<compile_context>
chip_gen: v7x
topology: tpu7x:2x2x1
jax: 0.10.0
libtpu: 0.0.40
codegen_flags: <defaults>
</compile_context>

<pallas_src>
import functools

import jax
import jax.numpy as jnp
from jax.experimental import pallas as pl
from jax.experimental.pallas import tpu as pltpu  # noqa: F401  (TPU backend)


# ----------------------------------------------------------------------------
# Fused Pallas kernel: full network forward
# ----------------------------------------------------------------------------

def _fused_forward_kernel(x_ref, adj_ref, enc_w_ref, enc_b_ref,
                          qkv_w_ref, qkv_b_ref, e_ref, o_w_ref, o_b_ref,
                          ln_ref, ff1_w_ref, ff1_b_ref, ff2_w_ref, ff2_b_ref,
                          head_w_ref, head_b_ref, out_ref,
                          *, n_layers, num_heads, gamma, clamp):
    f32 = jnp.float32
    x = x_ref[...].astype(f32)            # (N, dim_in)
    adj = adj_ref[...].astype(f32)        # (N, N), adj[i, j] = weight of edge j -> i

    n = x.shape[0]
    d = enc_w_ref.shape[1]
    dh = d // num_heads
    scale = 1.0 / (dh ** 0.5)
    inv_g = 1.0 / (gamma + 1.0)
    g_frac = gamma / (gamma + 1.0)

    # Fake-edge (non-edge) mask: computed once, reused by every layer / head.
    # TODO(synk): negate_edge_index also respects batch boundaries / self-loop
    # handling; a single dense graph is assumed and the complement of adj is used.
    fake_mask = (adj == 0.0).astype(f32)

    def layer_norm(h, g, b):
        mean = jnp.mean(h, axis=-1, keepdims=True)
        var = jnp.mean(jnp.square(h - mean), axis=-1, keepdims=True)
        return (h - mean) * jax.lax.rsqrt(var + 1e-5) * g + b

    # ---- FeatureEncoder: linear node encoder dim_in -> D (layers_pre_mp = 0) ----
    h = jnp.dot(x, enc_w_ref[...].astype(f32),
                preferred_element_type=f32) + enc_b_ref[...].astype(f32)

    # ---- Stack of WeightedSANLayer ----
    for l in range(n_layers):
        h_in1 = h

        # One fused 6-way projection: (N, D) x (D, 6D) -> [Q | K | V | Q2 | K2 | V2]
        qkv = jnp.dot(h, qkv_w_ref[l].astype(f32),
                      preferred_element_type=f32) + qkv_b_ref[l].astype(f32)
        q1a = qkv[:, 0 * d:1 * d]
        k1a = qkv[:, 1 * d:2 * d]
        v1a = qkv[:, 2 * d:3 * d]
        q2a = qkv[:, 3 * d:4 * d]
        k2a = qkv[:, 4 * d:5 * d]
        v2a = qkv[:, 5 * d:6 * d]

        # Edge-projection coefficients, attention scale folded in once:
        #   row 0 = E_w (scalar-weight slope), row 1 = E_b, row 2 = E2_b (fake edges).
        e = e_ref[l].astype(f32) * scale          # (3, D)

        head_outs = []
        for hh in range(num_heads):
            lo = hh * dh
            q1 = q1a[:, lo:lo + dh]
            k1 = k1a[:, lo:lo + dh]
            v1 = v1a[:, lo:lo + dh]
            q2 = q2a[:, lo:lo + dh]
            k2 = k2a[:, lo:lo + dh]
            v2 = v2a[:, lo:lo + dh]
            ew = e[0:1, lo:lo + dh]
            eb = e[1:2, lo:lo + dh]
            eb2 = e[2:3, lo:lo + dh]

            # --- real-edge branch ---
            # score[i,j] = sum_d Q[i,d] K[j,d] (adj[i,j] * E_w[d] + E_b[d]) / sqrt(dh)
            # One stacked (2N, dh) x (dh, N) matmul gives both the weight-dependent
            # part (s[:n]) and the bias part (s[n:]).
            qs = jnp.concatenate([q1 * ew, q1 * eb], axis=0)
            s = jnp.dot(qs, k1.T, preferred_element_type=f32)      # (2N, N)
            s_real = jnp.clip(adj * s[:n, :] + s[n:, :], -clamp, clamp)
            p_real = jnp.exp(s_real) * adj       # zero on non-edges, scaled by weight
            z_real = jnp.sum(p_real, axis=-1, keepdims=True) + 1e-6

            # --- fake-edge branch (complement of the weighted adjacency) ---
            # dummy zero edge attribute -> E_2 reduces to its bias eb2.
            s_fake = jnp.clip(jnp.dot(q2 * eb2, k2.T, preferred_element_type=f32),
                              -clamp, clamp)
            p_fake = jnp.exp(s_fake) * fake_mask
            z_fake = jnp.sum(p_fake, axis=-1, keepdims=True) + 1e-6

            # Fold softmax denominators and gamma mixing into the probabilities
            # -> a single (N, 2N) x (2N, dh) PV matmul per head.
            p_cat = jnp.concatenate(
                [p_real * (inv_g * pl.reciprocal(z_real, approx=True)),
                 p_fake * (g_frac * pl.reciprocal(z_fake, approx=True))], axis=1)
            v_cat = jnp.concatenate([v1, v2], axis=0)               # (2N, dh)
            head_outs.append(jnp.dot(p_cat, v_cat, preferred_element_type=f32))

        # Heads lane-concatenated -> one dense (N, D) x (D, D) O-projection matmul.
        attn = jnp.concatenate(head_outs, axis=1)                   # (N, D)
        h = h_in1 + jnp.dot(attn, o_w_ref[l].astype(f32),
                            preferred_element_type=f32) + o_b_ref[l].astype(f32)
        lnp = ln_ref[l].astype(f32)               # (4, D): ln1_g, ln1_b, ln2_g, ln2_b
        h = layer_norm(h, lnp[0:1, :], lnp[1:2, :])

        # FFN (expand 2x + ReLU) with residual + LayerNorm
        h_in2 = h
        hf = jnp.dot(h, ff1_w_ref[l].astype(f32),
                     preferred_element_type=f32) + ff1_b_ref[l].astype(f32)
        hf = jnp.maximum(hf, 0.0)
        hf = jnp.dot(hf, ff2_w_ref[l].astype(f32),
                     preferred_element_type=f32) + ff2_b_ref[l].astype(f32)
        h = h_in2 + hf
        h = layer_norm(h, lnp[2:3, :], lnp[3:4, :])

    # ---- post_mp: GNN node head (single linear) ----
    out = jnp.dot(h, head_w_ref[...].astype(f32),
                  preferred_element_type=f32) + head_b_ref[...].astype(f32)
    out_ref[...] = out.astype(out_ref.dtype)


def forward(params, x, adj, *, num_heads, gamma, clamp):
    """Entire WeightedSANTransformer forward as one pallas_call.

    All activations and weights (a few KB at these sizes) live in VMEM for the
    whole call, so there is a single launch and a single HBM round-trip.
    # TODO(synk): for large graphs (N in the thousands) add row tiling over
    # destination nodes (grid over node blocks, (tile_n, N) adj blocks) so the
    # dense adjacency fits v7x's 64 MiB VMEM.
    """
    n, _ = x.shape
    dim_out = params["head_w"].shape[1]
    n_layers = params["qkv_w"].shape[0]

    kernel = functools.partial(
        _fused_forward_kernel,
        n_layers=n_layers, num_heads=num_heads,
        gamma=float(gamma), clamp=float(clamp))

    return pl.pallas_call(
        kernel,
        out_shape=jax.ShapeDtypeStruct((n, dim_out), x.dtype),
    )(x, adj,
      params["enc_w"], params["enc_b"],
      params["qkv_w"], params["qkv_b"], params["e"],
      params["o_w"], params["o_b"], params["ln"],
      params["ff1_w"], params["ff1_b"], params["ff2_w"], params["ff2_b"],
      params["head_w"], params["head_b"])


# ----------------------------------------------------------------------------
# Parameter init (stacked/fused layout)
# ----------------------------------------------------------------------------

def _init_linear(key, din, dout):
    kw, kb = jax.random.split(key)
    w = jax.random.normal(kw, (din, dout), jnp.float32) * (1.0 / (din ** 0.5))
    b = jax.random.normal(kb, (dout,), jnp.float32) * 0.01
    return w, b


def init_params(key, dim_in, dim_hidden, num_heads, n_layers, dim_out):
    d = dim_hidden
    keys = jax.random.split(key, n_layers + 2)
    params = {}

    enc_w, enc_b = _init_linear(keys[0], dim_in, d)
    params["enc_w"], params["enc_b"] = enc_w, enc_b.reshape(1, d)

    qkv_w, qkv_b, e_p, o_w, o_b, ln_p = [], [], [], [], [], []
    ff1_w, ff1_b, ff2_w, ff2_b = [], [], [], []
    for l in range(n_layers):
        lk = jax.random.split(keys[1 + l], 11)
        ws, bs = [], []
        for i in range(6):                      # Q, K, V, Q2, K2, V2
            w, b = _init_linear(lk[i], d, d)
            ws.append(w)
            bs.append(b)
        qkv_w.append(jnp.concatenate(ws, axis=1))                  # (D, 6D)
        qkv_b.append(jnp.concatenate(bs).reshape(1, 6 * d))        # (1, 6D)

        ew, eb = _init_linear(lk[6], 1, d)      # E: scalar edge weight -> D
        _, eb2 = _init_linear(lk[7], 1, d)      # E2: fake edges (zero attr -> bias only)
        e_p.append(jnp.stack([ew.reshape(d), eb, eb2], axis=0))    # (3, D)

        w, b = _init_linear(lk[8], d, d)
        o_w.append(w)
        o_b.append(b.reshape(1, d))
        w, b = _init_linear(lk[9], d, 2 * d)
        ff1_w.append(w)
        ff1_b.append(b.reshape(1, 2 * d))
        w, b = _init_linear(lk[10], 2 * d, d)
        ff2_w.append(w)
        ff2_b.append(b.reshape(1, d))
        ln_p.append(jnp.stack([jnp.ones(d), jnp.zeros(d),
                               jnp.ones(d), jnp.zeros(d)], axis=0))  # (4, D)

    params["qkv_w"] = jnp.stack(qkv_w)
    params["qkv_b"] = jnp.stack(qkv_b)
    params["e"] = jnp.stack(e_p)
    params["o_w"] = jnp.stack(o_w)
    params["o_b"] = jnp.stack(o_b)
    params["ln"] = jnp.stack(ln_p)
    params["ff1_w"] = jnp.stack(ff1_w)
    params["ff1_b"] = jnp.stack(ff1_b)
    params["ff2_w"] = jnp.stack(ff2_w)
    params["ff2_b"] = jnp.stack(ff2_b)

    head_w, head_b = _init_linear(keys[-1], d, dim_out)
    params["head_w"], params["head_b"] = head_w, head_b.reshape(1, dim_out)
    return params


if __name__ == "__main__":
    N, DIM_IN, DIM_HIDDEN, NUM_HEADS, N_LAYERS, DIM_OUT = 16, 4, 32, 4, 2, 2
    GAMMA, CLAMP = 0.1, 5.0

    key = jax.random.PRNGKey(0)
    k_x, k_w, k_m, k_p = jax.random.split(key, 4)

    # node features and a sparse, symmetric, weighted adjacency (no self loops)
    x = jax.random.normal(k_x, (N, DIM_IN), jnp.float32)
    weights = jax.random.uniform(k_w, (N, N), jnp.float32, 0.1, 1.0)
    mask = (jax.random.uniform(k_m, (N, N)) < 0.3).astype(jnp.float32)
    adj = weights * mask
    adj = jnp.maximum(adj, adj.T) * (1.0 - jnp.eye(N, dtype=jnp.float32))

    params = init_params(k_p, DIM_IN, DIM_HIDDEN, NUM_HEADS, N_LAYERS, DIM_OUT)

    fwd = jax.jit(functools.partial(forward, num_heads=NUM_HEADS,
                                    gamma=GAMMA, clamp=CLAMP))
    out = jax.block_until_ready(fwd(params, x, adj))

    assert out.shape == (N, DIM_OUT), out.shape
    assert bool(jnp.all(jnp.isfinite(out)))
    print("KERNEL_OK")
</pallas_src>

<mosaic_0001>
module attributes {stable_mosaic.version = 11 : i64} {
  func.func @_fused_forward_kernel(%arg0: memref<16x4xf32, #tpu.memory_space<vmem>>, %arg1: memref<16x16xf32, #tpu.memory_space<vmem>>, %arg2: memref<4x32xf32, #tpu.memory_space<vmem>>, %arg3: memref<1x32xf32, #tpu.memory_space<vmem>>, %arg4: memref<2x32x192xf32, #tpu.memory_space<vmem>>, %arg5: memref<2x1x192xf32, #tpu.memory_space<vmem>>, %arg6: memref<2x3x32xf32, #tpu.memory_space<vmem>>, %arg7: memref<2x32x32xf32, #tpu.memory_space<vmem>>, %arg8: memref<2x1x32xf32, #tpu.memory_space<vmem>>, %arg9: memref<2x4x32xf32, #tpu.memory_space<vmem>>, %arg10: memref<2x32x64xf32, #tpu.memory_space<vmem>>, %arg11: memref<2x1x64xf32, #tpu.memory_space<vmem>>, %arg12: memref<2x64x32xf32, #tpu.memory_space<vmem>>, %arg13: memref<2x1x32xf32, #tpu.memory_space<vmem>>, %arg14: memref<32x2xf32, #tpu.memory_space<vmem>>, %arg15: memref<1x2xf32, #tpu.memory_space<vmem>>, %arg16: memref<16x2xf32, #tpu.memory_space<vmem>>) attributes {dimension_semantics = [], scalar_prefetch = 0 : i64, scratch_operands = 0 : i64, tpu.core_type = #tpu.core_type<tc>} {
    %c0 = arith.constant 0 : index
    %c0_0 = arith.constant 0 : index
    %0 = vector.load %arg0[%c0, %c0_0] : memref<16x4xf32, #tpu.memory_space<vmem>>, vector<16x4xf32>
    %c0_1 = arith.constant 0 : index
    %c0_2 = arith.constant 0 : index
    %1 = vector.load %arg1[%c0_1, %c0_2] : memref<16x16xf32, #tpu.memory_space<vmem>>, vector<16x16xf32>
    %cst = arith.constant 0.000000e+00 : f32
    %2 = vector.broadcast %cst : f32 to vector<16x16xf32>
    %3 = arith.cmpf oeq, %1, %2 : vector<16x16xf32>
    %4 = arith.extui %3 : vector<16x16xi1> to vector<16x16xi32>
    %5 = arith.sitofp %4 : vector<16x16xi32> to vector<16x16xf32>
    %c0_3 = arith.constant 0 : index
    %c0_4 = arith.constant 0 : index
    %6 = vector.load %arg2[%c0_3, %c0_4] : memref<4x32xf32, #tpu.memory_space<vmem>>, vector<4x32xf32>
    %cst_5 = arith.constant dense<0.000000e+00> : vector<16x32xf32>
    %7 = tpu.matmul %0, %6, %cst_5 {dimension_numbers = #tpu.dot_dimension_numbers<[1], [0], [0], [1], [0, 0, 1, 1], [], []>} : vector<16x4xf32>, vector<4x32xf32>, vector<16x32xf32> -> vector<16x32xf32>
    %c0_6 = arith.constant 0 : index
    %c0_7 = arith.constant 0 : index
    %8 = vector.load %arg3[%c0_6, %c0_7] : memref<1x32xf32, #tpu.memory_space<vmem>>, vector<1x32xf32>
    %9 = vector.broadcast %8 : vector<1x32xf32> to vector<16x32xf32>
    %10 = arith.addf %7, %9 : vector<16x32xf32>
    %c0_8 = arith.constant 0 : index
    %c0_9 = arith.constant 0 : index
    %c0_10 = arith.constant 0 : index
    %11 = vector.load %arg4[%c0_8, %c0_9, %c0_10] : memref<2x32x192xf32, #tpu.memory_space<vmem>>, vector<1x32x192xf32>
    %12 = vector.shape_cast %11 : vector<1x32x192xf32> to vector<32x192xf32>
    %cst_11 = arith.constant dense<0.000000e+00> : vector<16x192xf32>
    %13 = tpu.matmul %10, %12, %cst_11 {dimension_numbers = #tpu.dot_dimension_numbers<[1], [0], [0], [1], [0, 0, 1, 1], [], []>} : vector<16x32xf32>, vector<32x192xf32>, vector<16x192xf32> -> vector<16x192xf32>
    %c0_12 = arith.constant 0 : index
    %c0_13 = arith.constant 0 : index
    %c0_14 = arith.constant 0 : index
    %14 = vector.load %arg5[%c0_12, %c0_13, %c0_14] : memref<2x1x192xf32, #tpu.memory_space<vmem>>, vector<1x1x192xf32>
    %15 = vector.shape_cast %14 : vector<1x1x192xf32> to vector<1x192xf32>
    %16 = vector.broadcast %15 : vector<1x192xf32> to vector<16x192xf32>
    %17 = arith.addf %13, %16 : vector<16x192xf32>
    %18 = vector.extract_strided_slice %17 {offsets = [0, 0], sizes = [16, 32], strides = [1, 1]} : vector<16x192xf32> to vector<16x32xf32>
    %19 = vector.extract_strided_slice %17 {offsets = [0, 32], sizes = [16, 32], strides = [1, 1]} : vector<16x192xf32> to vector<16x32xf32>
    %20 = vector.extract_strided_slice %17 {offsets = [0, 64], sizes = [16, 32], strides = [1, 1]} : vector<16x192xf32> to vector<16x32xf32>
    %21 = vector.extract_strided_slice %17 {offsets = [0, 96], sizes = [16, 32], strides = [1, 1]} : vector<16x192xf32> to vector<16x32xf32>
    %22 = vector.extract_strided_slice %17 {offsets = [0, 128], sizes = [16, 32], strides = [1, 1]} : vector<16x192xf32> to vector<16x32xf32>
    %23 = vector.extract_strided_slice %17 {offsets = [0, 160], sizes = [16, 32], strides = [1, 1]} : vector<16x192xf32> to vector<16x32xf32>
    %c0_15 = arith.constant 0 : index
    %c0_16 = arith.constant 0 : index
    %c0_17 = arith.constant 0 : index
    %24 = vector.load %arg6[%c0_15, %c0_16, %c0_17] : memref<2x3x32xf32, #tpu.memory_space<vmem>>, vector<1x3x32xf32>
    %25 = vector.shape_cast %24 : vector<1x3x32xf32> to vector<3x32xf32>
    %cst_18 = arith.constant 0.353553385 : f32
    %26 = vector.broadcast %cst_18 : f32 to vector<3x32xf32>
    %27 = arith.mulf %25, %26 : vector<3x32xf32>
    %28 = vector.extract_strided_slice %18 {offsets = [0, 0], sizes = [16, 8], strides = [1, 1]} : vector<16x32xf32> to vector<16x8xf32>
    %29 = vector.extract_strided_slice %19 {offsets = [0, 0], sizes = [16, 8], strides = [1, 1]} : vector<16x32xf32> to vector<16x8xf32>
    %30 = vector.extract_strided_slice %20 {offsets = [0, 0], sizes = [16, 8], strides = [1, 1]} : vector<16x32xf32> to vector<16x8xf32>
    %31 = vector.extract_strided_slice %21 {offsets = [0, 0], sizes = [16, 8], strides = [1, 1]} : vector<16x32xf32> to vector<16x8xf32>
    %32 = vector.extract_strided_slice %22 {offsets = [0, 0], sizes = [16, 8], strides = [1, 1]} : vector<16x32xf32> to vector<16x8xf32>
    %33 = vector.extract_strided_slice %23 {offsets = [0, 0], sizes = [16, 8], strides = [1, 1]} : vector<16x32xf32> to vector<16x8xf32>
    %34 = vector.extract_strided_slice %27 {offsets = [0, 0], sizes = [1, 8], strides = [1, 1]} : vector<3x32xf32> to vector<1x8xf32>
    %35 = vector.extract_strided_slice %27 {offsets = [1, 0], sizes = [1, 8], strides = [1, 1]} : vector<3x32xf32> to vector<1x8xf32>
    %36 = vector.extract_strided_slice %27 {offsets = [2, 0], sizes = [1, 8], strides = [1, 1]} : vector<3x32xf32> to vector<1x8xf32>
    %37 = vector.broadcast %34 : vector<1x8xf32> to vector<16x8xf32>
    %38 = arith.mulf %28, %37 : vector<16x8xf32>
    %39 = vector.broadcast %35 : vector<1x8xf32> to vector<16x8xf32>
    %40 = arith.mulf %28, %39 : vector<16x8xf32>
    %41 = tpu.concatenate %38, %40 in 0 : vector<16x8xf32>, vector<16x8xf32> -> vector<32x8xf32>
    %42 = tpu.transpose %29, [1, 0] : vector<16x8xf32> -> vector<8x16xf32>
    %cst_19 = arith.constant dense<0.000000e+00> : vector<32x16xf32>
    %43 = tpu.matmul %41, %42, %cst_19 {dimension_numbers = #tpu.dot_dimension_numbers<[1], [0], [0], [1], [0, 0, 1, 1], [], []>} : vector<32x8xf32>, vector<8x16xf32>, vector<32x16xf32> -> vector<32x16xf32>
    %44 = vector.extract_strided_slice %43 {offsets = [0, 0], sizes = [16, 16], strides = [1, 1]} : vector<32x16xf32> to vector<16x16xf32>
    %45 = arith.mulf %1, %44 : vector<16x16xf32>
    %46 = vector.extract_strided_slice %43 {offsets = [16, 0], sizes = [16, 16], strides = [1, 1]} : vector<32x16xf32> to vector<16x16xf32>
    %47 = arith.addf %45, %46 : vector<16x16xf32>
    %cst_20 = arith.constant -5.000000e+00 : f32
    %cst_21 = arith.constant 5.000000e+00 : f32
    %48 = vector.broadcast %cst_20 : f32 to vector<16x16xf32>
    %49 = arith.maximumf %48, %47 : vector<16x16xf32>
    %50 = vector.broadcast %cst_21 : f32 to vector<16x16xf32>
    %51 = arith.minimumf %50, %49 : vector<16x16xf32>
    %52 = math.exp %51 : vector<16x16xf32>
    %53 = arith.mulf %52, %1 : vector<16x16xf32>
    %cst_22 = arith.constant dense<0.000000e+00> : vector<16xf32>
    %54 = vector.multi_reduction <add>, %53, %cst_22 [1] : vector<16x16xf32> to vector<16xf32>
    %55 = vector.shape_cast %54 : vector<16xf32> to vector<16x1xf32>
    %cst_23 = arith.constant 9.99999997E-7 : f32
    %56 = vector.broadcast %cst_23 : f32 to vector<16x1xf32>
    %57 = arith.addf %55, %56 : vector<16x1xf32>
    %58 = vector.broadcast %36 : vector<1x8xf32> to vector<16x8xf32>
    %59 = arith.mulf %31, %58 : vector<16x8xf32>
    %60 = tpu.transpose %32, [1, 0] : vector<16x8xf32> -> vector<8x16xf32>
    %cst_24 = arith.constant dense<0.000000e+00> : vector<16x16xf32>
    %61 = tpu.matmul %59, %60, %cst_24 {dimension_numbers = #tpu.dot_dimension_numbers<[1], [0], [0], [1], [0, 0, 1, 1], [], []>} : vector<16x8xf32>, vector<8x16xf32>, vector<16x16xf32> -> vector<16x16xf32>
    %cst_25 = arith.constant -5.000000e+00 : f32
    %cst_26 = arith.constant 5.000000e+00 : f32
    %62 = vector.broadcast %cst_25 : f32 to vector<16x16xf32>
    %63 = arith.maximumf %62, %61 : vector<16x16xf32>
    %64 = vector.broadcast %cst_26 : f32 to vector<16x16xf32>
    %65 = arith.minimumf %64, %63 : vector<16x16xf32>
    %66 = math.exp %65 : vector<16x16xf32>
    %67 = arith.mulf %66, %5 : vector<16x16xf32>
    %cst_27 = arith.constant dense<0.000000e+00> : vector<16xf32>
    %68 = vector.multi_reduction <add>, %67, %cst_27 [1] : vector<16x16xf32> to vector<16xf32>
    %69 = vector.shape_cast %68 : vector<16xf32> to vector<16x1xf32>
    %cst_28 = arith.constant 9.99999997E-7 : f32
    %70 = vector.broadcast %cst_28 : f32 to vector<16x1xf32>
    %71 = arith.addf %69, %70 : vector<16x1xf32>
    %72 = tpu.reciprocal %57 {approx = true} : vector<16x1xf32> -> vector<16x1xf32>
    %cst_29 = arith.constant 0.909090936 : f32
    %73 = vector.broadcast %cst_29 : f32 to vector<16x1xf32>
    %74 = arith.mulf %73, %72 : vector<16x1xf32>
    %75 = vector.broadcast %74 : vector<16x1xf32> to vector<16x16xf32>
    %76 = arith.mulf %53, %75 : vector<16x16xf32>
    %77 = tpu.reciprocal %71 {approx = true} : vector<16x1xf32> -> vector<16x1xf32>
    %cst_30 = arith.constant 0.0909090936 : f32
    %78 = vector.broadcast %cst_30 : f32 to vector<16x1xf32>
    %79 = arith.mulf %78, %77 : vector<16x1xf32>
    %80 = vector.broadcast %79 : vector<16x1xf32> to vector<16x16xf32>
    %81 = arith.mulf %67, %80 : vector<16x16xf32>
    %82 = tpu.concatenate %76, %81 in 1 : vector<16x16xf32>, vector<16x16xf32> -> vector<16x32xf32>
    %83 = tpu.concatenate %30, %33 in 0 : vector<16x8xf32>, vector<16x8xf32> -> vector<32x8xf32>
    %cst_31 = arith.constant dense<0.000000e+00> : vector<16x8xf32>
    %84 = tpu.matmul %82, %83, %cst_31 {dimension_numbers = #tpu.dot_dimension_numbers<[1], [0], [0], [1], [0, 0, 1, 1], [], []>} : vector<16x32xf32>, vector<32x8xf32>, vector<16x8xf32> -> vector<16x8xf32>
    %85 = vector.extract_strided_slice %18 {offsets = [0, 8], sizes = [16, 8], strides = [1, 1]} : vector<16x32xf32> to vector<16x8xf32>
    %86 = vector.extract_strided_slice %19 {offsets = [0, 8], sizes = [16, 8], strides = [1, 1]} : vector<16x32xf32> to vector<16x8xf32>
    %87 = vector.extract_strided_slice %20 {offsets = [0, 8], sizes = [16, 8], strides = [1, 1]} : vector<16x32xf32> to vector<16x8xf32>
    %88 = vector.extract_strided_slice %21 {offsets = [0, 8], sizes = [16, 8], strides = [1, 1]} : vector<16x32xf32> to vector<16x8xf32>
    %89 = vector.extract_strided_slice %22 {offsets = [0, 8], sizes = [16, 8], strides = [1, 1]} : vector<16x32xf32> to vector<16x8xf32>
    %90 = vector.extract_strided_slice %23 {offsets = [0, 8], sizes = [16, 8], strides = [1, 1]} : vector<16x32xf32> to vector<16x8xf32>
    %91 = vector.extract_strided_slice %27 {offsets = [0, 8], sizes = [1, 8], strides = [1, 1]} : vector<3x32xf32> to vector<1x8xf32>
    %92 = vector.extract_strided_slice %27 {offsets = [1, 8], sizes = [1, 8], strides = [1, 1]} : vector<3x32xf32> to vector<1x8xf32>
    %93 = vector.extract_strided_slice %27 {offsets = [2, 8], sizes = [1, 8], strides = [1, 1]} : vector<3x32xf32> to vector<1x8xf32>
    %94 = vector.broadcast %91 : vector<1x8xf32> to vector<16x8xf32>
    %95 = arith.mulf %85, %94 : vector<16x8xf32>
    %96 = vector.broadcast %92 : vector<1x8xf32> to vector<16x8xf32>
    %97 = arith.mulf %85, %96 : vector<16x8xf32>
    %98 = tpu.concatenate %95, %97 in 0 : vector<16x8xf32>, vector<16x8xf32> -> vector<32x8xf32>
    %99 = tpu.transpose %86, [1, 0] : vector<16x8xf32> -> vector<8x16xf32>
    %cst_32 = arith.constant dense<0.000000e+00> : vector<32x16xf32>
    %100 = tpu.matmul %98, %99, %cst_32 {dimension_numbers = #tpu.dot_dimension_numbers<[1], [0], [0], [1], [0, 0, 1, 1], [], []>} : vector<32x8xf32>, vector<8x16xf32>, vector<32x16xf32> -> vector<32x16xf32>
    %101 = vector.extract_strided_slice %100 {offsets = [0, 0], sizes = [16, 16], strides = [1, 1]} : vector<32x16xf32> to vector<16x16xf32>
    %102 = arith.mulf %1, %101 : vector<16x16xf32>
    %103 = vector.extract_strided_slice %100 {offsets = [16, 0], sizes = [16, 16], strides = [1, 1]} : vector<32x16xf32> to vector<16x16xf32>
    %104 = arith.addf %102, %103 : vector<16x16xf32>
    %cst_33 = arith.constant -5.000000e+00 : f32
    %cst_34 = arith.constant 5.000000e+00 : f32
    %105 = vector.broadcast %cst_33 : f32 to vector<16x16xf32>
    %106 = arith.maximumf %105, %104 : vector<16x16xf32>
    %107 = vector.broadcast %cst_34 : f32 to vector<16x16xf32>
    %108 = arith.minimumf %107, %106 : vector<16x16xf32>
    %109 = math.exp %108 : vector<16x16xf32>
    %110 = arith.mulf %109, %1 : vector<16x16xf32>
    %cst_35 = arith.constant dense<0.000000e+00> : vector<16xf32>
    %111 = vector.multi_reduction <add>, %110, %cst_35 [1] : vector<16x16xf32> to vector<16xf32>
    %112 = vector.shape_cast %111 : vector<16xf32> to vector<16x1xf32>
    %cst_36 = arith.constant 9.99999997E-7 : f32
    %113 = vector.broadcast %cst_36 : f32 to vector<16x1xf32>
    %114 = arith.addf %112, %113 : vector<16x1xf32>
    %115 = vector.broadcast %93 : vector<1x8xf32> to vector<16x8xf32>
    %116 = arith.mulf %88, %115 : vector<16x8xf32>
    %117 = tpu.transpose %89, [1, 0] : vector<16x8xf32> -> vector<8x16xf32>
    %cst_37 = arith.constant dense<0.000000e+00> : vector<16x16xf32>
    %118 = tpu.matmul %116, %117, %cst_37 {dimension_numbers = #tpu.dot_dimension_numbers<[1], [0], [0], [1], [0, 0, 1, 1], [], []>} : vector<16x8xf32>, vector<8x16xf32>, vector<16x16xf32> -> vector<16x16xf32>
    %cst_38 = arith.constant -5.000000e+00 : f32
    %cst_39 = arith.constant 5.000000e+00 : f32
    %119 = vector.broadcast %cst_38 : f32 to vector<16x16xf32>
    %120 = arith.maximumf %119, %118 : vector<16x16xf32>
    %121 = vector.broadcast %cst_39 : f32 to vector<16x16xf32>
    %122 = arith.minimumf %121, %120 : vector<16x16xf32>
    %123 = math.exp %122 : vector<16x16xf32>
    %124 = arith.mulf %123, %5 : vector<16x16xf32>
    %cst_40 = arith.constant dense<0.000000e+00> : vector<16xf32>
    %125 = vector.multi_reduction <add>, %124, %cst_40 [1] : vector<16x16xf32> to vector<16xf32>
    %126 = vector.shape_cast %125 : vector<16xf32> to vector<16x1xf32>
    %cst_41 = arith.constant 9.99999997E-7 : f32
    %127 = vector.broadcast %cst_41 : f32 to vector<16x1xf32>
    %128 = arith.addf %126, %127 : vector<16x1xf32>
    %129 = tpu.reciprocal %114 {approx = true} : vector<16x1xf32> -> vector<16x1xf32>
    %cst_42 = arith.constant 0.909090936 : f32
    %130 = vector.broadcast %cst_42 : f32 to vector<16x1xf32>
    %131 = arith.mulf %130, %129 : vector<16x1xf32>
    %132 = vector.broadcast %131 : vector<16x1xf32> to vector<16x16xf32>
    %133 = arith.mulf %110, %132 : vector<16x16xf32>
    %134 = tpu.reciprocal %128 {approx = true} : vector<16x1xf32> -> vector<16x1xf32>
    %cst_43 = arith.constant 0.0909090936 : f32
    %135 = vector.broadcast %cst_43 : f32 to vector<16x1xf32>
    %136 = arith.mulf %135, %134 : vector<16x1xf32>
    %137 = vector.broadcast %136 : vector<16x1xf32> to vector<16x16xf32>
    %138 = arith.mulf %124, %137 : vector<16x16xf32>
    %139 = tpu.concatenate %133, %138 in 1 : vector<16x16xf32>, vector<16x16xf32> -> vector<16x32xf32>
    %140 = tpu.concatenate %87, %90 in 0 : vector<16x8xf32>, vector<16x8xf32> -> vector<32x8xf32>
    %cst_44 = arith.constant dense<0.000000e+00> : vector<16x8xf32>
    %141 = tpu.matmul %139, %140, %cst_44 {dimension_numbers = #tpu.dot_dimension_numbers<[1], [0], [0], [1], [0, 0, 1, 1], [], []>} : vector<16x32xf32>, vector<32x8xf32>, vector<16x8xf32> -> vector<16x8xf32>
    %142 = vector.extract_strided_slice %18 {offsets = [0, 16], sizes = [16, 8], strides = [1, 1]} : vector<16x32xf32> to vector<16x8xf32>
    %143 = vector.extract_strided_slice %19 {offsets = [0, 16], sizes = [16, 8], strides = [1, 1]} : vector<16x32xf32> to vector<16x8xf32>
    %144 = vector.extract_strided_slice %20 {offsets = [0, 16], sizes = [16, 8], strides = [1, 1]} : vector<16x32xf32> to vector<16x8xf32>
    %145 = vector.extract_strided_slice %21 {offsets = [0, 16], sizes = [16, 8], strides = [1, 1]} : vector<16x32xf32> to vector<16x8xf32>
    %146 = vector.extract_strided_slice %22 {offsets = [0, 16], sizes = [16, 8], strides = [1, 1]} : vector<16x32xf32> to vector<16x8xf32>
    %147 = vector.extract_strided_slice %23 {offsets = [0, 16], sizes = [16, 8], strides = [1, 1]} : vector<16x32xf32> to vector<16x8xf32>
    %148 = vector.extract_strided_slice %27 {offsets = [0, 16], sizes = [1, 8], strides = [1, 1]} : vector<3x32xf32> to vector<1x8xf32>
    %149 = vector.extract_strided_slice %27 {offsets = [1, 16], sizes = [1, 8], strides = [1, 1]} : vector<3x32xf32> to vector<1x8xf32>
    %150 = vector.extract_strided_slice %27 {offsets = [2, 16], sizes = [1, 8], strides = [1, 1]} : vector<3x32xf32> to vector<1x8xf32>
    %151 = vector.broadcast %148 : vector<1x8xf32> to vector<16x8xf32>
    %152 = arith.mulf %142, %151 : vector<16x8xf32>
    %153 = vector.broadcast %149 : vector<1x8xf32> to vector<16x8xf32>
    %154 = arith.mulf %142, %153 : vector<16x8xf32>
    %155 = tpu.concatenate %152, %154 in 0 : vector<16x8xf32>, vector<16x8xf32> -> vector<32x8xf32>
    %156 = tpu.transpose %143, [1, 0] : vector<16x8xf32> -> vector<8x16xf32>
    %cst_45 = arith.constant dense<0.000000e+00> : vector<32x16xf32>
    %157 = tpu.matmul %155, %156, %cst_45 {dimension_numbers = #tpu.dot_dimension_numbers<[1], [0], [0], [1], [0, 0, 1, 1], [], []>} : vector<32x8xf32>, vector<8x16xf32>, vector<32x16xf32> -> vector<32x16xf32>
    %158 = vector.extract_strided_slice %157 {offsets = [0, 0], sizes = [16, 16], strides = [1, 1]} : vector<32x16xf32> to vector<16x16xf32>
    %159 = arith.mulf %1, %158 : vector<16x16xf32>
    %160 = vector.extract_strided_slice %157 {offsets = [16, 0], sizes = [16, 16], strides = [1, 1]} : vector<32x16xf32> to vector<16x16xf32>
    %161 = arith.addf %159, %160 : vector<16x16xf32>
    %cst_46 = arith.constant -5.000000e+00 : f32
    %cst_47 = arith.constant 5.000000e+00 : f32
    %162 = vector.broadcast %cst_46 : f32 to vector<16x16xf32>
    %163 = arith.maximumf %162, %161 : vector<16x16xf32>
    %164 = vector.broadcast %cst_47 : f32 to vector<16x16xf32>
    %165 = arith.minimumf %164, %163 : vector<16x16xf32>
    %166 = math.exp %165 : vector<16x16xf32>
    %167 = arith.mulf %166, %1 : vector<16x16xf32>
    %cst_48 = arith.constant dense<0.000000e+00> : vector<16xf32>
    %168 = vector.multi_reduction <add>, %167, %cst_48 [1] : vector<16x16xf32> to vector<16xf32>
    %169 = vector.shape_cast %168 : vector<16xf32> to vector<16x1xf32>
    %cst_49 = arith.constant 9.99999997E-7 : f32
    %170 = vector.broadcast %cst_49 : f32 to vector<16x1xf32>
    %171 = arith.addf %169, %170 : vector<16x1xf32>
    %172 = vector.broadcast %150 : vector<1x8xf32> to vector<16x8xf32>
    %173 = arith.mulf %145, %172 : vector<16x8xf32>
    %174 = tpu.transpose %146, [1, 0] : vector<16x8xf32> -> vector<8x16xf32>
    %cst_50 = arith.constant dense<0.000000e+00> : vector<16x16xf32>
    %175 = tpu.matmul %173, %174, %cst_50 {dimension_numbers = #tpu.dot_dimension_numbers<[1], [0], [0], [1], [0, 0, 1, 1], [], []>} : vector<16x8xf32>, vector<8x16xf32>, vector<16x16xf32> -> vector<16x16xf32>
    %cst_51 = arith.constant -5.000000e+00 : f32
    %cst_52 = arith.constant 5.000000e+00 : f32
    %176 = vector.broadcast %cst_51 : f32 to vector<16x16xf32>
    %177 = arith.maximumf %176, %175 : vector<16x16xf32>
    %178 = vector.broadcast %cst_52 : f32 to vector<16x16xf32>
    %179 = arith.minimumf %178, %177 : vector<16x16xf32>
    %180 = math.exp %179 : vector<16x16xf32>
    %181 = arith.mulf %180, %5 : vector<16x16xf32>
    %cst_53 = arith.constant dense<0.000000e+00> : vector<16xf32>
    %182 = vector.multi_reduction <add>, %181, %cst_53 [1] : vector<16x16xf32> to vector<16xf32>
    %183 = vector.shape_cast %182 : vector<16xf32> to vector<16x1xf32>
    %cst_54 = arith.constant 9.99999997E-7 : f32
    %184 = vector.broadcast %cst_54 : f32 to vector<16x1xf32>
    %185 = arith.addf %183, %184 : vector<16x1xf32>
    %186 = tpu.reciprocal %171 {approx = true} : vector<16x1xf32> -> vector<16x1xf32>
    %cst_55 = arith.constant 0.909090936 : f32
    %187 = vector.broadcast %cst_55 : f32 to vector<16x1xf32>
    %188 = arith.mulf %187, %186 : vector<16x1xf32>
    %189 = vector.broadcast %188 : vector<16x1xf32> to vector<16x16xf32>
    %190 = arith.mulf %167, %189 : vector<16x16xf32>
    %191 = tpu.reciprocal %185 {approx = true} : vector<16x1xf32> -> vector<16x1xf32>
    %cst_56 = arith.constant 0.0909090936 : f32
    %192 = vector.broadcast %cst_56 : f32 to vector<16x1xf32>
    %193 = arith.mulf %192, %191 : vector<16x1xf32>
    %194 = vector.broadcast %193 : vector<16x1xf32> to vector<16x16xf32>
    %195 = arith.mulf %181, %194 : vector<16x16xf32>
    %196 = tpu.concatenate %190, %195 in 1 : vector<16x16xf32>, vector<16x16xf32> -> vector<16x32xf32>
    %197 = tpu.concatenate %144, %147 in 0 : vector<16x8xf32>, vector<16x8xf32> -> vector<32x8xf32>
    %cst_57 = arith.constant dense<0.000000e+00> : vector<16x8xf32>
    %198 = tpu.matmul %196, %197, %cst_57 {dimension_numbers = #tpu.dot_dimension_numbers<[1], [0], [0], [1], [0, 0, 1, 1], [], []>} : vector<16x32xf32>, vector<32x8xf32>, vector<16x8xf32> -> vector<16x8xf32>
    %199 = vector.extract_strided_slice %18 {offsets = [0, 24], sizes = [16, 8], strides = [1, 1]} : vector<16x32xf32> to vector<16x8xf32>
    %200 = vector.extract_strided_slice %19 {offsets = [0, 24], sizes = [16, 8], strides = [1, 1]} : vector<16x32xf32> to vector<16x8xf32>
    %201 = vector.extract_strided_slice %20 {offsets = [0, 24], sizes = [16, 8], strides = [1, 1]} : vector<16x32xf32> to vector<16x8xf32>
    %202 = vector.extract_strided_slice %21 {offsets = [0, 24], sizes = [16, 8], strides = [1, 1]} : vector<16x32xf32> to vector<16x8xf32>
    %203 = vector.extract_strided_slice %22 {offsets = [0, 24], sizes = [16, 8], strides = [1, 1]} : vector<16x32xf32> to vector<16x8xf32>
    %204 = vector.extract_strided_slice %23 {offsets = [0, 24], sizes = [16, 8], strides = [1, 1]} : vector<16x32xf32> to vector<16x8xf32>
    %205 = vector.extract_strided_slice %27 {offsets = [0, 24], sizes = [1, 8], strides = [1, 1]} : vector<3x32xf32> to vector<1x8xf32>
    %206 = vector.extract_strided_slice %27 {offsets = [1, 24], sizes = [1, 8], strides = [1, 1]} : vector<3x32xf32> to vector<1x8xf32>
    %207 = vector.extract_strided_slice %27 {offsets = [2, 24], sizes = [1, 8], strides = [1, 1]} : vector<3x32xf32> to vector<1x8xf32>
    %208 = vector.broadcast %205 : vector<1x8xf32> to vector<16x8xf32>
    %209 = arith.mulf %199, %208 : vector<16x8xf32>
    %210 = vector.broadcast %206 : vector<1x8xf32> to vector<16x8xf32>
    %211 = arith.mulf %199, %210 : vector<16x8xf32>
    %212 = tpu.concatenate %209, %211 in 0 : vector<16x8xf32>, vector<16x8xf32> -> vector<32x8xf32>
    %213 = tpu.transpose %200, [1, 0] : vector<16x8xf32> -> vector<8x16xf32>
    %cst_58 = arith.constant dense<0.000000e+00> : vector<32x16xf32>
    %214 = tpu.matmul %212, %213, %cst_58 {dimension_numbers = #tpu.dot_dimension_numbers<[1], [0], [0], [1], [0, 0, 1, 1], [], []>} : vector<32x8xf32>, vector<8x16xf32>, vector<32x16xf32> -> vector<32x16xf32>
    %215 = vector.extract_strided_slice %214 {offsets = [0, 0], sizes = [16, 16], strides = [1, 1]} : vector<32x16xf32> to vector<16x16xf32>
    %216 = arith.mulf %1, %215 : vector<16x16xf32>
    %217 = vector.extract_strided_slice %214 {offsets = [16, 0], sizes = [16, 16], strides = [1, 1]} : vector<32x16xf32> to vector<16x16xf32>
    %218 = arith.addf %216, %217 : vector<16x16xf32>
    %cst_59 = arith.constant -5.000000e+00 : f32
    %cst_60 = arith.constant 5.000000e+00 : f32
    %219 = vector.broadcast %cst_59 : f32 to vector<16x16xf32>
    %220 = arith.maximumf %219, %218 : vector<16x16xf32>
    %221 = vector.broadcast %cst_60 : f32 to vector<16x16xf32>
    %222 = arith.minimumf %221, %220 : vector<16x16xf32>
    %223 = math.exp %222 : vector<16x16xf32>
    %224 = arith.mulf %223, %1 : vector<16x16xf32>
    %cst_61 = arith.constant dense<0.000000e+00> : vector<16xf32>
    %225 = vector.multi_reduction <add>, %224, %cst_61 [1] : vector<16x16xf32> to vector<16xf32>
    %226 = vector.shape_cast %225 : vector<16xf32> to vector<16x1xf32>
    %cst_62 = arith.constant 9.99999997E-7 : f32
    %227 = vector.broadcast %cst_62 : f32 to vector<16x1xf32>
    %228 = arith.addf %226, %227 : vector<16x1xf32>
    %229 = vector.broadcast %207 : vector<1x8xf32> to vector<16x8xf32>
    %230 = arith.mulf %202, %229 : vector<16x8xf32>
    %231 = tpu.transpose %203, [1, 0] : vector<16x8xf32> -> vector<8x16xf32>
    %cst_63 = arith.constant dense<0.000000e+00> : vector<16x16xf32>
    %232 = tpu.matmul %230, %231, %cst_63 {dimension_numbers = #tpu.dot_dimension_numbers<[1], [0], [0], [1], [0, 0, 1, 1], [], []>} : vector<16x8xf32>, vector<8x16xf32>, vector<16x16xf32> -> vector<16x16xf32>
    %cst_64 = arith.constant -5.000000e+00 : f32
    %cst_65 = arith.constant 5.000000e+00 : f32
    %233 = vector.broadcast %cst_64 : f32 to vector<16x16xf32>
    %234 = arith.maximumf %233, %232 : vector<16x16xf32>
    %235 = vector.broadcast %cst_65 : f32 to vector<16x16xf32>
    %236 = arith.minimumf %235, %234 : vector<16x16xf32>
    %237 = math.exp %236 : vector<16x16xf32>
    %238 = arith.mulf %237, %5 : vector<16x16xf32>
    %cst_66 = arith.constant dense<0.000000e+00> : vector<16xf32>
    %239 = vector.multi_reduction <add>, %238, %cst_66 [1] : vector<16x16xf32> to vector<16xf32>
    %240 = vector.shape_cast %239 : vector<16xf32> to vector<16x1xf32>
    %cst_67 = arith.constant 9.99999997E-7 : f32
    %241 = vector.broadcast %cst_67 : f32 to vector<16x1xf32>
    %242 = arith.addf %240, %241 : vector<16x1xf32>
    %243 = tpu.reciprocal %228 {approx = true} : vector<16x1xf32> -> vector<16x1xf32>
    %cst_68 = arith.constant 0.909090936 : f32
    %244 = vector.broadcast %cst_68 : f32 to vector<16x1xf32>
    %245 = arith.mulf %244, %243 : vector<16x1xf32>
    %246 = vector.broadcast %245 : vector<16x1xf32> to vector<16x16xf32>
    %247 = arith.mulf %224, %246 : vector<16x16xf32>
    %248 = tpu.reciprocal %242 {approx = true} : vector<16x1xf32> -> vector<16x1xf32>
    %cst_69 = arith.constant 0.0909090936 : f32
    %249 = vector.broadcast %cst_69 : f32 to vector<16x1xf32>
    %250 = arith.mulf %249, %248 : vector<16x1xf32>
    %251 = vector.broadcast %250 : vector<16x1xf32> to vector<16x16xf32>
    %252 = arith.mulf %238, %251 : vector<16x16xf32>
    %253 = tpu.concatenate %247, %252 in 1 : vector<16x16xf32>, vector<16x16xf32> -> vector<16x32xf32>
    %254 = tpu.concatenate %201, %204 in 0 : vector<16x8xf32>, vector<16x8xf32> -> vector<32x8xf32>
    %cst_70 = arith.constant dense<0.000000e+00> : vector<16x8xf32>
    %255 = tpu.matmul %253, %254, %cst_70 {dimension_numbers = #tpu.dot_dimension_numbers<[1], [0], [0], [1], [0, 0, 1, 1], [], []>} : vector<16x32xf32>, vector<32x8xf32>, vector<16x8xf32> -> vector<16x8xf32>
    %256 = tpu.concatenate %84, %141, %198, %255 in 1 : vector<16x8xf32>, vector<16x8xf32>, vector<16x8xf32>, vector<16x8xf32> -> vector<16x32xf32>
    %c0_71 = arith.constant 0 : index
    %c0_72 = arith.constant 0 : index
    %c0_73 = arith.constant 0 : index
    %257 = vector.load %arg7[%c0_71, %c0_72, %c0_73] : memref<2x32x32xf32, #tpu.memory_space<vmem>>, vector<1x32x32xf32>
    %258 = vector.shape_cast %257 : vector<1x32x32xf32> to vector<32x32xf32>
    %cst_74 = arith.constant dense<0.000000e+00> : vector<16x32xf32>
    %259 = tpu.matmul %256, %258, %cst_74 {dimension_numbers = #tpu.dot_dimension_numbers<[1], [0], [0], [1], [0, 0, 1, 1], [], []>} : vector<16x32xf32>, vector<32x32xf32>, vector<16x32xf32> -> vector<16x32xf32>
    %260 = arith.addf %10, %259 : vector<16x32xf32>
    %c0_75 = arith.constant 0 : index
    %c0_76 = arith.constant 0 : index
    %c0_77 = arith.constant 0 : index
    %261 = vector.load %arg8[%c0_75, %c0_76, %c0_77] : memref<2x1x32xf32, #tpu.memory_space<vmem>>, vector<1x1x32xf32>
    %262 = vector.shape_cast %261 : vector<1x1x32xf32> to vector<1x32xf32>
    %263 = vector.broadcast %262 : vector<1x32xf32> to vector<16x32xf32>
    %264 = arith.addf %260, %263 : vector<16x32xf32>
    %c0_78 = arith.constant 0 : index
    %c0_79 = arith.constant 0 : index
    %c0_80 = arith.constant 0 : index
    %265 = vector.load %arg9[%c0_78, %c0_79, %c0_80] : memref<2x4x32xf32, #tpu.memory_space<vmem>>, vector<1x4x32xf32>
    %266 = vector.shape_cast %265 : vector<1x4x32xf32> to vector<4x32xf32>
    %267 = vector.extract_strided_slice %266 {offsets = [0, 0], sizes = [1, 32], strides = [1, 1]} : vector<4x32xf32> to vector<1x32xf32>
    %268 = vector.extract_strided_slice %266 {offsets = [1, 0], sizes = [1, 32], strides = [1, 1]} : vector<4x32xf32> to vector<1x32xf32>
    %cst_81 = arith.constant dense<0.000000e+00> : vector<16xf32>
    %269 = vector.multi_reduction <add>, %264, %cst_81 [1] : vector<16x32xf32> to vector<16xf32>
    %270 = vector.shape_cast %269 : vector<16xf32> to vector<16x1xf32>
    %cst_82 = arith.constant 3.200000e+01 : f32
    %271 = vector.broadcast %cst_82 : f32 to vector<16x1xf32>
    %272 = arith.divf %270, %271 : vector<16x1xf32>
    %273 = vector.broadcast %272 : vector<16x1xf32> to vector<16x32xf32>
    %274 = arith.subf %264, %273 : vector<16x32xf32>
    %275 = arith.mulf %274, %274 : vector<16x32xf32>
    %cst_83 = arith.constant dense<0.000000e+00> : vector<16xf32>
    %276 = vector.multi_reduction <add>, %275, %cst_83 [1] : vector<16x32xf32> to vector<16xf32>
    %277 = vector.shape_cast %276 : vector<16xf32> to vector<16x1xf32>
    %cst_84 = arith.constant 3.200000e+01 : f32
    %278 = vector.broadcast %cst_84 : f32 to vector<16x1xf32>
    %279 = arith.divf %277, %278 : vector<16x1xf32>
    %280 = vector.broadcast %272 : vector<16x1xf32> to vector<16x32xf32>
    %281 = arith.subf %264, %280 : vector<16x32xf32>
    %cst_85 = arith.constant 9.99999974E-6 : f32
    %282 = vector.broadcast %cst_85 : f32 to vector<16x1xf32>
    %283 = arith.addf %279, %282 : vector<16x1xf32>
    %284 = math.rsqrt %283 : vector<16x1xf32>
    %285 = vector.broadcast %284 : vector<16x1xf32> to vector<16x32xf32>
    %286 = arith.mulf %281, %285 : vector<16x32xf32>
    %287 = vector.broadcast %267 : vector<1x32xf32> to vector<16x32xf32>
    %288 = arith.mulf %286, %287 : vector<16x32xf32>
    %289 = vector.broadcast %268 : vector<1x32xf32> to vector<16x32xf32>
    %290 = arith.addf %288, %289 : vector<16x32xf32>
    %c0_86 = arith.constant 0 : index
    %c0_87 = arith.constant 0 : index
    %c0_88 = arith.constant 0 : index
    %291 = vector.load %arg10[%c0_86, %c0_87, %c0_88] : memref<2x32x64xf32, #tpu.memory_space<vmem>>, vector<1x32x64xf32>
    %292 = vector.shape_cast %291 : vector<1x32x64xf32> to vector<32x64xf32>
    %cst_89 = arith.constant dense<0.000000e+00> : vector<16x64xf32>
    %293 = tpu.matmul %290, %292, %cst_89 {dimension_numbers = #tpu.dot_dimension_numbers<[1], [0], [0], [1], [0, 0, 1, 1], [], []>} : vector<16x32xf32>, vector<32x64xf32>, vector<16x64xf32> -> vector<16x64xf32>
    %c0_90 = arith.constant 0 : index
    %c0_91 = arith.constant 0 : index
    %c0_92 = arith.constant 0 : index
    %294 = vector.load %arg11[%c0_90, %c0_91, %c0_92] : memref<2x1x64xf32, #tpu.memory_space<vmem>>, vector<1x1x64xf32>
    %295 = vector.shape_cast %294 : vector<1x1x64xf32> to vector<1x64xf32>
    %296 = vector.broadcast %295 : vector<1x64xf32> to vector<16x64xf32>
    %297 = arith.addf %293, %296 : vector<16x64xf32>
    %cst_93 = arith.constant 0.000000e+00 : f32
    %298 = vector.broadcast %cst_93 : f32 to vector<16x64xf32>
    %299 = arith.maximumf %297, %298 : vector<16x64xf32>
    %c0_94 = arith.constant 0 : index
    %c0_95 = arith.constant 0 : index
    %c0_96 = arith.constant 0 : index
    %300 = vector.load %arg12[%c0_94, %c0_95, %c0_96] : memref<2x64x32xf32, #tpu.memory_space<vmem>>, vector<1x64x32xf32>
    %301 = vector.shape_cast %300 : vector<1x64x32xf32> to vector<64x32xf32>
    %cst_97 = arith.constant dense<0.000000e+00> : vector<16x32xf32>
    %302 = tpu.matmul %299, %301, %cst_97 {dimension_numbers = #tpu.dot_dimension_numbers<[1], [0], [0], [1], [0, 0, 1, 1], [], []>} : vector<16x64xf32>, vector<64x32xf32>, vector<16x32xf32> -> vector<16x32xf32>
    %c0_98 = arith.constant 0 : index
    %c0_99 = arith.constant 0 : index
    %c0_100 = arith.constant 0 : index
    %303 = vector.load %arg13[%c0_98, %c0_99, %c0_100] : memref<2x1x32xf32, #tpu.memory_space<vmem>>, vector<1x1x32xf32>
    %304 = vector.shape_cast %303 : vector<1x1x32xf32> to vector<1x32xf32>
    %305 = vector.broadcast %304 : vector<1x32xf32> to vector<16x32xf32>
    %306 = arith.addf %302, %305 : vector<16x32xf32>
    %307 = arith.addf %290, %306 : vector<16x32xf32>
    %308 = vector.extract_strided_slice %266 {offsets = [2, 0], sizes = [1, 32], strides = [1, 1]} : vector<4x32xf32> to vector<1x32xf32>
    %309 = vector.extract_strided_slice %266 {offsets = [3, 0], sizes = [1, 32], strides = [1, 1]} : vector<4x32xf32> to vector<1x32xf32>
    %cst_101 = arith.constant dense<0.000000e+00> : vector<16xf32>
    %310 = vector.multi_reduction <add>, %307, %cst_101 [1] : vector<16x32xf32> to vector<16xf32>
    %311 = vector.shape_cast %310 : vector<16xf32> to vector<16x1xf32>
    %cst_102 = arith.constant 3.200000e+01 : f32
    %312 = vector.broadcast %cst_102 : f32 to vector<16x1xf32>
    %313 = arith.divf %311, %312 : vector<16x1xf32>
    %314 = vector.broadcast %313 : vector<16x1xf32> to vector<16x32xf32>
    %315 = arith.subf %307, %314 : vector<16x32xf32>
    %316 = arith.mulf %315, %315 : vector<16x32xf32>
    %cst_103 = arith.constant dense<0.000000e+00> : vector<16xf32>
    %317 = vector.multi_reduction <add>, %316, %cst_103 [1] : vector<16x32xf32> to vector<16xf32>
    %318 = vector.shape_cast %317 : vector<16xf32> to vector<16x1xf32>
    %cst_104 = arith.constant 3.200000e+01 : f32
    %319 = vector.broadcast %cst_104 : f32 to vector<16x1xf32>
    %320 = arith.divf %318, %319 : vector<16x1xf32>
    %321 = vector.broadcast %313 : vector<16x1xf32> to vector<16x32xf32>
    %322 = arith.subf %307, %321 : vector<16x32xf32>
    %cst_105 = arith.constant 9.99999974E-6 : f32
    %323 = vector.broadcast %cst_105 : f32 to vector<16x1xf32>
    %324 = arith.addf %320, %323 : vector<16x1xf32>
    %325 = math.rsqrt %324 : vector<16x1xf32>
    %326 = vector.broadcast %325 : vector<16x1xf32> to vector<16x32xf32>
    %327 = arith.mulf %322, %326 : vector<16x32xf32>
    %328 = vector.broadcast %308 : vector<1x32xf32> to vector<16x32xf32>
    %329 = arith.mulf %327, %328 : vector<16x32xf32>
    %330 = vector.broadcast %309 : vector<1x32xf32> to vector<16x32xf32>
    %331 = arith.addf %329, %330 : vector<16x32xf32>
    %c1 = arith.constant 1 : index
    %c0_106 = arith.constant 0 : index
    %c0_107 = arith.constant 0 : index
    %332 = vector.load %arg4[%c1, %c0_106, %c0_107] : memref<2x32x192xf32, #tpu.memory_space<vmem>>, vector<1x32x192xf32>
    %333 = vector.shape_cast %332 : vector<1x32x192xf32> to vector<32x192xf32>
    %cst_108 = arith.constant dense<0.000000e+00> : vector<16x192xf32>
    %334 = tpu.matmul %331, %333, %cst_108 {dimension_numbers = #tpu.dot_dimension_numbers<[1], [0], [0], [1], [0, 0, 1, 1], [], []>} : vector<16x32xf32>, vector<32x192xf32>, vector<16x192xf32> -> vector<16x192xf32>
    %c1_109 = arith.constant 1 : index
    %c0_110 = arith.constant 0 : index
    %c0_111 = arith.constant 0 : index
    %335 = vector.load %arg5[%c1_109, %c0_110, %c0_111] : memref<2x1x192xf32, #tpu.memory_space<vmem>>, vector<1x1x192xf32>
    %336 = vector.shape_cast %335 : vector<1x1x192xf32> to vector<1x192xf32>
    %337 = vector.broadcast %336 : vector<1x192xf32> to vector<16x192xf32>
    %338 = arith.addf %334, %337 : vector<16x192xf32>
    %339 = vector.extract_strided_slice %338 {offsets = [0, 0], sizes = [16, 32], strides = [1, 1]} : vector<16x192xf32> to vector<16x32xf32>
    %340 = vector.extract_strided_slice %338 {offsets = [0, 32], sizes = [16, 32], strides = [1, 1]} : vector<16x192xf32> to vector<16x32xf32>
    %341 = vector.extract_strided_slice %338 {offsets = [0, 64], sizes = [16, 32], strides = [1, 1]} : vector<16x192xf32> to vector<16x32xf32>
    %342 = vector.extract_strided_slice %338 {offsets = [0, 96], sizes = [16, 32], strides = [1, 1]} : vector<16x192xf32> to vector<16x32xf32>
    %343 = vector.extract_strided_slice %338 {offsets = [0, 128], sizes = [16, 32], strides = [1, 1]} : vector<16x192xf32> to vector<16x32xf32>
    %344 = vector.extract_strided_slice %338 {offsets = [0, 160], sizes = [16, 32], strides = [1, 1]} : vector<16x192xf32> to vector<16x32xf32>
    %c1_112 = arith.constant 1 : index
    %c0_113 = arith.constant 0 : index
    %c0_114 = arith.constant 0 : index
    %345 = vector.load %arg6[%c1_112, %c0_113, %c0_114] : memref<2x3x32xf32, #tpu.memory_space<vmem>>, vector<1x3x32xf32>
    %346 = vector.shape_cast %345 : vector<1x3x32xf32> to vector<3x32xf32>
    %cst_115 = arith.constant 0.353553385 : f32
    %347 = vector.broadcast %cst_115 : f32 to vector<3x32xf32>
    %348 = arith.mulf %346, %347 : vector<3x32xf32>
    %349 = vector.extract_strided_slice %339 {offsets = [0, 0], sizes = [16, 8], strides = [1, 1]} : vector<16x32xf32> to vector<16x8xf32>
    %350 = vector.extract_strided_slice %340 {offsets = [0, 0], sizes = [16, 8], strides = [1, 1]} : vector<16x32xf32> to vector<16x8xf32>
    %351 = vector.extract_strided_slice %341 {offsets = [0, 0], sizes = [16, 8], strides = [1, 1]} : vector<16x32xf32> to vector<16x8xf32>
    %352 = vector.extract_strided_slice %342 {offsets = [0, 0], sizes = [16, 8], strides = [1, 1]} : vector<16x32xf32> to vector<16x8xf32>
    %353 = vector.extract_strided_slice %343 {offsets = [0, 0], sizes = [16, 8], strides = [1, 1]} : vector<16x32xf32> to vector<16x8xf32>
    %354 = vector.extract_strided_slice %344 {offsets = [0, 0], sizes = [16, 8], strides = [1, 1]} : vector<16x32xf32> to vector<16x8xf32>
    %355 = vector.extract_strided_slice %348 {offsets = [0, 0], sizes = [1, 8], strides = [1, 1]} : vector<3x32xf32> to vector<1x8xf32>
    %356 = vector.extract_strided_slice %348 {offsets = [1, 0], sizes = [1, 8], strides = [1, 1]} : vector<3x32xf32> to vector<1x8xf32>
    %357 = vector.extract_strided_slice %348 {offsets = [2, 0], sizes = [1, 8], strides = [1, 1]} : vector<3x32xf32> to vector<1x8xf32>
    %358 = vector.broadcast %355 : vector<1x8xf32> to vector<16x8xf32>
    %359 = arith.mulf %349, %358 : vector<16x8xf32>
    %360 = vector.broadcast %356 : vector<1x8xf32> to vector<16x8xf32>
    %361 = arith.mulf %349, %360 : vector<16x8xf32>
    %362 = tpu.concatenate %359, %361 in 0 : vector<16x8xf32>, vector<16x8xf32> -> vector<32x8xf32>
    %363 = tpu.transpose %350, [1, 0] : vector<16x8xf32> -> vector<8x16xf32>
    %cst_116 = arith.constant dense<0.000000e+00> : vector<32x16xf32>
    %364 = tpu.matmul %362, %363, %cst_116 {dimension_numbers = #tpu.dot_dimension_numbers<[1], [0], [0], [1], [0, 0, 1, 1], [], []>} : vector<32x8xf32>, vector<8x16xf32>, vector<32x16xf32> -> vector<32x16xf32>
    %365 = vector.extract_strided_slice %364 {offsets = [0, 0], sizes = [16, 16], strides = [1, 1]} : vector<32x16xf32> to vector<16x16xf32>
    %366 = arith.mulf %1, %365 : vector<16x16xf32>
    %367 = vector.extract_strided_slice %364 {offsets = [16, 0], sizes = [16, 16], strides = [1, 1]} : vector<32x16xf32> to vector<16x16xf32>
    %368 = arith.addf %366, %367 : vector<16x16xf32>
    %cst_117 = arith.constant -5.000000e+00 : f32
    %cst_118 = arith.constant 5.000000e+00 : f32
    %369 = vector.broadcast %cst_117 : f32 to vector<16x16xf32>
    %370 = arith.maximumf %369, %368 : vector<16x16xf32>
    %371 = vector.broadcast %cst_118 : f32 to vector<16x16xf32>
    %372 = arith.minimumf %371, %370 : vector<16x16xf32>
    %373 = math.exp %372 : vector<16x16xf32>
    %374 = arith.mulf %373, %1 : vector<16x16xf32>
    %cst_119 = arith.constant dense<0.000000e+00> : vector<16xf32>
    %375 = vector.multi_reduction <add>, %374, %cst_119 [1] : vector<16x16xf32> to vector<16xf32>
    %376 = vector.shape_cast %375 : vector<16xf32> to vector<16x1xf32>
    %cst_120 = arith.constant 9.99999997E-7 : f32
    %377 = vector.broadcast %cst_120 : f32 to vector<16x1xf32>
    %378 = arith.addf %376, %377 : vector<16x1xf32>
    %379 = vector.broadcast %357 : vector<1x8xf32> to vector<16x8xf32>
    %380 = arith.mulf %352, %379 : vector<16x8xf32>
    %381 = tpu.transpose %353, [1, 0] : vector<16x8xf32> -> vector<8x16xf32>
    %cst_121 = arith.constant dense<0.000000e+00> : vector<16x16xf32>
    %382 = tpu.matmul %380, %381, %cst_121 {dimension_numbers = #tpu.dot_dimension_numbers<[1], [0], [0], [1], [0, 0, 1, 1], [], []>} : vector<16x8xf32>, vector<8x16xf32>, vector<16x16xf32> -> vector<16x16xf32>
    %cst_122 = arith.constant -5.000000e+00 : f32
    %cst_123 = arith.constant 5.000000e+00 : f32
    %383 = vector.broadcast %cst_122 : f32 to vector<16x16xf32>
    %384 = arith.maximumf %383, %382 : vector<16x16xf32>
    %385 = vector.broadcast %cst_123 : f32 to vector<16x16xf32>
    %386 = arith.minimumf %385, %384 : vector<16x16xf32>
    %387 = math.exp %386 : vector<16x16xf32>
    %388 = arith.mulf %387, %5 : vector<16x16xf32>
    %cst_124 = arith.constant dense<0.000000e+00> : vector<16xf32>
    %389 = vector.multi_reduction <add>, %388, %cst_124 [1] : vector<16x16xf32> to vector<16xf32>
    %390 = vector.shape_cast %389 : vector<16xf32> to vector<16x1xf32>
    %cst_125 = arith.constant 9.99999997E-7 : f32
    %391 = vector.broadcast %cst_125 : f32 to vector<16x1xf32>
    %392 = arith.addf %390, %391 : vector<16x1xf32>
    %393 = tpu.reciprocal %378 {approx = true} : vector<16x1xf32> -> vector<16x1xf32>
    %cst_126 = arith.constant 0.909090936 : f32
    %394 = vector.broadcast %cst_126 : f32 to vector<16x1xf32>
    %395 = arith.mulf %394, %393 : vector<16x1xf32>
    %396 = vector.broadcast %395 : vector<16x1xf32> to vector<16x16xf32>
    %397 = arith.mulf %374, %396 : vector<16x16xf32>
    %398 = tpu.reciprocal %392 {approx = true} : vector<16x1xf32> -> vector<16x1xf32>
    %cst_127 = arith.constant 0.0909090936 : f32
    %399 = vector.broadcast %cst_127 : f32 to vector<16x1xf32>
    %400 = arith.mulf %399, %398 : vector<16x1xf32>
    %401 = vector.broadcast %400 : vector<16x1xf32> to vector<16x16xf32>
    %402 = arith.mulf %388, %401 : vector<16x16xf32>
    %403 = tpu.concatenate %397, %402 in 1 : vector<16x16xf32>, vector<16x16xf32> -> vector<16x32xf32>
    %404 = tpu.concatenate %351, %354 in 0 : vector<16x8xf32>, vector<16x8xf32> -> vector<32x8xf32>
    %cst_128 = arith.constant dense<0.000000e+00> : vector<16x8xf32>
    %405 = tpu.matmul %403, %404, %cst_128 {dimension_numbers = #tpu.dot_dimension_numbers<[1], [0], [0], [1], [0, 0, 1, 1], [], []>} : vector<16x32xf32>, vector<32x8xf32>, vector<16x8xf32> -> vector<16x8xf32>
    %406 = vector.extract_strided_slice %339 {offsets = [0, 8], sizes = [16, 8], strides = [1, 1]} : vector<16x32xf32> to vector<16x8xf32>
    %407 = vector.extract_strided_slice %340 {offsets = [0, 8], sizes = [16, 8], strides = [1, 1]} : vector<16x32xf32> to vector<16x8xf32>
    %408 = vector.extract_strided_slice %341 {offsets = [0, 8], sizes = [16, 8], strides = [1, 1]} : vector<16x32xf32> to vector<16x8xf32>
    %409 = vector.extract_strided_slice %342 {offsets = [0, 8], sizes = [16, 8], strides = [1, 1]} : vector<16x32xf32> to vector<16x8xf32>
    %410 = vector.extract_strided_slice %343 {offsets = [0, 8], sizes = [16, 8], strides = [1, 1]} : vector<16x32xf32> to vector<16x8xf32>
    %411 = vector.extract_strided_slice %344 {offsets = [0, 8], sizes = [16, 8], strides = [1, 1]} : vector<16x32xf32> to vector<16x8xf32>
    %412 = vector.extract_strided_slice %348 {offsets = [0, 8], sizes = [1, 8], strides = [1, 1]} : vector<3x32xf32> to vector<1x8xf32>
    %413 = vector.extract_strided_slice %348 {offsets = [1, 8], sizes = [1, 8], strides = [1, 1]} : vector<3x32xf32> to vector<1x8xf32>
    %414 = vector.extract_strided_slice %348 {offsets = [2, 8], sizes = [1, 8], strides = [1, 1]} : vector<3x32xf32> to vector<1x8xf32>
    %415 = vector.broadcast %412 : vector<1x8xf32> to vector<16x8xf32>
    %416 = arith.mulf %406, %415 : vector<16x8xf32>
    %417 = vector.broadcast %413 : vector<1x8xf32> to vector<16x8xf32>
    %418 = arith.mulf %406, %417 : vector<16x8xf32>
    %419 = tpu.concatenate %416, %418 in 0 : vector<16x8xf32>, vector<16x8xf32> -> vector<32x8xf32>
    %420 = tpu.transpose %407, [1, 0] : vector<16x8xf32> -> vector<8x16xf32>
    %cst_129 = arith.constant dense<0.000000e+00> : vector<32x16xf32>
    %421 = tpu.matmul %419, %420, %cst_129 {dimension_numbers = #tpu.dot_dimension_numbers<[1], [0], [0], [1], [0, 0, 1, 1], [], []>} : vector<32x8xf32>, vector<8x16xf32>, vector<32x16xf32> -> vector<32x16xf32>
    %422 = vector.extract_strided_slice %421 {offsets = [0, 0], sizes = [16, 16], strides = [1, 1]} : vector<32x16xf32> to vector<16x16xf32>
    %423 = arith.mulf %1, %422 : vector<16x16xf32>
    %424 = vector.extract_strided_slice %421 {offsets = [16, 0], sizes = [16, 16], strides = [1, 1]} : vector<32x16xf32> to vector<16x16xf32>
    %425 = arith.addf %423, %424 : vector<16x16xf32>
    %cst_130 = arith.constant -5.000000e+00 : f32
    %cst_131 = arith.constant 5.000000e+00 : f32
    %426 = vector.broadcast %cst_130 : f32 to vector<16x16xf32>
    %427 = arith.maximumf %426, %425 : vector<16x16xf32>
    %428 = vector.broadcast %cst_131 : f32 to vector<16x16xf32>
    %429 = arith.minimumf %428, %427 : vector<16x16xf32>
    %430 = math.exp %429 : vector<16x16xf32>
    %431 = arith.mulf %430, %1 : vector<16x16xf32>
    %cst_132 = arith.constant dense<0.000000e+00> : vector<16xf32>
    %432 = vector.multi_reduction <add>, %431, %cst_132 [1] : vector<16x16xf32> to vector<16xf32>
    %433 = vector.shape_cast %432 : vector<16xf32> to vector<16x1xf32>
    %cst_133 = arith.constant 9.99999997E-7 : f32
    %434 = vector.broadcast %cst_133 : f32 to vector<16x1xf32>
    %435 = arith.addf %433, %434 : vector<16x1xf32>
    %436 = vector.broadcast %414 : vector<1x8xf32> to vector<16x8xf32>
    %437 = arith.mulf %409, %436 : vector<16x8xf32>
    %438 = tpu.transpose %410, [1, 0] : vector<16x8xf32> -> vector<8x16xf32>
    %cst_134 = arith.constant dense<0.000000e+00> : vector<16x16xf32>
    %439 = tpu.matmul %437, %438, %cst_134 {dimension_numbers = #tpu.dot_dimension_numbers<[1], [0], [0], [1], [0, 0, 1, 1], [], []>} : vector<16x8xf32>, vector<8x16xf32>, vector<16x16xf32> -> vector<16x16xf32>
    %cst_135 = arith.constant -5.000000e+00 : f32
    %cst_136 = arith.constant 5.000000e+00 : f32
    %440 = vector.broadcast %cst_135 : f32 to vector<16x16xf32>
    %441 = arith.maximumf %440, %439 : vector<16x16xf32>
    %442 = vector.broadcast %cst_136 : f32 to vector<16x16xf32>
    %443 = arith.minimumf %442, %441 : vector<16x16xf32>
    %444 = math.exp %443 : vector<16x16xf32>
    %445 = arith.mulf %444, %5 : vector<16x16xf32>
    %cst_137 = arith.constant dense<0.000000e+00> : vector<16xf32>
    %446 = vector.multi_reduction <add>, %445, %cst_137 [1] : vector<16x16xf32> to vector<16xf32>
    %447 = vector.shape_cast %446 : vector<16xf32> to vector<16x1xf32>
    %cst_138 = arith.constant 9.99999997E-7 : f32
    %448 = vector.broadcast %cst_138 : f32 to vector<16x1xf32>
    %449 = arith.addf %447, %448 : vector<16x1xf32>
    %450 = tpu.reciprocal %435 {approx = true} : vector<16x1xf32> -> vector<16x1xf32>
    %cst_139 = arith.constant 0.909090936 : f32
    %451 = vector.broadcast %cst_139 : f32 to vector<16x1xf32>
    %452 = arith.mulf %451, %450 : vector<16x1xf32>
    %453 = vector.broadcast %452 : vector<16x1xf32> to vector<16x16xf32>
    %454 = arith.mulf %431, %453 : vector<16x16xf32>
    %455 = tpu.reciprocal %449 {approx = true} : vector<16x1xf32> -> vector<16x1xf32>
    %cst_140 = arith.constant 0.0909090936 : f32
    %456 = vector.broadcast %cst_140 : f32 to vector<16x1xf32>
    %457 = arith.mulf %456, %455 : vector<16x1xf32>
    %458 = vector.broadcast %457 : vector<16x1xf32> to vector<16x16xf32>
    %459 = arith.mulf %445, %458 : vector<16x16xf32>
    %460 = tpu.concatenate %454, %459 in 1 : vector<16x16xf32>, vector<16x16xf32> -> vector<16x32xf32>
    %461 = tpu.concatenate %408, %411 in 0 : vector<16x8xf32>, vector<16x8xf32> -> vector<32x8xf32>
    %cst_141 = arith.constant dense<0.000000e+00> : vector<16x8xf32>
    %462 = tpu.matmul %460, %461, %cst_141 {dimension_numbers = #tpu.dot_dimension_numbers<[1], [0], [0], [1], [0, 0, 1, 1], [], []>} : vector<16x32xf32>, vector<32x8xf32>, vector<16x8xf32> -> vector<16x8xf32>
    %463 = vector.extract_strided_slice %339 {offsets = [0, 16], sizes = [16, 8], strides = [1, 1]} : vector<16x32xf32> to vector<16x8xf32>
    %464 = vector.extract_strided_slice %340 {offsets = [0, 16], sizes = [16, 8], strides = [1, 1]} : vector<16x32xf32> to vector<16x8xf32>
    %465 = vector.extract_strided_slice %341 {offsets = [0, 16], sizes = [16, 8], strides = [1, 1]} : vector<16x32xf32> to vector<16x8xf32>
    %466 = vector.extract_strided_slice %342 {offsets = [0, 16], sizes = [16, 8], strides = [1, 1]} : vector<16x32xf32> to vector<16x8xf32>
    %467 = vector.extract_strided_slice %343 {offsets = [0, 16], sizes = [16, 8], strides = [1, 1]} : vector<16x32xf32> to vector<16x8xf32>
    %468 = vector.extract_strided_slice %344 {offsets = [0, 16], sizes = [16, 8], strides = [1, 1]} : vector<16x32xf32> to vector<16x8xf32>
    %469 = vector.extract_strided_slice %348 {offsets = [0, 16], sizes = [1, 8], strides = [1, 1]} : vector<3x32xf32> to vector<1x8xf32>
    %470 = vector.extract_strided_slice %348 {offsets = [1, 16], sizes = [1, 8], strides = [1, 1]} : vector<3x32xf32> to vector<1x8xf32>
    %471 = vector.extract_strided_slice %348 {offsets = [2, 16], sizes = [1, 8], strides = [1, 1]} : vector<3x32xf32> to vector<1x8xf32>
    %472 = vector.broadcast %469 : vector<1x8xf32> to vector<16x8xf32>
    %473 = arith.mulf %463, %472 : vector<16x8xf32>
    %474 = vector.broadcast %470 : vector<1x8xf32> to vector<16x8xf32>
    %475 = arith.mulf %463, %474 : vector<16x8xf32>
    %476 = tpu.concatenate %473, %475 in 0 : vector<16x8xf32>, vector<16x8xf32> -> vector<32x8xf32>
    %477 = tpu.transpose %464, [1, 0] : vector<16x8xf32> -> vector<8x16xf32>
    %cst_142 = arith.constant dense<0.000000e+00> : vector<32x16xf32>
    %478 = tpu.matmul %476, %477, %cst_142 {dimension_numbers = #tpu.dot_dimension_numbers<[1], [0], [0], [1], [0, 0, 1, 1], [], []>} : vector<32x8xf32>, vector<8x16xf32>, vector<32x16xf32> -> vector<32x16xf32>
    %479 = vector.extract_strided_slice %478 {offsets = [0, 0], sizes = [16, 16], strides = [1, 1]} : vector<32x16xf32> to vector<16x16xf32>
    %480 = arith.mulf %1, %479 : vector<16x16xf32>
    %481 = vector.extract_strided_slice %478 {offsets = [16, 0], sizes = [16, 16], strides = [1, 1]} : vector<32x16xf32> to vector<16x16xf32>
    %482 = arith.addf %480, %481 : vector<16x16xf32>
    %cst_143 = arith.constant -5.000000e+00 : f32
    %cst_144 = arith.constant 5.000000e+00 : f32
    %483 = vector.broadcast %cst_143 : f32 to vector<16x16xf32>
    %484 = arith.maximumf %483, %482 : vector<16x16xf32>
    %485 = vector.broadcast %cst_144 : f32 to vector<16x16xf32>
    %486 = arith.minimumf %485, %484 : vector<16x16xf32>
    %487 = math.exp %486 : vector<16x16xf32>
    %488 = arith.mulf %487, %1 : vector<16x16xf32>
    %cst_145 = arith.constant dense<0.000000e+00> : vector<16xf32>
    %489 = vector.multi_reduction <add>, %488, %cst_145 [1] : vector<16x16xf32> to vector<16xf32>
    %490 = vector.shape_cast %489 : vector<16xf32> to vector<16x1xf32>
    %cst_146 = arith.constant 9.99999997E-7 : f32
    %491 = vector.broadcast %cst_146 : f32 to vector<16x1xf32>
    %492 = arith.addf %490, %491 : vector<16x1xf32>
    %493 = vector.broadcast %471 : vector<1x8xf32> to vector<16x8xf32>
    %494 = arith.mulf %466, %493 : vector<16x8xf32>
    %495 = tpu.transpose %467, [1, 0] : vector<16x8xf32> -> vector<8x16xf32>
    %cst_147 = arith.constant dense<0.000000e+00> : vector<16x16xf32>
    %496 = tpu.matmul %494, %495, %cst_147 {dimension_numbers = #tpu.dot_dimension_numbers<[1], [0], [0], [1], [0, 0, 1, 1], [], []>} : vector<16x8xf32>, vector<8x16xf32>, vector<16x16xf32> -> vector<16x16xf32>
    %cst_148 = arith.constant -5.000000e+00 : f32
    %cst_149 = arith.constant 5.000000e+00 : f32
    %497 = vector.broadcast %cst_148 : f32 to vector<16x16xf32>
    %498 = arith.maximumf %497, %496 : vector<16x16xf32>
    %499 = vector.broadcast %cst_149 : f32 to vector<16x16xf32>
    %500 = arith.minimumf %499, %498 : vector<16x16xf32>
    %501 = math.exp %500 : vector<16x16xf32>
    %502 = arith.mulf %501, %5 : vector<16x16xf32>
    %cst_150 = arith.constant dense<0.000000e+00> : vector<16xf32>
    %503 = vector.multi_reduction <add>, %502, %cst_150 [1] : vector<16x16xf32> to vector<16xf32>
    %504 = vector.shape_cast %503 : vector<16xf32> to vector<16x1xf32>
    %cst_151 = arith.constant 9.99999997E-7 : f32
    %505 = vector.broadcast %cst_151 : f32 to vector<16x1xf32>
    %506 = arith.addf %504, %505 : vector<16x1xf32>
    %507 = tpu.reciprocal %492 {approx = true} : vector<16x1xf32> -> vector<16x1xf32>
    %cst_152 = arith.constant 0.909090936 : f32
    %508 = vector.broadcast %cst_152 : f32 to vector<16x1xf32>
    %509 = arith.mulf %508, %507 : vector<16x1xf32>
    %510 = vector.broadcast %509 : vector<16x1xf32> to vector<16x16xf32>
    %511 = arith.mulf %488, %510 : vector<16x16xf32>
    %512 = tpu.reciprocal %506 {approx = true} : vector<16x1xf32> -> vector<16x1xf32>
    %cst_153 = arith.constant 0.0909090936 : f32
    %513 = vector.broadcast %cst_153 : f32 to vector<16x1xf32>
    %514 = arith.mulf %513, %512 : vector<16x1xf32>
    %515 = vector.broadcast %514 : vector<16x1xf32> to vector<16x16xf32>
    %516 = arith.mulf %502, %515 : vector<16x16xf32>
    %517 = tpu.concatenate %511, %516 in 1 : vector<16x16xf32>, vector<16x16xf32> -> vector<16x32xf32>
    %518 = tpu.concatenate %465, %468 in 0 : vector<16x8xf32>, vector<16x8xf32> -> vector<32x8xf32>
    %cst_154 = arith.constant dense<0.000000e+00> : vector<16x8xf32>
    %519 = tpu.matmul %517, %518, %cst_154 {dimension_numbers = #tpu.dot_dimension_numbers<[1], [0], [0], [1], [0, 0, 1, 1], [], []>} : vector<16x32xf32>, vector<32x8xf32>, vector<16x8xf32> -> vector<16x8xf32>
    %520 = vector.extract_strided_slice %339 {offsets = [0, 24], sizes = [16, 8], strides = [1, 1]} : vector<16x32xf32> to vector<16x8xf32>
    %521 = vector.extract_strided_slice %340 {offsets = [0, 24], sizes = [16, 8], strides = [1, 1]} : vector<16x32xf32> to vector<16x8xf32>
    %522 = vector.extract_strided_slice %341 {offsets = [0, 24], sizes = [16, 8], strides = [1, 1]} : vector<16x32xf32> to vector<16x8xf32>
    %523 = vector.extract_strided_slice %342 {offsets = [0, 24], sizes = [16, 8], strides = [1, 1]} : vector<16x32xf32> to vector<16x8xf32>
    %524 = vector.extract_strided_slice %343 {offsets = [0, 24], sizes = [16, 8], strides = [1, 1]} : vector<16x32xf32> to vector<16x8xf32>
    %525 = vector.extract_strided_slice %344 {offsets = [0, 24], sizes = [16, 8], strides = [1, 1]} : vector<16x32xf32> to vector<16x8xf32>
    %526 = vector.extract_strided_slice %348 {offsets = [0, 24], sizes = [1, 8], strides = [1, 1]} : vector<3x32xf32> to vector<1x8xf32>
    %527 = vector.extract_strided_slice %348 {offsets = [1, 24], sizes = [1, 8], strides = [1, 1]} : vector<3x32xf32> to vector<1x8xf32>
    %528 = vector.extract_strided_slice %348 {offsets = [2, 24], sizes = [1, 8], strides = [1, 1]} : vector<3x32xf32> to vector<1x8xf32>
    %529 = vector.broadcast %526 : vector<1x8xf32> to vector<16x8xf32>
    %530 = arith.mulf %520, %529 : vector<16x8xf32>
    %531 = vector.broadcast %527 : vector<1x8xf32> to vector<16x8xf32>
    %532 = arith.mulf %520, %531 : vector<16x8xf32>
    %533 = tpu.concatenate %530, %532 in 0 : vector<16x8xf32>, vector<16x8xf32> -> vector<32x8xf32>
    %534 = tpu.transpose %521, [1, 0] : vector<16x8xf32> -> vector<8x16xf32>
    %cst_155 = arith.constant dense<0.000000e+00> : vector<32x16xf32>
    %535 = tpu.matmul %533, %534, %cst_155 {dimension_numbers = #tpu.dot_dimension_numbers<[1], [0], [0], [1], [0, 0, 1, 1], [], []>} : vector<32x8xf32>, vector<8x16xf32>, vector<32x16xf32> -> vector<32x16xf32>
    %536 = vector.extract_strided_slice %535 {offsets = [0, 0], sizes = [16, 16], strides = [1, 1]} : vector<32x16xf32> to vector<16x16xf32>
    %537 = arith.mulf %1, %536 : vector<16x16xf32>
    %538 = vector.extract_strided_slice %535 {offsets = [16, 0], sizes = [16, 16], strides = [1, 1]} : vector<32x16xf32> to vector<16x16xf32>
    %539 = arith.addf %537, %538 : vector<16x16xf32>
    %cst_156 = arith.constant -5.000000e+00 : f32
    %cst_157 = arith.constant 5.000000e+00 : f32
    %540 = vector.broadcast %cst_156 : f32 to vector<16x16xf32>
    %541 = arith.maximumf %540, %539 : vector<16x16xf32>
    %542 = vector.broadcast %cst_157 : f32 to vector<16x16xf32>
    %543 = arith.minimumf %542, %541 : vector<16x16xf32>
    %544 = math.exp %543 : vector<16x16xf32>
    %545 = arith.mulf %544, %1 : vector<16x16xf32>
    %cst_158 = arith.constant dense<0.000000e+00> : vector<16xf32>
    %546 = vector.multi_reduction <add>, %545, %cst_158 [1] : vector<16x16xf32> to vector<16xf32>
    %547 = vector.shape_cast %546 : vector<16xf32> to vector<16x1xf32>
    %cst_159 = arith.constant 9.99999997E-7 : f32
    %548 = vector.broadcast %cst_159 : f32 to vector<16x1xf32>
    %549 = arith.addf %547, %548 : vector<16x1xf32>
    %550 = vector.broadcast %528 : vector<1x8xf32> to vector<16x8xf32>
    %551 = arith.mulf %523, %550 : vector<16x8xf32>
    %552 = tpu.transpose %524, [1, 0] : vector<16x8xf32> -> vector<8x16xf32>
    %cst_160 = arith.constant dense<0.000000e+00> : vector<16x16xf32>
    %553 = tpu.matmul %551, %552, %cst_160 {dimension_numbers = #tpu.dot_dimension_numbers<[1], [0], [0], [1], [0, 0, 1, 1], [], []>} : vector<16x8xf32>, vector<8x16xf32>, vector<16x16xf32> -> vector<16x16xf32>
    %cst_161 = arith.constant -5.000000e+00 : f32
    %cst_162 = arith.constant 5.000000e+00 : f32
    %554 = vector.broadcast %cst_161 : f32 to vector<16x16xf32>
    %555 = arith.maximumf %554, %553 : vector<16x16xf32>
    %556 = vector.broadcast %cst_162 : f32 to vector<16x16xf32>
    %557 = arith.minimumf %556, %555 : vector<16x16xf32>
    %558 = math.exp %557 : vector<16x16xf32>
    %559 = arith.mulf %558, %5 : vector<16x16xf32>
    %cst_163 = arith.constant dense<0.000000e+00> : vector<16xf32>
    %560 = vector.multi_reduction <add>, %559, %cst_163 [1] : vector<16x16xf32> to vector<16xf32>
    %561 = vector.shape_cast %560 : vector<16xf32> to vector<16x1xf32>
    %cst_164 = arith.constant 9.99999997E-7 : f32
    %562 = vector.broadcast %cst_164 : f32 to vector<16x1xf32>
    %563 = arith.addf %561, %562 : vector<16x1xf32>
    %564 = tpu.reciprocal %549 {approx = true} : vector<16x1xf32> -> vector<16x1xf32>
    %cst_165 = arith.constant 0.909090936 : f32
    %565 = vector.broadcast %cst_165 : f32 to vector<16x1xf32>
    %566 = arith.mulf %565, %564 : vector<16x1xf32>
    %567 = vector.broadcast %566 : vector<16x1xf32> to vector<16x16xf32>
    %568 = arith.mulf %545, %567 : vector<16x16xf32>
    %569 = tpu.reciprocal %563 {approx = true} : vector<16x1xf32> -> vector<16x1xf32>
    %cst_166 = arith.constant 0.0909090936 : f32
    %570 = vector.broadcast %cst_166 : f32 to vector<16x1xf32>
    %571 = arith.mulf %570, %569 : vector<16x1xf32>
    %572 = vector.broadcast %571 : vector<16x1xf32> to vector<16x16xf32>
    %573 = arith.mulf %559, %572 : vector<16x16xf32>
    %574 = tpu.concatenate %568, %573 in 1 : vector<16x16xf32>, vector<16x16xf32> -> vector<16x32xf32>
    %575 = tpu.concatenate %522, %525 in 0 : vector<16x8xf32>, vector<16x8xf32> -> vector<32x8xf32>
    %cst_167 = arith.constant dense<0.000000e+00> : vector<16x8xf32>
    %576 = tpu.matmul %574, %575, %cst_167 {dimension_numbers = #tpu.dot_dimension_numbers<[1], [0], [0], [1], [0, 0, 1, 1], [], []>} : vector<16x32xf32>, vector<32x8xf32>, vector<16x8xf32> -> vector<16x8xf32>
    %577 = tpu.concatenate %405, %462, %519, %576 in 1 : vector<16x8xf32>, vector<16x8xf32>, vector<16x8xf32>, vector<16x8xf32> -> vector<16x32xf32>
    %c1_168 = arith.constant 1 : index
    %c0_169 = arith.constant 0 : index
    %c0_170 = arith.constant 0 : index
    %578 = vector.load %arg7[%c1_168, %c0_169, %c0_170] : memref<2x32x32xf32, #tpu.memory_space<vmem>>, vector<1x32x32xf32>
    %579 = vector.shape_cast %578 : vector<1x32x32xf32> to vector<32x32xf32>
    %cst_171 = arith.constant dense<0.000000e+00> : vector<16x32xf32>
    %580 = tpu.matmul %577, %579, %cst_171 {dimension_numbers = #tpu.dot_dimension_numbers<[1], [0], [0], [1], [0, 0, 1, 1], [], []>} : vector<16x32xf32>, vector<32x32xf32>, vector<16x32xf32> -> vector<16x32xf32>
    %581 = arith.addf %331, %580 : vector<16x32xf32>
    %c1_172 = arith.constant 1 : index
    %c0_173 = arith.constant 0 : index
    %c0_174 = arith.constant 0 : index
    %582 = vector.load %arg8[%c1_172, %c0_173, %c0_174] : memref<2x1x32xf32, #tpu.memory_space<vmem>>, vector<1x1x32xf32>
    %583 = vector.shape_cast %582 : vector<1x1x32xf32> to vector<1x32xf32>
    %584 = vector.broadcast %583 : vector<1x32xf32> to vector<16x32xf32>
    %585 = arith.addf %581, %584 : vector<16x32xf32>
    %c1_175 = arith.constant 1 : index
    %c0_176 = arith.constant 0 : index
    %c0_177 = arith.constant 0 : index
    %586 = vector.load %arg9[%c1_175, %c0_176, %c0_177] : memref<2x4x32xf32, #tpu.memory_space<vmem>>, vector<1x4x32xf32>
    %587 = vector.shape_cast %586 : vector<1x4x32xf32> to vector<4x32xf32>
    %588 = vector.extract_strided_slice %587 {offsets = [0, 0], sizes = [1, 32], strides = [1, 1]} : vector<4x32xf32> to vector<1x32xf32>
    %589 = vector.extract_strided_slice %587 {offsets = [1, 0], sizes = [1, 32], strides = [1, 1]} : vector<4x32xf32> to vector<1x32xf32>
    %cst_178 = arith.constant dense<0.000000e+00> : vector<16xf32>
    %590 = vector.multi_reduction <add>, %585, %cst_178 [1] : vector<16x32xf32> to vector<16xf32>
    %591 = vector.shape_cast %590 : vector<16xf32> to vector<16x1xf32>
    %cst_179 = arith.constant 3.200000e+01 : f32
    %592 = vector.broadcast %cst_179 : f32 to vector<16x1xf32>
    %593 = arith.divf %591, %592 : vector<16x1xf32>
    %594 = vector.broadcast %593 : vector<16x1xf32> to vector<16x32xf32>
    %595 = arith.subf %585, %594 : vector<16x32xf32>
    %596 = arith.mulf %595, %595 : vector<16x32xf32>
    %cst_180 = arith.constant dense<0.000000e+00> : vector<16xf32>
    %597 = vector.multi_reduction <add>, %596, %cst_180 [1] : vector<16x32xf32> to vector<16xf32>
    %598 = vector.shape_cast %597 : vector<16xf32> to vector<16x1xf32>
    %cst_181 = arith.constant 3.200000e+01 : f32
    %599 = vector.broadcast %cst_181 : f32 to vector<16x1xf32>
    %600 = arith.divf %598, %599 : vector<16x1xf32>
    %601 = vector.broadcast %593 : vector<16x1xf32> to vector<16x32xf32>
    %602 = arith.subf %585, %601 : vector<16x32xf32>
    %cst_182 = arith.constant 9.99999974E-6 : f32
    %603 = vector.broadcast %cst_182 : f32 to vector<16x1xf32>
    %604 = arith.addf %600, %603 : vector<16x1xf32>
    %605 = math.rsqrt %604 : vector<16x1xf32>
    %606 = vector.broadcast %605 : vector<16x1xf32> to vector<16x32xf32>
    %607 = arith.mulf %602, %606 : vector<16x32xf32>
    %608 = vector.broadcast %588 : vector<1x32xf32> to vector<16x32xf32>
    %609 = arith.mulf %607, %608 : vector<16x32xf32>
    %610 = vector.broadcast %589 : vector<1x32xf32> to vector<16x32xf32>
    %611 = arith.addf %609, %610 : vector<16x32xf32>
    %c1_183 = arith.constant 1 : index
    %c0_184 = arith.constant 0 : index
    %c0_185 = arith.constant 0 : index
    %612 = vector.load %arg10[%c1_183, %c0_184, %c0_185] : memref<2x32x64xf32, #tpu.memory_space<vmem>>, vector<1x32x64xf32>
    %613 = vector.shape_cast %612 : vector<1x32x64xf32> to vector<32x64xf32>
    %cst_186 = arith.constant dense<0.000000e+00> : vector<16x64xf32>
    %614 = tpu.matmul %611, %613, %cst_186 {dimension_numbers = #tpu.dot_dimension_numbers<[1], [0], [0], [1], [0, 0, 1, 1], [], []>} : vector<16x32xf32>, vector<32x64xf32>, vector<16x64xf32> -> vector<16x64xf32>
    %c1_187 = arith.constant 1 : index
    %c0_188 = arith.constant 0 : index
    %c0_189 = arith.constant 0 : index
    %615 = vector.load %arg11[%c1_187, %c0_188, %c0_189] : memref<2x1x64xf32, #tpu.memory_space<vmem>>, vector<1x1x64xf32>
    %616 = vector.shape_cast %615 : vector<1x1x64xf32> to vector<1x64xf32>
    %617 = vector.broadcast %616 : vector<1x64xf32> to vector<16x64xf32>
    %618 = arith.addf %614, %617 : vector<16x64xf32>
    %cst_190 = arith.constant 0.000000e+00 : f32
    %619 = vector.broadcast %cst_190 : f32 to vector<16x64xf32>
    %620 = arith.maximumf %618, %619 : vector<16x64xf32>
    %c1_191 = arith.constant 1 : index
    %c0_192 = arith.constant 0 : index
    %c0_193 = arith.constant 0 : index
    %621 = vector.load %arg12[%c1_191, %c0_192, %c0_193] : memref<2x64x32xf32, #tpu.memory_space<vmem>>, vector<1x64x32xf32>
    %622 = vector.shape_cast %621 : vector<1x64x32xf32> to vector<64x32xf32>
    %cst_194 = arith.constant dense<0.000000e+00> : vector<16x32xf32>
    %623 = tpu.matmul %620, %622, %cst_194 {dimension_numbers = #tpu.dot_dimension_numbers<[1], [0], [0], [1], [0, 0, 1, 1], [], []>} : vector<16x64xf32>, vector<64x32xf32>, vector<16x32xf32> -> vector<16x32xf32>
    %c1_195 = arith.constant 1 : index
    %c0_196 = arith.constant 0 : index
    %c0_197 = arith.constant 0 : index
    %624 = vector.load %arg13[%c1_195, %c0_196, %c0_197] : memref<2x1x32xf32, #tpu.memory_space<vmem>>, vector<1x1x32xf32>
    %625 = vector.shape_cast %624 : vector<1x1x32xf32> to vector<1x32xf32>
    %626 = vector.broadcast %625 : vector<1x32xf32> to vector<16x32xf32>
    %627 = arith.addf %623, %626 : vector<16x32xf32>
    %628 = arith.addf %611, %627 : vector<16x32xf32>
    %629 = vector.extract_strided_slice %587 {offsets = [2, 0], sizes = [1, 32], strides = [1, 1]} : vector<4x32xf32> to vector<1x32xf32>
    %630 = vector.extract_strided_slice %587 {offsets = [3, 0], sizes = [1, 32], strides = [1, 1]} : vector<4x32xf32> to vector<1x32xf32>
    %cst_198 = arith.constant dense<0.000000e+00> : vector<16xf32>
    %631 = vector.multi_reduction <add>, %628, %cst_198 [1] : vector<16x32xf32> to vector<16xf32>
    %632 = vector.shape_cast %631 : vector<16xf32> to vector<16x1xf32>
    %cst_199 = arith.constant 3.200000e+01 : f32
    %633 = vector.broadcast %cst_199 : f32 to vector<16x1xf32>
    %634 = arith.divf %632, %633 : vector<16x1xf32>
    %635 = vector.broadcast %634 : vector<16x1xf32> to vector<16x32xf32>
    %636 = arith.subf %628, %635 : vector<16x32xf32>
    %637 = arith.mulf %636, %636 : vector<16x32xf32>
    %cst_200 = arith.constant dense<0.000000e+00> : vector<16xf32>
    %638 = vector.multi_reduction <add>, %637, %cst_200 [1] : vector<16x32xf32> to vector<16xf32>
    %639 = vector.shape_cast %638 : vector<16xf32> to vector<16x1xf32>
    %cst_201 = arith.constant 3.200000e+01 : f32
    %640 = vector.broadcast %cst_201 : f32 to vector<16x1xf32>
    %641 = arith.divf %639, %640 : vector<16x1xf32>
    %642 = vector.broadcast %634 : vector<16x1xf32> to vector<16x32xf32>
    %643 = arith.subf %628, %642 : vector<16x32xf32>
    %cst_202 = arith.constant 9.99999974E-6 : f32
    %644 = vector.broadcast %cst_202 : f32 to vector<16x1xf32>
    %645 = arith.addf %641, %644 : vector<16x1xf32>
    %646 = math.rsqrt %645 : vector<16x1xf32>
    %647 = vector.broadcast %646 : vector<16x1xf32> to vector<16x32xf32>
    %648 = arith.mulf %643, %647 : vector<16x32xf32>
    %649 = vector.broadcast %629 : vector<1x32xf32> to vector<16x32xf32>
    %650 = arith.mulf %648, %649 : vector<16x32xf32>
    %651 = vector.broadcast %630 : vector<1x32xf32> to vector<16x32xf32>
    %652 = arith.addf %650, %651 : vector<16x32xf32>
    %c0_203 = arith.constant 0 : index
    %c0_204 = arith.constant 0 : index
    %653 = vector.load %arg14[%c0_203, %c0_204] : memref<32x2xf32, #tpu.memory_space<vmem>>, vector<32x2xf32>
    %cst_205 = arith.constant dense<0.000000e+00> : vector<16x2xf32>
    %654 = tpu.matmul %652, %653, %cst_205 {dimension_numbers = #tpu.dot_dimension_numbers<[1], [0], [0], [1], [0, 0, 1, 1], [], []>} : vector<16x32xf32>, vector<32x2xf32>, vector<16x2xf32> -> vector<16x2xf32>
    %c0_206 = arith.constant 0 : index
    %c0_207 = arith.constant 0 : index
    %655 = vector.load %arg15[%c0_206, %c0_207] : memref<1x2xf32, #tpu.memory_space<vmem>>, vector<1x2xf32>
    %656 = vector.broadcast %655 : vector<1x2xf32> to vector<16x2xf32>
    %657 = arith.addf %654, %656 : vector<16x2xf32>
    %c0_208 = arith.constant 0 : index
    %c0_209 = arith.constant 0 : index
    %658 = vector.load %arg16[%c0_208, %c0_209] : memref<16x2xf32, #tpu.memory_space<vmem>>, vector<16x2xf32>
    tpu.vector_store %arg16[%c0_208, %c0_209], %657 {strides = array<i32>} : memref<16x2xf32, #tpu.memory_space<vmem>>, vector<16x2xf32>,
    return
  }
}

</mosaic_0001>

<bundles_post_ra>
// kernel: forward.1
= control target key start
LH: loop header
LB: loop body
LE: loop exit
PB: predicated region body
PF: predicated region fallthrough
CT: control target
= control target key end

     0   :  { %s6633_s0 = inlined_call_operand.vmem [shape: f32[16,4], index: 0, kind: input, shape index: {}]   ;;  %s6634_s1 = inlined_call_operand.vmem [shape: f32[16,16], index: 1, kind: input, shape index: {}]   ;;  %s6635_s2 = inlined_call_operand.hbm [shape: f32[4,32], index: 2, kind: input, shape index: {}]   ;;  %s6636_s3 = inlined_call_operand.hbm [shape: f32[1,32], index: 3, kind: input, shape index: {}]   ;;  %s6637_s4 = inlined_call_operand.vmem [shape: f32[2,32,192], index: 4, kind: input, shape index: {}]   ;;  %s6638_s5 = inlined_call_operand.vmem [shape: f32[2,1,192], index: 5, kind: input, shape index: {}]   ;;  %s6639_s6 = inlined_call_operand.vmem [shape: f32[2,3,32], index: 6, kind: input, shape index: {}]   ;;  %s6640_s7 = inlined_call_operand.vmem [shape: f32[2,32,32], index: 7, kind: input, shape index: {}]   ;;  %s6641_s8 = inlined_call_operand.vmem [shape: f32[2,1,32], index: 8, kind: input, shape index: {}]   ;;  %s6642_s9 = inlined_call_operand.vmem [shape: f32[2,4,32], index: 9, kind: input, shape index: {}]   ;;  %s6643_s10 = inlined_call_operand.hbm [shape: f32[2,32,64], index: 10, kind: input, shape index: {}]   ;;  %s6644_s11 = inlined_call_operand.hbm [shape: f32[2,1,64], index: 11, kind: input, shape index: {}]   ;;  %s6645_s12 = inlined_call_operand.vmem [shape: f32[2,64,32], index: 12, kind: input, shape index: {}]   ;;  %s6646_s13 = inlined_call_operand.hbm [shape: f32[2,1,32], index: 13, kind: input, shape index: {}]   ;;  %s6647_s14 = inlined_call_operand.vmem [shape: f32[32,2], index: 14, kind: input, shape index: {}]   ;;  %s6648_s15 = inlined_call_operand.hbm [shape: f32[1,2], index: 15, kind: input, shape index: {}]   ;;  %s6649_s16 = inlined_call_operand.vmem [shape: f32[16,2], index: 16, kind: output, shape index: {}]  }
   0x1   :  { %6658 = sst [smem:[#allocation16_spill]] %s6633_s0 }
   0x2   :  { %21 = vsyncpa [#allocation3], 0 }
   0x3   :  { %22 = vsyncpa [#allocation5], 0 }
   0x4   :  { %23 = vsyncpa [#allocation8], 0 }
   0x5   :  { %24 = vsyncpa [#allocation11], 0  ;;  %s5644_s21 = smov [#allocation4]   ;;  %s5645_s23 = smov [#allocation7]  }
   0x6   :  { %s45_s22 = sshll.u32 %s5644_s21, 4  ;;  %s78_s24 = sshll.u32 %s5645_s23, 4  ;;  %s46_s22 = int_to_ptr.vmem [resolvable:$true] %s45_s22  ;;  %s5753_s24 = int_to_ptr.vmem [resolvable:$true] %s78_s24 }
   0x7   :  { %s5504_s27 = scalar_lea.hbm %s6636_s3, 16 }
   0x8   :  { %p5505_p0 = scmp.ne.s32.totalorder %s6636_s3, %s5504_s27  ;;  %p5508_p1 = scmp.lt.u32.totalorder %s5504_s27, %s6636_s3 }
   0xa   :  { %p5510_p2 = pnand %p5508_p1, %p5505_p0 }
   0xc   :  { %5513 = shalt.err (!%p5510_p2)
}
   0xd   :  { %s5514_s17 = scalar_lea.vmem %s46_s22, 16  ;;  %s5518_s18 = scalar_lea.vmem %s46_s22, 32 }
   0xe   :  { %p5515_p3 = scmp.ne.s32.totalorder %s46_s22, %s5514_s17  ;;  %p5519_p4 = scmp.lt.s32.totalorder %s46_s22, %s46_s22 }
   0xf   :  { %p5520_p5 = scmp.lt.s32.totalorder %s5518_s18, %s5514_s17 }
  0x11   :  { %p5521_p6 = por %p5520_p5, %p5519_p4 }
  0x13   :  { %p5522_p7 = pnand %p5521_p6, %p5515_p3 }
  0x15   :  { %5525 = shalt.err (!%p5522_p7)
}
  0x16   :  { %48 = dma.hbm_to_vmem [thread:$0]  %s6636_s3, 16, %s46_s22, [#allocation5]  }
  0x17   :  { %s5526_s25 = scalar_lea.hbm %s6644_s11, 32 }
  0x18   :  { %p5527_p8 = scmp.ne.s32.totalorder %s6644_s11, %s5526_s25  ;;  %p5530_p9 = scmp.lt.u32.totalorder %s5526_s25, %s6644_s11 }
  0x1a   :  { %p5532_p10 = pnand %p5530_p9, %p5527_p8 }
  0x1c   :  { %5535 = shalt.err (!%p5532_p10)
}
  0x1d   :  { %s5536_s30 = scalar_lea.vmem %s5753_s24, 32  ;;  %p5541_p12 = scmp.lt.s32.totalorder %s5753_s24, %s5753_s24 }
  0x1e   :  { %p5537_p11 = scmp.ne.s32.totalorder %s5753_s24, %s5536_s30  ;;  %p5542_p13 = scmp.lt.s32.totalorder %s5536_s30, %s5536_s30 }
  0x20   :  { %p5543_p0 = por %p5542_p13, %p5541_p12 }
  0x22   :  { %p5544_p1 = pnand %p5543_p0, %p5537_p11 }
  0x24   :  { %5547 = shalt.err (!%p5544_p1)
}
  0x25   :  { %s5646_s3 = smov 16   ;;  %s5647_s22 = smov 1  }
  0x26   :  { %84 = dma.hbm_to_vmem [thread:$0]  %s6644_s11, 32, %s5753_s24, [#allocation8], %s5646_s3, %s5646_s3, %s5647_s22  }
  0x27   :  { %s5648_s18 = smov [#allocation2]   ;;  %s5649_s20 = smov [#allocation6]  }
  0x28   :  { %s35_s19 = sshll.u32 %s5648_s18, 4  ;;  %s66_s21 = sshll.u32 %s5649_s20, 4  ;;  %s36_s19 = int_to_ptr.vmem [resolvable:$true] %s35_s19  ;;  %s5787_s21 = int_to_ptr.vmem [resolvable:$true] %s66_s21 }
  0x29   :  { %s5548_s26 = scalar_lea.hbm %s6635_s2, 64 }
  0x2a   :  { %p5549_p2 = scmp.ne.s32.totalorder %s6635_s2, %s5548_s26  ;;  %p5552_p3 = scmp.lt.u32.totalorder %s5548_s26, %s6635_s2 }
  0x2c   :  { %p5554_p4 = pnand %p5552_p3, %p5549_p2 }
  0x2e   :  { %5557 = shalt.err (!%p5554_p4)
}
  0x2f   :  { %s5558_s11 = scalar_lea.vmem %s36_s19, 64  ;;  %p5563_p6 = scmp.lt.s32.totalorder %s36_s19, %s36_s19 }
  0x30   :  { %p5559_p5 = scmp.ne.s32.totalorder %s36_s19, %s5558_s11  ;;  %p5564_p7 = scmp.lt.s32.totalorder %s5558_s11, %s5558_s11 }
  0x32   :  { %p5565_p8 = por %p5564_p7, %p5563_p6 }
  0x34   :  { %p5566_p9 = pnand %p5565_p8, %p5559_p5 }
  0x36   :  { %5569 = shalt.err (!%p5566_p9)
}
  0x37   :  { %38 = dma.hbm_to_vmem [thread:$0]  %s6635_s2, 64, %s36_s19, [#allocation3]  }
  0x38   :  { %s5570_s20 = scalar_lea.hbm %s6643_s10, 1024 }
  0x39   :  { %p5571_p10 = scmp.ne.s32.totalorder %s6643_s10, %s5570_s20  ;;  %p5574_p11 = scmp.lt.u32.totalorder %s5570_s20, %s6643_s10 }
  0x3b   :  { %p5576_p12 = pnand %p5574_p11, %p5571_p10 }
  0x3d   :  { %5579 = shalt.err (!%p5576_p12)
}
  0x3e   :  { %s5580_s28 = scalar_lea.vmem %s5787_s21, 1024  ;;  %p5585_p0 = scmp.lt.s32.totalorder %s5787_s21, %s5787_s21 }
  0x3f   :  { %p5581_p13 = scmp.ne.s32.totalorder %s5787_s21, %s5580_s28  ;;  %p5586_p1 = scmp.lt.s32.totalorder %s5580_s28, %s5580_s28 }
  0x41   :  { %p5587_p2 = por %p5586_p1, %p5585_p0 }
  0x43   :  { %p5588_p3 = pnand %p5587_p2, %p5581_p13 }
  0x45   :  { %5591 = shalt.err (!%p5588_p3)
}
  0x46   :  { %s5650_s2 = smov 128   ;;  %s6654_s19 = smov 8  }
  0x47   :  { %72 = dma.hbm_to_vmem [thread:$0]  %s6643_s10, 1024, %s5787_s21, [#allocation5], %s5650_s2, %s5650_s2, %s6654_s19  }
  0x48   :  { %s5652_s11 = smov [#allocation9]   ;;  %s5653_s0 = smov [#allocation10]  }
  0x49   :  { %s92_s24 = sshll.u32 %s5652_s11, 4  ;;  %s107_s17 = sshll.u32 %s5653_s0, 4  ;;  %s93_s24 = int_to_ptr.vmem [resolvable:$true] %s92_s24  ;;  %s108_s17 = int_to_ptr.vmem [resolvable:$true] %s107_s17 }
  0x4a   :  { %s5592_s23 = scalar_lea.hbm %s6646_s13, 32 }
  0x4b   :  { %p5593_p4 = scmp.ne.s32.totalorder %s6646_s13, %s5592_s23  ;;  %p5596_p5 = scmp.lt.u32.totalorder %s5592_s23, %s6646_s13 }
  0x4d   :  { %p5598_p6 = pnand %p5596_p5, %p5593_p4 }
  0x4f   :  { %5601 = shalt.err (!%p5598_p6)
}
  0x50   :  { %s5602_s10 = scalar_lea.vmem %s93_s24, 32  ;;  %p5607_p8 = scmp.lt.s32.totalorder %s93_s24, %s93_s24 }
  0x51   :  { %p5603_p7 = scmp.ne.s32.totalorder %s93_s24, %s5602_s10  ;;  %p5608_p9 = scmp.lt.s32.totalorder %s5602_s10, %s5602_s10 }
  0x53   :  { %p5609_p10 = por %p5608_p9, %p5607_p8 }
  0x55   :  { %p5610_p11 = pnand %p5609_p10, %p5603_p7 }
  0x57   :  { %5613 = shalt.err (!%p5610_p11)
}
  0x58   :  { %98 = dma.hbm_to_vmem [thread:$0]  %s6646_s13, 32, %s93_s24, [#allocation8], %s5646_s3, %s5646_s3, %s5647_s22  }
  0x59   :  { %s5614_s11 = scalar_lea.hbm %s6648_s15, 16 }
  0x5a   :  { %p5615_p12 = scmp.ne.s32.totalorder %s6648_s15, %s5614_s11  ;;  %p5618_p13 = scmp.lt.u32.totalorder %s5614_s11, %s6648_s15 }
  0x5c   :  { %p5620_p0 = pnand %p5618_p13, %p5615_p12 }
  0x5e   :  { %5623 = shalt.err (!%p5620_p0)
}
  0x5f   :  { %s5624_s25 = scalar_lea.vmem %s108_s17, 16  ;;  %s5628_s26 = scalar_lea.vmem %s108_s17, 32 }
  0x60   :  { %p5625_p1 = scmp.ne.s32.totalorder %s108_s17, %s5624_s25  ;;  %p5629_p2 = scmp.lt.s32.totalorder %s108_s17, %s108_s17 }
  0x61   :  { %p5630_p3 = scmp.lt.s32.totalorder %s5628_s26, %s5624_s25 }
  0x63   :  { %p5631_p4 = por %p5630_p3, %p5629_p2 }
  0x65   :  { %p5632_p5 = pnand %p5631_p4, %p5625_p1 }
  0x67   :  { %5635 = shalt.err (!%p5632_p5)
}
  0x68   :  { %110 = dma.hbm_to_vmem [thread:$0]  %s6648_s15, 16, %s108_s17, [#allocation11]  }
  0x69   :  { %5636 = dma.done.wait [#allocation3], 64  }
  0x6a   :  { %5637 = vsyncadd [#allocation3], 4294967232 }
  0x6b   :  { %5638 = dma.done.wait [#allocation5], 1040  }
  0x6c   :  { %5639 = vsyncadd [#allocation5], 4294966256 }
  0x6d   :  { %5640 = dma.done.wait [#allocation8], 64  }
  0x6e   :  { %5641 = vsyncadd [#allocation8], 4294967232 }
  0x6f   :  { %5642 = dma.done.wait [#allocation11], 16  }
  0x70   :  { %5643 = vsyncadd [#allocation11], 4294967280  ;;  %vm154_vm0 = vcmask 1043456   ;;  %vm147_vm1 = vcmask 31744   ;;  %v139_v0 = vld [vmem:[#allocation2] sm:$0xf]  ;;  %v243_v16 = vlaneseq }
  0x71   :  { %s6659_s28 = sld [smem:[#allocation16_spill]]  ;;  %4604 = vmatprep.subr.msk.mxu0 %vm154_vm0, %v139_v0  ;;  %v234_v3 = vld [vmem:[%s6637_s4 + $0x8] sm:$0xff]  ;;  %v236_v4 = vld [vmem:[%s6637_s4 + $0x18] sm:$0xff]  ;;  %v233_v5 = vld [vmem:[%s6637_s4] sm:$0xff]  ;;  %v5654_v15 = vmov 0.0   ;;  %s5655_s21 = smov 96  }
  0x72   :  { %4605 = vmatpush3.msk.msra.mxu0 %vm154_vm0, %v139_v0  ;;  %v4926_v6 = vpack.c.bf16 %v236_v4, %v234_v3  ;;  %v235_v7 = vld [vmem:[%s6637_s4 + $0x10] sm:$0xff]  ;;  %v238_v9 = vld [vmem:[%s6637_s4 + $0x28] sm:$0xff]  ;;  %v240_v10 = vld [vmem:[%s6637_s4 + $0x38] sm:$0xff]  ;;  %324 = vmatprep.mubr.f32.mxu1 %v5654_v15  ;;  %v5880_v18 = vshrl.u32 %v243_v16, 7  ;;  %vm253_vm2 = vcmask 261120   ;;  %vm357_vm3 = vcmask 64512  }
  0x73   :  { %v4928_v8 = vpack.c.bf16 %v235_v7, %v233_v5  ;;  %v4930_v11 = vpack.c.bf16 %v240_v10, %v238_v9  ;;  %v237_v12 = vld [vmem:[%s6637_s4 + $0x20] sm:$0xff]  ;;  %v239_v13 = vld [vmem:[%s6637_s4 + $0x30] sm:$0xff]  ;;  %s5656_s2 = smov 32   ;;  %vm5922_vm4 = vmpackc.low %vm357_vm3, %vm357_vm3  ;;  %vm473_vm7 = vcmask 130048   ;;  %s5657_s18 = smov 64   ;;  %vm1813_vm8 = vcmask 195584  }
  0x74   :  { %4927 = vmatprep.subr.bf16.mxu1 %v4926_v6  ;;  %v4932_v14 = vpack.c.bf16 %v239_v13, %v237_v12  ;;  %v337_v17 = vld [vmem:[%s6639_s6] sm:$0x7]  ;;  %v5883_v20 = vsub.s32 2, %v5880_v18  ;;  %v4242_v22 = vld [vmem:[#allocation4] ss:$0 sm:$0xff]  ;;  %v5897_v27 = vsub.s32 0, %v5880_v18 }
  0x75   :  { %4929 = vmatpush1.bf16.msra.mxu1 %v4928_v8  ;;  %v338_v19 = vmul.f32 0.35355338, %v337_v17  ;;  %v241_v28 = vld [vmem:[%s6638_s5] sm:$0x3]  ;;  %v5904_v30 = vsub.s32 1, %v5880_v18  ;;  %s5658_s20 = smov 120  }
  0x76   :  { %4931 = vmatprep.subr.bf16.mxu1 %v4930_v11  ;;  %v246_v29 = vrot.slane %v241_v28, %v5897_v27  ;;  %s5659_s23 = smov 24   ;;  %s5660_s25 = smov 88   ;;  %vm2061_vm9 = vcmask 523264   ;;  %vm4229_vm10 = vcmask 15360  }
  0x77   :  { %v129_v1 = vld [vmem:[%s6659_s28] sm:$0xff]  ;;  %v130_v2 = vld [vmem:[%s6659_s28 + $0x8] sm:$0xff]  ;;  %v485_v21 = vrot.slane %v338_v19, %v5883_v20  ;;  %v342_v31 = vrot.slane %v338_v19, %v5897_v27  ;;  %v250_v36 = vrot.slane %v241_v28, %v5904_v30  ;;  %v348_v56 = vrot.slane %v338_v19, %v5904_v30  ;;  %s5661_s26 = smov 56   ;;  %s5662_s13 = smov 112  }
  0x78   :  { %4606 = vmatprep.mubr.msk.f32.mxu0 %vm147_vm1, %v129_v1  ;;  %v5958_v1 = vld [vmem:[%s6634_s1 + $0x8] sm:$0xff]  ;;  %s5663_s22 = smov 80   ;;  %s5664_s24 = smov 48  }
  0x79   :  { %4607 = vmatmul.mubr.msk.f32.vlgmr.msra.gmra.mrb[0].mxu0 %vm147_vm1, %v130_v2  ;;  %4933 = vmatpush1.bf16.msra.mxu1 %v4932_v14  ;;  %v5963_v2 = vld [vmem:[%s6634_s1] sm:$0xff]  ;;  %vm134_vm5 = vcmp.eq.f32.partialorder %v5958_v1, 0.0  ;;  %s6656_s27 = smov 104   ;;  %s6653_s28 = smov 72  }
  0x7a   :  { %487 = vrot.lane.b32.xlu0 %v485_v21, %s5655_s21  ;;  %vm133_vm6 = vcmp.eq.f32.partialorder %v5963_v2, 0.0  ;;  %v5968_v3 = vsel %vm134_vm5, 1.0, %v5654_v15  ;;  %s6651_s10 = smov 40  }
  0x7b   :  { %v5971_v4 = vsel %vm133_vm6, 1.0, %v5654_v15 }
  0xec   :  { %v488_v33 = vpop.permute.xlu0 %487 }
 0x14c   :  { %v4608_v23 = vpop.f32.mrb[0].mxu0 }
 0x14d   :  { %v224_v24 = vpop.f32.mrb[1].mxu0  ;;  %v5892_v26 = vadd.f32 %v4608_v23, %v4242_v22 }
 0x14e   :  { %v5887_v25 = vadd.f32 %v4242_v22, %v224_v24 }
 0x150   :  { %4246 = vmatmul.mubr.msk.f32.vlgmr.msra.gmra.mrb[0].mxu1 %vm253_vm2, %v5887_v25 }
 0x151   :  { %330 = vmatprep.mubr.f32.mxu1 %v5654_v15 }
 0x154   :  { %4247 = vmatmul.mubr.msk.f32.gmra.mrb[2].mxu1 %vm253_vm2, %v5892_v26 }
 0x223   :  { %v326_v32 = vpop.f32.mrb[0].mxu1 }
 0x224   :  { %v327_v34 = vadd.f32 %v326_v32, %v246_v29  ;;  %v328_v35 = vpop.f32.mrb[1].mxu1 }
 0x225   :  { %v329_v42 = vadd.f32 %v328_v35, %v250_v36 }
 0x226   :  { %v5908_v37 = vmul.f32 %v488_v33, %v327_v34  ;;  %v5910_v38 = vmul.f32 %v342_v31, %v327_v34  ;;  %v5945_v57 = vmul.f32 %v348_v56, %v327_v34 }
 0x227   :  { %v332_v39 = vpop.f32.mrb[2].mxu1 }
 0x228   :  { %v333_v40 = vadd.f32 %v332_v39, %v246_v29  ;;  %v334_v41 = vpop.f32.mrb[3].mxu1  ;;  %494 = vrot.lane.b32.xlu0 %v5908_v37, %s5656_s2  ;;  %4613 = vmatprep.mubr.msk.f32.mxu0 %vm357_vm3, %v5910_v38 }
 0x229   :  { %v335_v43 = vadd.f32 %v334_v41, %v250_v36 }
 0x22a   :  { %v5916_v44 = vmul.f32 %v342_v31, %v333_v40  ;;  %v5918_v45 = vmul.f32 %v488_v33, %v333_v40  ;;  %v5926_v47 = vpack.i.bf16 %v333_v40, %v327_v34  ;;  %v5951_v58 = vmul.f32 %v348_v56, %v333_v40 }
 0x22b   :  { %v4940_v48 = vpack.c.bf16 %v335_v43, %v329_v42  ;;  %v5928_v49 = vpack.i.bf16 %v335_v43, %v329_v42 }
 0x22c   :  { %496 = vrot.lane.b32.xlu1 %v5918_v45, %s5656_s2 }
 0x22d   :  { %4942 = vmatprep.subr.msk.bf16.mxu1 %vm5922_vm4, %v4940_v48 }
 0x22e   :  { %4945 = vmatpush3.bf16.xpose.msk.msra.mxu1 %vm5922_vm4, %v4940_v48 }
 0x230   :  { %5199 = vrot.lane.b32.xlu1 %v5926_v47, %s5655_s21 }
 0x29a   :  { %v495_v50 = vpop.permute.xlu0 %494 }
 0x29b   :  { %4623 = vmatprep.mubr.msk.f32.mxu1 %vm357_vm3, %v495_v50 }
 0x29e   :  { %v497_v51 = vpop.permute.xlu1 %496 }
 0x29f   :  { %4624 = vmatmul.mubr.msk.f32.vlgmr.msra.gmra.mrb[4].mxu1 %vm357_vm3, %v497_v51 }
 0x2a2   :  { %v5200_v52 = vpop.permute.xlu1 %5199 }
 0x2a3   :  { %v5202_v53 = vunpack.i.h.bf16 %v5200_v52  ;;  %v5201_v54 = vunpack.i.l.bf16 %v5200_v52 }
 0x2a5   :  { %v4934_v55 = vpack.c.bf16 %v5202_v53, %v5201_v54 }
 0x2a7   :  { %4936 = vmatprep.subr.msk.bf16.mxu0 %vm5922_vm4, %v4934_v55 }
 0x2a8   :  { %4939 = vmatpush3.bf16.xpose.msk.msra.mxu0 %vm5922_vm4, %v4934_v55 }
 0x2af   :  { %4614 = vmatmul.mubr.msk.f32.vlgmr.msra.gmra.mrb[2].mxu0 %vm357_vm3, %v5916_v44 }
 0x2b0   :  { %4616 = vmatprep.mubr.msk.f32.mxu0 %vm357_vm3, %v5945_v57 }
 0x2b3   :  { %4617 = vmatmul.mubr.msk.f32.gmra.mrb[4].mxu0 %vm357_vm3, %v5951_v58 }
 0x372   :  { %v4625_v59 = vpop.f32.mrb[4].mxu1 }
 0x373   :  { %v4261_v60 = vclamps-f32 %v4625_v59, 5.0  ;;  %v574_v61 = vpop.f32.mrb[5].mxu1 }
 0x374   :  { %v4260_v62 = vclamps-f32 %v574_v61, 5.0 }
 0x375   :  { %v589_v63 = vmul.f32 1.442695, %v4261_v60 }
 0x376   :  { %v587_v0 = vmul.f32 1.442695, %v4260_v62 }
 0x377   :  { %5358 = vpow2.f32 %v589_v63 }
 0x378   :  { %5360 = vpow2.f32 %v587_v0 }
 0x381   :  { %v5359_v5 = vpop.eup %5358 }
 0x382   :  { %v5361_v6 = vpop.eup %5360  ;;  %v4615_v7 = vpop.f32.mrb[2].mxu0  ;;  %v592_v8 = vmul.f32 %v5359_v5, %v5968_v3 }
 0x383   :  { %v440_v9 = vpop.f32.mrb[3].mxu0  ;;  %v591_v10 = vmul.f32 %v5361_v6, %v5971_v4  ;;  %v460_v12 = vmul.f32 %v4615_v7, %v5958_v1 }
 0x384   :  { %v596_v11 = vsel %vm473_vm7, %v592_v8, 0.0  ;;  %v459_v14 = vmul.f32 %v440_v9, %v5963_v2 }
 0x385   :  { %597 = vadd.xlane.f32.xlu1 %v596_v11  ;;  %v593_v13 = vsel %vm473_vm7, %v591_v10, 0.0 }
 0x386   :  { %594 = vadd.xlane.f32.xlu0 %v593_v13  ;;  %v4618_v16 = vpop.f32.mrb[4].mxu0 }
 0x387   :  { %v462_v17 = vadd.f32 %v4618_v16, %v460_v12  ;;  %v450_v19 = vpop.f32.mrb[5].mxu0 }
 0x388   :  { %v461_v21 = vadd.f32 %v459_v14, %v450_v19 }
 0x389   :  { %v4255_v22 = vclamps-f32 %v462_v17, 5.0 }
 0x38a   :  { %v4254_v24 = vclamps-f32 %v461_v21, 5.0 }
 0x38b   :  { %v469_v23 = vmul.f32 1.442695, %v4255_v22 }
 0x38c   :  { %v467_v28 = vmul.f32 1.442695, %v4254_v24 }
 0x38d   :  { %5362 = vpow2.f32 %v469_v23 }
 0x38e   :  { %5364 = vpow2.f32 %v467_v28 }
 0x396   :  { %5209 = vrot.lane.b32.xlu1 %v5926_v47, %s5657_s18 }
 0x397   :  { %v5363_v29 = vpop.eup %5362 }
 0x398   :  { %v472_v31 = vmul.f32 %v5363_v29, %v5958_v1  ;;  %v5365_v32 = vpop.eup %5364 }
 0x399   :  { %v471_v34 = vmul.f32 %v5365_v32, %v5963_v2 }
 0x39a   :  { %v477_v33 = vsel %vm473_vm7, %v472_v31, 0.0 }
 0x39b   :  { %v474_v35 = vsel %vm473_vm7, %v471_v34, 0.0 }
 0x39c   :  { %5204 = vrot.lane.b32.xlu0 %v5928_v49, %s5656_s2 }
 0x3ba   :  { %478 = vadd.xlane.f32.xlu1 %v477_v33 }
 0x3be   :  { %475 = vadd.xlane.f32.xlu1 %v474_v35 }
 0x412   :  { %v598_v36 = vpop.xlane.xlu1 %597 }
 0x413   :  { %v600_v39 = vadd.f32 1e-06, %v598_v36  ;;  %v595_v40 = vpop.xlane.xlu0 %594 }
 0x414   :  { %v599_v41 = vadd.f32 1e-06, %v595_v40 }
 0x415   :  { %5366 = vrcp.f32 %v600_v39 }
 0x416   :  { %5368 = vrcp.f32 %v599_v41  ;;  %v5210_v42 = vpop.permute.xlu1 %5209 }
 0x417   :  { %v5212_v43 = vunpack.i.h.bf16 %v5210_v42  ;;  %v5211_v48 = vunpack.i.l.bf16 %v5210_v42  ;;  %v5987_v50 = vpop.permute.xlu0 %5204 }
 0x418   :  { %5214 = vrot.lane.b32.xlu0 %v5987_v50, %s5657_s18 }
 0x419   :  { %v4946_v51 = vpack.c.bf16 %v5212_v43, %v5211_v48 }
 0x41b   :  { %4947 = vmatprep.subr.bf16.mxu0 %v4946_v51 }
 0x41c   :  { %4949 = vmatpush3.bf16.msra.mxu0 %v4946_v51  ;;  %5219 = vrot.lane.b32.xlu0 %v5928_v49, %s5658_s20 }
 0x41f   :  { %v5367_v52 = vpop.eup %5366 }
 0x420   :  { %v5369_v53 = vpop.eup %5368  ;;  %v610_v54 = vmul.f32 0.09090909, %v5367_v52 }
 0x421   :  { %v609_v55 = vmul.f32 0.09090909, %v5369_v53 }
 0x422   :  { %v612_v56 = vmul.f32 %v610_v54, %v592_v8 }
 0x423   :  { %v611_v59 = vmul.f32 %v609_v55, %v591_v10 }
 0x424   :  { %617 = vrot.lane.b32.xlu1 %v612_v56, %s5646_s3 }
 0x425   :  { %615 = vrot.lane.b32.xlu0 %v611_v59, %s5646_s3 }
 0x428   :  { %853 = vrot.lane.b32.xlu1 %v5918_v45, %s5659_s23 }
 0x429   :  { %851 = vrot.lane.b32.xlu0 %v5908_v37, %s5659_s23 }
 0x42c   :  { %720 = vrot.lane.b32.xlu1 %v5910_v38, %s5658_s20 }
 0x42d   :  { %5224 = vrot.lane.b32.xlu0 %v5926_v47, %s5660_s25 }
 0x430   :  { %724 = vrot.lane.b32.xlu1 %v5945_v57, %s5658_s20 }
 0x431   :  { %722 = vrot.lane.b32.xlu0 %v5916_v44, %s5658_s20 }
 0x435   :  { %726 = vrot.lane.b32.xlu0 %v5951_v58, %s5658_s20 }
 0x447   :  { %v479_v60 = vpop.xlane.xlu1 %478 }
 0x448   :  { %v481_v63 = vadd.f32 1e-06, %v479_v60 }
 0x44b   :  { %v476_v61 = vpop.xlane.xlu1 %475 }
 0x44c   :  { %v480_v62 = vadd.f32 1e-06, %v476_v61 }
 0x44e   :  { %5370 = vrcp.f32 %v480_v62 }
 0x44f   :  { %5372 = vrcp.f32 %v481_v63 }
 0x458   :  { %v5371_v5 = vpop.eup %5370 }
 0x459   :  { %v5373_v8 = vpop.eup %5372  ;;  %v603_v10 = vmul.f32 0.90909094, %v5371_v5 }
 0x45a   :  { %v604_v12 = vmul.f32 0.90909094, %v5373_v8 }
 0x45b   :  { %v605_v19 = vmul.f32 %v603_v10, %v471_v34 }
 0x45c   :  { %v606_v21 = vmul.f32 %v604_v12, %v472_v31 }
 0x48a   :  { %v5215_v0 = vpop.permute.xlu0 %5214 }
 0x48b   :  { %v5217_v6 = vunpack.i.h.bf16 %v5215_v0  ;;  %v5216_v7 = vunpack.i.l.bf16 %v5215_v0 }
 0x48d   :  { %v4950_v9 = vpack.c.bf16 %v5217_v6, %v5216_v7 }
 0x48e   :  { %v5220_v11 = vpop.permute.xlu0 %5219 }
 0x48f   :  { %v5222_v13 = vunpack.i.h.bf16 %v5220_v11  ;;  %v5221_v14 = vunpack.i.l.bf16 %v5220_v11  ;;  %4951 = vmatprep.subr.bf16.mxu0 %v4950_v9 }
 0x490   :  { %4953 = vmatpush3.bf16.msra.mxu0 %v4950_v9 }
 0x491   :  { %v4960_v16 = vpack.c.bf16 %v5222_v13, %v5221_v14 }
 0x493   :  { %4962 = vmatprep.subr.msk.bf16.mxu0 %vm5922_vm4, %v4960_v16 }
 0x496   :  { %v618_v17 = vpop.permute.xlu1 %617 }
 0x497   :  { %v616_v22 = vpop.permute.xlu0 %615  ;;  %v622_v24 = vsel %vm473_vm7, %v606_v21, %v618_v17 }
 0x498   :  { %v621_v23 = vsel %vm473_vm7, %v605_v19, %v616_v22 }
 0x499   :  { %4634 = vmatprep.mubr.msk.f32.mxu0 %vm253_vm2, %v621_v23 }
 0x49a   :  { %4635 = vmatmul.mubr.msk.f32.vlgmr.msra.gmra.mrb[6].mxu0 %vm253_vm2, %v622_v24  ;;  %v854_v28 = vpop.permute.xlu1 %853 }
 0x49b   :  { %v852_v29 = vpop.permute.xlu0 %851  ;;  %4965 = vmatpush3.bf16.xpose.msk.msra.mxu0 %vm5922_vm4, %v4960_v16 }
 0x49c   :  { %4651 = vmatprep.mubr.msk.f32.mxu0 %vm357_vm3, %v852_v29 }
 0x49e   :  { %v721_v31 = vpop.permute.xlu1 %720 }
 0x49f   :  { %v5225_v32 = vpop.permute.xlu0 %5224  ;;  %4641 = vmatprep.mubr.msk.f32.mxu1 %vm357_vm3, %v721_v31 }
 0x4a0   :  { %v5227_v33 = vunpack.i.h.bf16 %v5225_v32  ;;  %v5226_v34 = vunpack.i.l.bf16 %v5225_v32 }
 0x4a2   :  { %v4954_v35 = vpack.c.bf16 %v5227_v33, %v5226_v34  ;;  %4652 = vmatmul.mubr.msk.f32.vlgmr.msra.gmra.mrb[8].mxu0 %vm357_vm3, %v854_v28  ;;  %v725_v39 = vpop.permute.xlu1 %724 }
 0x4a3   :  { %v723_v36 = vpop.permute.xlu0 %722 }
 0x4a4   :  { %4956 = vmatprep.subr.msk.bf16.mxu1 %vm5922_vm4, %v4954_v35 }
 0x4a5   :  { %4959 = vmatpush3.bf16.xpose.msk.msra.mxu1 %vm5922_vm4, %v4954_v35 }
 0x4a7   :  { %v727_v40 = vpop.permute.xlu0 %726 }
 0x4ac   :  { %4642 = vmatmul.mubr.msk.f32.vlgmr.msra.gmra.mrb[6].mxu1 %vm357_vm3, %v723_v36 }
 0x4ad   :  { %4644 = vmatprep.mubr.msk.f32.mxu1 %vm357_vm3, %v725_v39 }
 0x4b0   :  { %4645 = vmatmul.mubr.msk.f32.gmra.mrb[8].mxu1 %vm357_vm3, %v727_v40 }
 0x56d   :  { %v6027_v41 = vpop.f32.mrb[6].mxu0 }
 0x56e   :  { %v6029_v42 = vpop.f32.mrb[7].mxu0 }
 0x575   :  { %v4653_v43 = vpop.f32.mrb[8].mxu0 }
 0x576   :  { %v4277_v48 = vclamps-f32 %v4653_v43, 5.0  ;;  %v933_v51 = vpop.f32.mrb[9].mxu0 }
 0x577   :  { %v4276_v52 = vclamps-f32 %v933_v51, 5.0 }
 0x578   :  { %v948_v53 = vmul.f32 1.442695, %v4277_v48 }
 0x579   :  { %v946_v54 = vmul.f32 1.442695, %v4276_v52 }
 0x57a   :  { %5374 = vpow2.f32 %v948_v53 }
 0x57b   :  { %5376 = vpow2.f32 %v946_v54 }
 0x57f   :  { %v4643_v55 = vpop.f32.mrb[6].mxu1 }
 0x580   :  { %v810_v56 = vpop.f32.mrb[7].mxu1  ;;  %v830_v59 = vmul.f32 %v4643_v55, %v5958_v1 }
 0x581   :  { %v829_v60 = vmul.f32 %v810_v56, %v5963_v2 }
 0x583   :  { %v4646_v61 = vpop.f32.mrb[8].mxu1 }
 0x584   :  { %v832_v62 = vadd.f32 %v4646_v61, %v830_v59  ;;  %v820_v63 = vpop.f32.mrb[9].mxu1  ;;  %v5375_v5 = vpop.eup %5374 }
 0x585   :  { %v831_v0 = vadd.f32 %v829_v60, %v820_v63  ;;  %v5377_v7 = vpop.eup %5376  ;;  %v951_v9 = vmul.f32 %v5375_v5, %v5968_v3 }
 0x586   :  { %v4271_v6 = vclamps-f32 %v832_v62, 5.0  ;;  %v950_v11 = vmul.f32 %v5377_v7, %v5971_v4 }
 0x587   :  { %v4270_v8 = vclamps-f32 %v831_v0, 5.0  ;;  %v955_v13 = vsel %vm473_vm7, %v951_v9, 0.0 }
 0x588   :  { %v839_v10 = vmul.f32 1.442695, %v4271_v6  ;;  %956 = vadd.xlane.f32.xlu0 %v955_v13  ;;  %v952_v14 = vsel %vm473_vm7, %v950_v11, 0.0 }
 0x589   :  { %v837_v12 = vmul.f32 1.442695, %v4270_v8  ;;  %953 = vadd.xlane.f32.xlu1 %v952_v14 }
 0x58a   :  { %5378 = vpow2.f32 %v839_v10 }
 0x58b   :  { %5380 = vpow2.f32 %v837_v12 }
 0x594   :  { %v5379_v16 = vpop.eup %5378 }
 0x595   :  { %v5381_v17 = vpop.eup %5380  ;;  %v842_v19 = vmul.f32 %v5379_v16, %v5958_v1 }
 0x596   :  { %v841_v21 = vmul.f32 %v5381_v17, %v5963_v2 }
 0x597   :  { %v846_v22 = vsel %vm473_vm7, %v842_v19, 0.0 }
 0x598   :  { %847 = vadd.xlane.f32.xlu1 %v846_v22  ;;  %v843_v23 = vsel %vm473_vm7, %v841_v21, 0.0 }
 0x599   :  { %844 = vadd.xlane.f32.xlu0 %v843_v23 }
 0x5a9   :  { %5234 = vrot.lane.b32.xlu1 %v5987_v50, %s5661_s26 }
 0x5ad   :  { %5239 = vrot.lane.b32.xlu1 %v5928_v49, %s5662_s13 }
 0x5af   :  { %5229 = vrot.lane.b32.xlu0 %v5926_v47, %s5661_s26 }
 0x615   :  { %v957_v24 = vpop.xlane.xlu0 %956 }
 0x616   :  { %v959_v28 = vadd.f32 1e-06, %v957_v24  ;;  %v954_v29 = vpop.xlane.xlu1 %953 }
 0x617   :  { %v958_v31 = vadd.f32 1e-06, %v954_v29 }
 0x618   :  { %5382 = vrcp.f32 %v959_v28 }
 0x619   :  { %5384 = vrcp.f32 %v958_v31 }
 0x622   :  { %v5383_v32 = vpop.eup %5382 }
 0x623   :  { %v5385_v33 = vpop.eup %5384  ;;  %v969_v35 = vmul.f32 0.09090909, %v5383_v32 }
 0x624   :  { %v968_v39 = vmul.f32 0.09090909, %v5385_v33 }
 0x625   :  { %v848_v34 = vpop.xlane.xlu1 %847  ;;  %v971_v40 = vmul.f32 %v969_v35, %v951_v9 }
 0x626   :  { %v845_v36 = vpop.xlane.xlu0 %844  ;;  %v970_v43 = vmul.f32 %v968_v39, %v950_v11  ;;  %v850_v5 = vadd.f32 1e-06, %v848_v34 }
 0x627   :  { %976 = vrot.lane.b32.xlu1 %v971_v40, %s5646_s3  ;;  %v849_v0 = vadd.f32 1e-06, %v845_v36 }
 0x628   :  { %974 = vrot.lane.b32.xlu0 %v970_v43, %s5646_s3 }
 0x629   :  { %v5235_v48 = vpop.permute.xlu1 %5234  ;;  %5386 = vrcp.f32 %v849_v0 }
 0x62a   :  { %v5230_v51 = vpop.permute.xlu0 %5229  ;;  %v5237_v52 = vunpack.i.h.bf16 %v5235_v48  ;;  %v5236_v53 = vunpack.i.l.bf16 %v5235_v48  ;;  %5388 = vrcp.f32 %v850_v5 }
 0x62b   :  { %v5232_v54 = vunpack.i.h.bf16 %v5230_v51  ;;  %v5231_v55 = vunpack.i.l.bf16 %v5230_v51  ;;  %1208 = vrot.lane.b32.xlu1 %v5918_v45, %s5646_s3 }
 0x62c   :  { %1206 = vrot.lane.b32.xlu0 %v5908_v37, %s5646_s3  ;;  %v4970_v62 = vpack.c.bf16 %v5237_v52, %v5236_v53 }
 0x62d   :  { %v5240_v56 = vpop.permute.xlu1 %5239  ;;  %v4966_v59 = vpack.c.bf16 %v5232_v54, %v5231_v55 }
 0x62e   :  { %v5242_v60 = vunpack.i.h.bf16 %v5240_v56  ;;  %v5241_v61 = vunpack.i.l.bf16 %v5240_v56 }
 0x62f   :  { %4967 = vmatprep.subr.bf16.mxu1 %v4966_v59  ;;  %1075 = vrot.lane.b32.xlu1 %v5910_v38, %s5662_s13 }
 0x630   :  { %4969 = vmatpush3.bf16.msra.mxu1 %v4966_v59  ;;  %5244 = vrot.lane.b32.xlu0 %v5926_v47, %s5663_s22  ;;  %v4980_v63 = vpack.c.bf16 %v5242_v60, %v5241_v61 }
 0x631   :  { %4971 = vmatprep.subr.bf16.mxu1 %v4970_v62 }
 0x633   :  { %1079 = vrot.lane.b32.xlu1 %v5945_v57, %s5662_s13  ;;  %v5387_v6 = vpop.eup %5386 }
 0x634   :  { %4973 = vmatpush3.bf16.msra.mxu1 %v4970_v62  ;;  %1077 = vrot.lane.b32.xlu0 %v5916_v44, %s5662_s13  ;;  %v5389_v7 = vpop.eup %5388  ;;  %v962_v8 = vmul.f32 0.90909094, %v5387_v6 }
 0x635   :  { %4982 = vmatprep.subr.msk.bf16.mxu1 %vm5922_vm4, %v4980_v63  ;;  %v963_v9 = vmul.f32 0.90909094, %v5389_v7 }
 0x636   :  { %v964_v11 = vmul.f32 %v962_v8, %v841_v21 }
 0x637   :  { %v965_v12 = vmul.f32 %v963_v9, %v842_v19 }
 0x638   :  { %1081 = vrot.lane.b32.xlu0 %v5951_v58, %s5662_s13 }
 0x699   :  { %v977_v10 = vpop.permute.xlu1 %976 }
 0x69a   :  { %v975_v13 = vpop.permute.xlu0 %974  ;;  %v981_v16 = vsel %vm473_vm7, %v965_v12, %v977_v10 }
 0x69b   :  { %v980_v14 = vsel %vm473_vm7, %v964_v11, %v975_v13 }
 0x69c   :  { %4662 = vmatprep.mubr.msk.f32.mxu1 %vm253_vm2, %v980_v14 }
 0x69d   :  { %v1209_v17 = vpop.permute.xlu1 %1208  ;;  %4663 = vmatmul.mubr.msk.f32.vlgmr.msra.gmra.mrb[10].mxu1 %vm253_vm2, %v981_v16 }
 0x69e   :  { %4985 = vmatpush3.bf16.xpose.msk.msra.mxu1 %vm5922_vm4, %v4980_v63  ;;  %v1207_v22 = vpop.permute.xlu0 %1206 }
 0x69f   :  { %4679 = vmatprep.mubr.msk.f32.mxu1 %vm357_vm3, %v1207_v22 }
 0x6a1   :  { %v1076_v23 = vpop.permute.xlu1 %1075 }
 0x6a2   :  { %v5245_v24 = vpop.permute.xlu0 %5244  ;;  %4669 = vmatprep.mubr.msk.f32.mxu0 %vm357_vm3, %v1076_v23 }
 0x6a3   :  { %v5247_v19 = vunpack.i.h.bf16 %v5245_v24  ;;  %v5246_v21 = vunpack.i.l.bf16 %v5245_v24 }
 0x6a5   :  { %v4974_v28 = vpack.c.bf16 %v5247_v19, %v5246_v21  ;;  %4680 = vmatmul.mubr.msk.f32.vlgmr.msra.gmra.mrb[12].mxu1 %vm357_vm3, %v1209_v17  ;;  %v1080_v31 = vpop.permute.xlu1 %1079 }
 0x6a6   :  { %v1078_v29 = vpop.permute.xlu0 %1077 }
 0x6a7   :  { %4976 = vmatprep.subr.msk.bf16.mxu0 %vm5922_vm4, %v4974_v28 }
 0x6a8   :  { %4979 = vmatpush3.bf16.xpose.msk.msra.mxu0 %vm5922_vm4, %v4974_v28 }
 0x6aa   :  { %v1082_v32 = vpop.permute.xlu0 %1081 }
 0x6af   :  { %4670 = vmatmul.mubr.msk.f32.vlgmr.msra.gmra.mrb[10].mxu0 %vm357_vm3, %v1078_v29 }
 0x6b0   :  { %4672 = vmatprep.mubr.msk.f32.mxu0 %vm357_vm3, %v1080_v31 }
 0x6b3   :  { %4673 = vmatmul.mubr.msk.f32.gmra.mrb[12].mxu0 %vm357_vm3, %v1082_v32 }
 0x770   :  { %v6081_v33 = vpop.f32.mrb[10].mxu1 }
 0x771   :  { %v6083_v34 = vpop.f32.mrb[11].mxu1 }
 0x778   :  { %v4681_v35 = vpop.f32.mrb[12].mxu1 }
 0x779   :  { %v4293_v36 = vclamps-f32 %v4681_v35, 5.0  ;;  %v1288_v39 = vpop.f32.mrb[13].mxu1 }
 0x77a   :  { %v4292_v40 = vclamps-f32 %v1288_v39, 5.0 }
 0x77b   :  { %v1303_v43 = vmul.f32 1.442695, %v4293_v36 }
 0x77c   :  { %v1301_v48 = vmul.f32 1.442695, %v4292_v40 }
 0x77d   :  { %5390 = vpow2.f32 %v1303_v43 }
 0x77e   :  { %5392 = vpow2.f32 %v1301_v48 }
 0x782   :  { %v4671_v51 = vpop.f32.mrb[10].mxu0 }
 0x783   :  { %v1165_v52 = vpop.f32.mrb[11].mxu0  ;;  %v1185_v53 = vmul.f32 %v4671_v51, %v5958_v1 }
 0x784   :  { %v1184_v54 = vmul.f32 %v1165_v52, %v5963_v2 }
 0x786   :  { %v4674_v55 = vpop.f32.mrb[12].mxu0 }
 0x787   :  { %v5391_v56 = vpop.eup %5390  ;;  %v1187_v59 = vadd.f32 %v4674_v55, %v1185_v53  ;;  %v1175_v60 = vpop.f32.mrb[13].mxu0 }
 0x788   :  { %v5393_v61 = vpop.eup %5392  ;;  %v1186_v62 = vadd.f32 %v1184_v54, %v1175_v60  ;;  %v1306_v63 = vmul.f32 %v5391_v56, %v5968_v3 }
 0x789   :  { %v4287_v0 = vclamps-f32 %v1187_v59, 5.0  ;;  %v1305_v5 = vmul.f32 %v5393_v61, %v5971_v4 }
 0x78a   :  { %v4286_v6 = vclamps-f32 %v1186_v62, 5.0  ;;  %v1310_v7 = vsel %vm473_vm7, %v1306_v63, 0.0 }
 0x78b   :  { %v1194_v8 = vmul.f32 1.442695, %v4287_v0  ;;  %1311 = vadd.xlane.f32.xlu0 %v1310_v7  ;;  %v1307_v9 = vsel %vm473_vm7, %v1305_v5, 0.0 }
 0x78c   :  { %v1192_v10 = vmul.f32 1.442695, %v4286_v6  ;;  %1308 = vadd.xlane.f32.xlu1 %v1307_v9 }
 0x78d   :  { %5394 = vpow2.f32 %v1194_v8 }
 0x78e   :  { %5396 = vpow2.f32 %v1192_v10 }
 0x797   :  { %v5395_v11 = vpop.eup %5394 }
 0x798   :  { %v5397_v12 = vpop.eup %5396  ;;  %v1197_v13 = vmul.f32 %v5395_v11, %v5958_v1 }
 0x799   :  { %v1196_v14 = vmul.f32 %v5397_v12, %v5963_v2 }
 0x79a   :  { %v1201_v16 = vsel %vm473_vm7, %v1197_v13, 0.0 }
 0x79b   :  { %1202 = vadd.xlane.f32.xlu1 %v1201_v16  ;;  %v1198_v17 = vsel %vm473_vm7, %v1196_v14, 0.0 }
 0x79c   :  { %1199 = vadd.xlane.f32.xlu0 %v1198_v17 }
 0x7ac   :  { %5254 = vrot.lane.b32.xlu1 %v5987_v50, %s5664_s24 }
 0x7b0   :  { %5259 = vrot.lane.b32.xlu1 %v5928_v49, %s6656_s27 }
 0x7b2   :  { %5249 = vrot.lane.b32.xlu0 %v5926_v47, %s5664_s24 }
 0x818   :  { %v1312_v22 = vpop.xlane.xlu0 %1311 }
 0x819   :  { %v1314_v23 = vadd.f32 1e-06, %v1312_v22  ;;  %v1309_v24 = vpop.xlane.xlu1 %1308 }
 0x81a   :  { %v1313_v19 = vadd.f32 1e-06, %v1309_v24 }
 0x81b   :  { %5398 = vrcp.f32 %v1314_v23 }
 0x81c   :  { %5400 = vrcp.f32 %v1313_v19 }
 0x825   :  { %v5399_v21 = vpop.eup %5398 }
 0x826   :  { %v5401_v28 = vpop.eup %5400  ;;  %v1324_v29 = vmul.f32 0.09090909, %v5399_v21 }
 0x827   :  { %v1323_v31 = vmul.f32 0.09090909, %v5401_v28 }
 0x828   :  { %v1203_v32 = vpop.xlane.xlu1 %1202  ;;  %v1326_v35 = vmul.f32 %v1324_v29, %v1306_v63 }
 0x829   :  { %v1200_v36 = vpop.xlane.xlu0 %1199  ;;  %v1325_v39 = vmul.f32 %v1323_v31, %v1305_v5 }
 0x82a   :  { %1331 = vrot.lane.b32.xlu1 %v1326_v35, %s5646_s3 }
 0x82b   :  { %1329 = vrot.lane.b32.xlu0 %v1325_v39, %s5646_s3 }
 0x82c   :  { %v5255_v49 = vpop.permute.xlu1 %5254 }
 0x82d   :  { %v5250_v40 = vpop.permute.xlu0 %5249  ;;  %v5257_v43 = vunpack.i.h.bf16 %v5255_v49  ;;  %v5256_v48 = vunpack.i.l.bf16 %v5255_v49 }
 0x82e   :  { %v5252_v51 = vunpack.i.h.bf16 %v5250_v40  ;;  %v5251_v52 = vunpack.i.l.bf16 %v5250_v40  ;;  %1563 = vrot.lane.b32.xlu1 %v5918_v45, %s6654_s19 }
 0x82f   :  { %1561 = vrot.lane.b32.xlu0 %v5908_v37, %s6654_s19  ;;  %v4990_v59 = vpack.c.bf16 %v5257_v43, %v5256_v48  ;;  %v1204_v37 = vadd.f32 1e-06, %v1200_v36 }
 0x830   :  { %v5260_v53 = vpop.permute.xlu1 %5259  ;;  %v4986_v54 = vpack.c.bf16 %v5252_v51, %v5251_v52 }
 0x831   :  { %v5262_v55 = vunpack.i.h.bf16 %v5260_v53  ;;  %v5261_v56 = vunpack.i.l.bf16 %v5260_v53  ;;  %5402 = vrcp.f32 %v1204_v37 }
 0x832   :  { %1430 = vrot.lane.b32.xlu1 %v5910_v38, %s6656_s27  ;;  %4987 = vmatprep.subr.bf16.mxu0 %v4986_v54  ;;  %v1205_v38 = vadd.f32 1e-06, %v1203_v32 }
 0x833   :  { %5264 = vrot.lane.b32.xlu0 %v5926_v47, %s6653_s28  ;;  %4989 = vmatpush3.bf16.msra.mxu0 %v4986_v54  ;;  %v5000_v60 = vpack.c.bf16 %v5262_v55, %v5261_v56 }
 0x834   :  { %4991 = vmatprep.subr.bf16.mxu0 %v4990_v59  ;;  %5404 = vrcp.f32 %v1205_v38 }
 0x836   :  { %1434 = vrot.lane.b32.xlu1 %v5945_v57, %s6656_s27 }
 0x837   :  { %1432 = vrot.lane.b32.xlu0 %v5916_v44, %s6656_s27  ;;  %4993 = vmatpush3.bf16.msra.mxu0 %v4990_v59 }
 0x838   :  { %5002 = vmatprep.subr.msk.bf16.mxu0 %vm5922_vm4, %v5000_v60 }
 0x83b   :  { %1436 = vrot.lane.b32.xlu0 %v5951_v58, %s6656_s27  ;;  %v5403_v45 = vpop.eup %5402 }
 0x83c   :  { %v1317_v62 = vmul.f32 0.90909094, %v5403_v45 }
 0x83e   :  { %v5405_v61 = vpop.eup %5404  ;;  %v1319_v57 = vmul.f32 %v1317_v62, %v1196_v14 }
 0x83f   :  { %v1318_v63 = vmul.f32 0.90909094, %v5405_v61 }
 0x841   :  { %v1320_v5 = vmul.f32 %v1318_v63, %v1197_v13 }
 0x89c   :  { %v1332_v0 = vpop.permute.xlu1 %1331 }
 0x89d   :  { %v1330_v6 = vpop.permute.xlu0 %1329  ;;  %v1336_v7 = vsel %vm473_vm7, %v1320_v5, %v1332_v0 }
 0x89e   :  { %v1335_v44 = vsel %vm473_vm7, %v1319_v57, %v1330_v6 }
 0x89f   :  { %4690 = vmatprep.mubr.msk.f32.mxu0 %vm253_vm2, %v1335_v44 }
 0x8a0   :  { %v1564_v8 = vpop.permute.xlu1 %1563  ;;  %4691 = vmatmul.mubr.msk.f32.vlgmr.msra.gmra.mrb[14].mxu0 %vm253_vm2, %v1336_v7 }
 0x8a1   :  { %5005 = vmatpush3.bf16.xpose.msk.msra.mxu0 %vm5922_vm4, %v5000_v60  ;;  %v1562_v58 = vpop.permute.xlu0 %1561 }
 0x8a2   :  { %4707 = vmatprep.mubr.msk.f32.mxu0 %vm357_vm3, %v1562_v58 }
 0x8a4   :  { %v1431_v9 = vpop.permute.xlu1 %1430 }
 0x8a5   :  { %v5265_v10 = vpop.permute.xlu0 %5264  ;;  %4697 = vmatprep.mubr.msk.f32.mxu1 %vm357_vm3, %v1431_v9 }
 0x8a6   :  { %v5267_v11 = vunpack.i.h.bf16 %v5265_v10  ;;  %v5266_v12 = vunpack.i.l.bf16 %v5265_v10 }
 0x8a8   :  { %v4994_v13 = vpack.c.bf16 %v5267_v11, %v5266_v12  ;;  %4708 = vmatmul.mubr.msk.f32.vlgmr.msra.gmra.mrb[16].mxu0 %vm357_vm3, %v1564_v8  ;;  %v1435_v16 = vpop.permute.xlu1 %1434 }
 0x8a9   :  { %v1433_v14 = vpop.permute.xlu0 %1432 }
 0x8aa   :  { %4996 = vmatprep.subr.msk.bf16.mxu1 %vm5922_vm4, %v4994_v13 }
 0x8ab   :  { %4999 = vmatpush3.bf16.xpose.msk.msra.mxu1 %vm5922_vm4, %v4994_v13 }
 0x8ad   :  { %v1437_v17 = vpop.permute.xlu0 %1436 }
 0x8b2   :  { %4698 = vmatmul.mubr.msk.f32.vlgmr.msra.gmra.mrb[14].mxu1 %vm357_vm3, %v1433_v14 }
 0x8b3   :  { %4700 = vmatprep.mubr.msk.f32.mxu1 %vm357_vm3, %v1435_v16 }
 0x8b6   :  { %4701 = vmatmul.mubr.msk.f32.gmra.mrb[16].mxu1 %vm357_vm3, %v1437_v17 }
 0x973   :  { %v6135_v22 = vpop.f32.mrb[14].mxu0 }
 0x974   :  { %v6137_v23 = vpop.f32.mrb[15].mxu0 }
 0x97b   :  { %v4709_v24 = vpop.f32.mrb[16].mxu0 }
 0x97c   :  { %v4309_v19 = vclamps-f32 %v4709_v24, 5.0  ;;  %v1643_v21 = vpop.f32.mrb[17].mxu0 }
 0x97d   :  { %v4308_v28 = vclamps-f32 %v1643_v21, 5.0 }
 0x97e   :  { %v1658_v29 = vmul.f32 1.442695, %v4309_v19 }
 0x97f   :  { %v1656_v31 = vmul.f32 1.442695, %v4308_v28 }
 0x980   :  { %5406 = vpow2.f32 %v1658_v29 }
 0x981   :  { %5408 = vpow2.f32 %v1656_v31 }
 0x985   :  { %v4699_v32 = vpop.f32.mrb[14].mxu1 }
 0x986   :  { %v1520_v35 = vpop.f32.mrb[15].mxu1  ;;  %v1540_v36 = vmul.f32 %v4699_v32, %v5958_v1 }
 0x987   :  { %v1539_v39 = vmul.f32 %v1520_v35, %v5963_v2 }
 0x989   :  { %v4702_v49 = vpop.f32.mrb[16].mxu1 }
 0x98a   :  { %v5407_v40 = vpop.eup %5406  ;;  %v1542_v43 = vadd.f32 %v4702_v49, %v1540_v36  ;;  %v1530_v48 = vpop.f32.mrb[17].mxu1 }
 0x98b   :  { %v5409_v51 = vpop.eup %5408  ;;  %v1541_v52 = vadd.f32 %v1539_v39, %v1530_v48  ;;  %v1661_v53 = vmul.f32 %v5407_v40, %v5968_v3  ;;  %v1817_v40 = vld [vmem:[%s6640_s7 + $0x8] sm:$0xff] }
 0x98c   :  { %v4303_v54 = vclamps-f32 %v1542_v43, 5.0  ;;  %v1660_v55 = vmul.f32 %v5409_v51, %v5971_v4  ;;  %v1818_v43 = vld [vmem:[%s6640_s7 + $0x10] sm:$0xff]  ;;  %v1819_v51 = vld [vmem:[%s6640_s7 + $0x18] sm:$0xff] }
 0x98d   :  { %v4302_v56 = vclamps-f32 %v1541_v52, 5.0  ;;  %v1665_v59 = vsel %vm473_vm7, %v1661_v53, 0.0  ;;  %v5018_v52 = vpack.c.bf16 %v1819_v51, %v1818_v43  ;;  %v6221_v51 = vld [vmem:[%s6642_s9] sm:$0xf] }
 0x98e   :  { %v1549_v60 = vmul.f32 1.442695, %v4303_v54  ;;  %1666 = vadd.xlane.f32.xlu0 %v1665_v59  ;;  %v1662_v37 = vsel %vm473_vm7, %v1660_v55, 0.0 }
 0x98f   :  { %v1547_v38 = vmul.f32 1.442695, %v4302_v56  ;;  %1663 = vadd.xlane.f32.xlu1 %v1662_v37 }
 0x990   :  { %5410 = vpow2.f32 %v1549_v60 }
 0x991   :  { %5412 = vpow2.f32 %v1547_v38 }
 0x99a   :  { %v5411_v45 = vpop.eup %5410 }
 0x99b   :  { %v5413_v61 = vpop.eup %5412  ;;  %v1552_v62 = vmul.f32 %v5411_v45, %v5958_v1 }
 0x99c   :  { %v1551_v63 = vmul.f32 %v5413_v61, %v5963_v2 }
 0x99d   :  { %v1556_v0 = vsel %vm473_vm7, %v1552_v62, 0.0 }
 0x99e   :  { %1557 = vadd.xlane.f32.xlu1 %v1556_v0  ;;  %v1553_v57 = vsel %vm473_vm7, %v1551_v63, 0.0 }
 0x99f   :  { %1554 = vadd.xlane.f32.xlu0 %v1553_v57 }
 0x9af   :  { %5274 = vrot.lane.b32.xlu1 %v5987_v50, %s6651_s10 }
 0x9b5   :  { %5269 = vrot.lane.b32.xlu0 %v5926_v47, %s6651_s10 }
 0xa1b   :  { %v1667_v5 = vpop.xlane.xlu0 %1666 }
 0xa1c   :  { %v1669_v6 = vadd.f32 1e-06, %v1667_v5  ;;  %v1664_v44 = vpop.xlane.xlu1 %1663 }
 0xa1d   :  { %v1668_v7 = vadd.f32 1e-06, %v1664_v44 }
 0xa1e   :  { %5414 = vrcp.f32 %v1669_v6 }
 0xa1f   :  { %5416 = vrcp.f32 %v1668_v7 }
 0xa28   :  { %v5415_v1 = vpop.eup %5414 }
 0xa29   :  { %v5417_v2 = vpop.eup %5416  ;;  %v1679_v8 = vmul.f32 0.09090909, %v5415_v1 }
 0xa2a   :  { %v1678_v58 = vmul.f32 0.09090909, %v5417_v2 }
 0xa2b   :  { %v1558_v9 = vpop.xlane.xlu1 %1557  ;;  %v1681_v10 = vmul.f32 %v1679_v8, %v1661_v53 }
 0xa2c   :  { %v1555_v11 = vpop.xlane.xlu0 %1554  ;;  %v1680_v12 = vmul.f32 %v1678_v58, %v1660_v55  ;;  %v1560_v28 = vadd.f32 1e-06, %v1558_v9 }
 0xa2d   :  { %1686 = vrot.lane.b32.xlu0 %v1681_v10, %s5646_s3  ;;  %v1559_v21 = vadd.f32 1e-06, %v1555_v11 }
 0xa2e   :  { %1684 = vrot.lane.b32.xlu1 %v1680_v12, %s5646_s3 }
 0xa2f   :  { %v5275_v50 = vpop.permute.xlu1 %5274  ;;  %5418 = vrcp.f32 %v1559_v21 }
 0xa30   :  { %v5270_v47 = vpop.permute.xlu0 %5269  ;;  %v5277_v13 = vunpack.i.h.bf16 %v5275_v50  ;;  %v5276_v14 = vunpack.i.l.bf16 %v5275_v50  ;;  %5420 = vrcp.f32 %v1560_v28  ;;  %v2046_v28 = vld [vmem:[%s6645_s12] sm:$0xff] }
 0xa31   :  { %1789 = vrot.lane.b32.xlu0 %v6081_v33, %s6654_s19  ;;  %v5272_v16 = vunpack.i.h.bf16 %v5270_v47  ;;  %v5271_v17 = vunpack.i.l.bf16 %v5270_v47 }
 0xa32   :  { %1787 = vrot.lane.b32.xlu1 %v6083_v34, %s6654_s19  ;;  %v5010_v19 = vpack.c.bf16 %v5277_v13, %v5276_v14  ;;  %v1952_v14 = vld [vmem:[#allocation6] sm:$0xff] }
 0xa33   :  { %v5006_v24 = vpack.c.bf16 %v5272_v16, %v5271_v17  ;;  %v1953_v16 = vld [vmem:[#allocation6 + $0x8] sm:$0xff] }
 0xa34   :  { %v5022_v17 = vpack.c.bf16 %v1953_v16, %v1952_v14 }
 0xa35   :  { %1797 = vrot.lane.b32.xlu0 %v6135_v22, %s5646_s3  ;;  %5007 = vmatprep.subr.bf16.mxu1 %v5006_v24 }
 0xa36   :  { %1795 = vrot.lane.b32.xlu1 %v6137_v23, %s5646_s3  ;;  %5009 = vmatpush3.bf16.msra.mxu1 %v5006_v24  ;;  %v1816_v23 = vld [vmem:[%s6640_s7] sm:$0xff]  ;;  %v1954_v24 = vld [vmem:[#allocation6 + $0x10] sm:$0xff] }
 0xa37   :  { %5011 = vmatprep.subr.bf16.mxu1 %v5010_v19  ;;  %v5014_v48 = vpack.c.bf16 %v1817_v40, %v1816_v23 }
 0xa39   :  { %v5419_v33 = vpop.eup %5418  ;;  %5015 = vmatprep.subr.bf16.mxu0 %v5014_v48 }
 0xa3a   :  { %5013 = vmatpush3.bf16.msra.mxu1 %v5010_v19  ;;  %v5421_v29 = vpop.eup %5420  ;;  %v1672_v31 = vmul.f32 0.90909094, %v5419_v33  ;;  %5017 = vmatpush3.bf16.msra.mxu0 %v5014_v48  ;;  %v1955_v19 = vld [vmem:[#allocation6 + $0x18] sm:$0xff]  ;;  %v2047_v33 = vld [vmem:[%s6645_s12 + $0x8] sm:$0xff] }
 0xa3b   :  { %v1673_v34 = vmul.f32 0.90909094, %v5421_v29  ;;  %5019 = vmatprep.subr.bf16.mxu0 %v5018_v52  ;;  %5023 = vmatprep.subr.bf16.mxu1 %v5022_v17  ;;  %v5026_v21 = vpack.c.bf16 %v1955_v19, %v1954_v24  ;;  %v2048_v29 = vld [vmem:[%s6645_s12 + $0x10] sm:$0xff] }
 0xa3c   :  { %v1674_v32 = vmul.f32 %v1672_v31, %v1551_v63  ;;  %v5030_v31 = vpack.c.bf16 %v2047_v33, %v2046_v28  ;;  %v4324_v28 = vld [vmem:[%s6637_s4 + $0x58] sm:$0xff] }
 0xa3d   :  { %v1675_v36 = vmul.f32 %v1673_v34, %v1552_v62  ;;  %v2049_v34 = vld [vmem:[%s6645_s12 + $0x18] sm:$0xff] }
 0xa3e   :  { %5021 = vmatpush3.bf16.msra.mxu0 %v5018_v52  ;;  %v1943_v52 = vrot.slane %v6221_v51, %v5897_v27 }
 0xa3f   :  { %5031 = vmatprep.subr.bf16.mxu0 %v5030_v31 }
 0xa9f   :  { %v1687_v35 = vpop.permute.xlu0 %1686 }
 0xaa0   :  { %v1685_v39 = vpop.permute.xlu1 %1684  ;;  %v1691_v49 = vsel %vm473_vm7, %v1675_v36, %v1687_v35  ;;  %v2050_v35 = vld [vmem:[%s6645_s12 + $0x20] sm:$0xff]  ;;  %v2051_v36 = vld [vmem:[%s6645_s12 + $0x28] sm:$0xff] }
 0xaa1   :  { %v1690_v22 = vsel %vm473_vm7, %v1674_v32, %v1685_v39  ;;  %v5034_v32 = vpack.c.bf16 %v2049_v34, %v2048_v29  ;;  %v5038_v39 = vpack.c.bf16 %v2051_v36, %v2050_v35  ;;  %v4321_v29 = vld [vmem:[%s6637_s4 + $0x40] sm:$0xff]  ;;  %v4328_v35 = vld [vmem:[%s6637_s4 + $0x78] sm:$0xff] }
 0xaa2   :  { %4718 = vmatprep.mubr.msk.f32.mxu1 %vm253_vm2, %v1690_v22  ;;  %v4325_v36 = vld [vmem:[%s6637_s4 + $0x60] sm:$0xff] }
 0xaa3   :  { %4719 = vmatmul.mubr.msk.f32.vlgmr.msra.gmra.mrb[18].mxu1 %vm253_vm2, %v1691_v49  ;;  %v1790_v55 = vpop.permute.xlu0 %1789 }
 0xaa4   :  { %v1788_v56 = vpop.permute.xlu1 %1787  ;;  %v1810_v45 = vsel %vm357_vm3, %v6027_v41, %v1790_v55  ;;  %5025 = vmatpush3.bf16.msra.mxu1 %v5022_v17 }
 0xaa5   :  { %v1809_v37 = vsel %vm357_vm3, %v6029_v42, %v1788_v56  ;;  %v4314_v42 = vld [vmem:[%s6641_s8] ss:$0 sm:$0xff]  ;;  %5027 = vmatprep.subr.bf16.mxu1 %v5026_v21 }
 0xaa7   :  { %v1798_v59 = vpop.permute.xlu0 %1797 }
 0xaa8   :  { %v1796_v60 = vpop.permute.xlu1 %1795  ;;  %v1812_v63 = vsel %vm473_vm7, %v1810_v45, %v1798_v59  ;;  %5029 = vmatpush3.bf16.msra.mxu1 %v5026_v21  ;;  %v1949_v59 = vrot.slane %v6221_v51, %v5904_v30  ;;  %v4322_v21 = vld [vmem:[%s6637_s4 + $0x48] sm:$0xff] }
 0xaa9   :  { %v1811_v61 = vsel %vm473_vm7, %v1809_v37, %v1796_v60  ;;  %v5046_v33 = vpack.c.bf16 %v4324_v28, %v4322_v21 }
 0xaab   :  { %5047 = vmatprep.subr.bf16.mxu1 %v5046_v33 }
 0xb76   :  { %v4720_v53 = vpop.f32.mrb[18].mxu1 }
 0xb77   :  { %1805 = vrot.lane.b32.xlu0 %v4720_v53, %s5659_s23  ;;  %v1776_v54 = vpop.f32.mrb[19].mxu1 }
 0xb78   :  { %1803 = vrot.lane.b32.xlu1 %v1776_v54, %s5659_s23 }
 0xbe9   :  { %v1806_v38 = vpop.permute.xlu0 %1805 }
 0xbea   :  { %v1804_v62 = vpop.permute.xlu1 %1803  ;;  %v1815_v57 = vsel %vm1813_vm8, %v1812_v63, %v1806_v38 }
 0xbeb   :  { %v1814_v0 = vsel %vm1813_vm8, %v1811_v61, %v1804_v62  ;;  %v2052_v61 = vld [vmem:[%s6645_s12 + $0x30] sm:$0xff]  ;;  %v2053_v62 = vld [vmem:[%s6645_s12 + $0x38] sm:$0xff] }
 0xbec   :  { %4729 = vmatprep.mubr.msk.f32.mxu0 %vm253_vm2, %v1814_v0  ;;  %v5042_v63 = vpack.c.bf16 %v2053_v62, %v2052_v61  ;;  %v4315_v0 = vld [vmem:[#allocation7] ss:$0 sm:$0xff] }
 0xbed   :  { %4730 = vmatmul.mubr.msk.f32.vlgmr.msra.gmra.mrb[18].mxu0 %vm253_vm2, %v1815_v57 }
 0xbee   :  { %5033 = vmatpush3.bf16.msra.mxu0 %v5030_v31  ;;  %v4323_v31 = vld [vmem:[%s6637_s4 + $0x50] sm:$0xff] }
 0xbef   :  { %5035 = vmatprep.subr.bf16.mxu0 %v5034_v32  ;;  %v5048_v34 = vpack.c.bf16 %v4323_v31, %v4321_v29 }
 0xbf2   :  { %5037 = vmatpush3.bf16.msra.mxu0 %v5034_v32  ;;  %v4326_v32 = vld [vmem:[%s6637_s4 + $0x68] sm:$0xff] }
 0xbf3   :  { %5039 = vmatprep.subr.bf16.mxu0 %v5038_v39 }
 0xbf6   :  { %5041 = vmatpush3.bf16.msra.mxu0 %v5038_v39  ;;  %v5050_v39 = vpack.c.bf16 %v4328_v35, %v4326_v32 }
 0xbf7   :  { %5043 = vmatprep.subr.bf16.mxu0 %v5042_v63 }
 0xbfa   :  { %5045 = vmatpush3.bf16.msra.mxu0 %v5042_v63 }
 0xcc0   :  { %v4731_v5 = vpop.f32.mrb[18].mxu0 }
 0xcc1   :  { %v1902_v41 = vadd.f32 %v4731_v5, %v5892_v26  ;;  %v1892_v6 = vpop.f32.mrb[19].mxu0 }
 0xcc2   :  { %v1901_v44 = vadd.f32 %v1892_v6, %v5887_v25 }
 0xcc3   :  { %v1911_v7 = vadd.f32 %v4314_v42, %v1902_v41 }
 0xcc4   :  { %v1910_v1 = vadd.f32 %v4314_v42, %v1901_v44 }
 0xcc5   :  { %v1916_v2 = vsel %vm253_vm2, %v1911_v7, 0.0 }
 0xcc6   :  { %1917 = vadd.xlane.f32.xlu0 %v1916_v2  ;;  %v1913_v8 = vsel %vm253_vm2, %v1910_v1, 0.0 }
 0xcc7   :  { %1914 = vadd.xlane.f32.xlu1 %v1913_v8 }
 0xd53   :  { %v1918_v58 = vpop.xlane.xlu0 %1917 }
 0xd54   :  { %v1921_v9 = vmul.f32 0.03125, %v1918_v58  ;;  %v1915_v10 = vpop.xlane.xlu1 %1914 }
 0xd55   :  { %v1920_v11 = vmul.f32 0.03125, %v1915_v10 }
 0xd56   :  { %v1923_v12 = vsub.f32 %v1911_v7, %v1921_v9  ;;  %v4318_v7 = vld [vmem:[#allocation9] ss:$0 sm:$0xff] }
 0xd57   :  { %v1922_v50 = vsub.f32 %v1910_v1, %v1920_v11 }
 0xd58   :  { %v1925_v47 = vmul.f32 %v1923_v12, %v1923_v12 }
 0xd59   :  { %v1924_v13 = vmul.f32 %v1922_v50, %v1922_v50 }
 0xd5a   :  { %v1929_v26 = vsel %vm253_vm2, %v1925_v47, 0.0 }
 0xd5b   :  { %1930 = vadd.xlane.f32.xlu1 %v1929_v26  ;;  %v1926_v25 = vsel %vm253_vm2, %v1924_v13, 0.0 }
 0xd5c   :  { %1927 = vadd.xlane.f32.xlu0 %v1926_v25 }
 0xde8   :  { %v1931_v22 = vpop.xlane.xlu1 %1930 }
 0xde9   :  { %v1933_v49 = vmul.f32 0.03125, %v1931_v22  ;;  %v1928_v23 = vpop.xlane.xlu0 %1927  ;;  %v4327_v22 = vld [vmem:[%s6637_s4 + $0x70] sm:$0xff] }
 0xdea   :  { %v1932_v40 = vmul.f32 0.03125, %v1928_v23  ;;  %v4332_v23 = vld [vmem:[%s6639_s6 + $0x4] sm:$0x7] }
 0xdeb   :  { %v1935_v43 = vadd.f32 1e-05, %v1933_v49  ;;  %v5052_v49 = vpack.c.bf16 %v4327_v22, %v4325_v36 }
 0xdec   :  { %v1934_v48 = vadd.f32 1e-05, %v1932_v40  ;;  %v2290_v40 = vmul.f32 0.35355338, %v4332_v23 }
 0xded   :  { %5422 = vrsqrt.f32 %v1935_v43 }
 0xdee   :  { %5424 = vrsqrt.f32 %v1934_v48  ;;  %v2435_v43 = vrot.slane %v2290_v40, %v5883_v20  ;;  %v2300_v28 = vrot.slane %v2290_v40, %v5904_v30 }
 0xdf7   :  { %v5423_v53 = vpop.eup %5422 }
 0xdf8   :  { %v5425_v54 = vpop.eup %5424  ;;  %v1939_v55 = vmul.f32 %v5423_v53, %v1923_v12 }
 0xdf9   :  { %v1938_v56 = vmul.f32 %v5425_v54, %v1922_v50 }
 0xdfa   :  { %v1945_v60 = vmul.f32 %v1943_v52, %v1939_v55 }
 0xdfb   :  { %v1944_v37 = vmul.f32 %v1943_v52, %v1938_v56 }
 0xdfc   :  { %v1951_v45 = vadd.f32 %v1949_v59, %v1945_v60 }
 0xdfd   :  { %v1950_v38 = vadd.f32 %v1949_v59, %v1944_v37  ;;  %v2179_v59 = vsub.s32 3, %v5880_v18  ;;  %v2174_v37 = vrot.slane %v6221_v51, %v5883_v20 }
 0xdff   :  { %4740 = vmatprep.mubr.msk.f32.mxu1 %vm253_vm2, %v1950_v38  ;;  %v2180_v61 = vrot.slane %v6221_v51, %v2179_v59 }
 0xe00   :  { %4741 = vmatmul.mubr.msk.f32.vlgmr.msra.gmra.mrb[20].mxu1 %vm253_vm2, %v1951_v45 }
 0xe01   :  { %2275 = vmatprep.mubr.f32.mxu1 %v5654_v15  ;;  %5049 = vmatpush1.bf16.msra.mxu1 %v5048_v34 }
 0xe02   :  { %5051 = vmatprep.subr.bf16.mxu1 %v5050_v39 }
 0xe05   :  { %5053 = vmatpush1.bf16.msra.mxu1 %v5052_v49 }
 0xed3   :  { %v4742_v57 = vpop.f32.mrb[20].mxu1 }
 0xed4   :  { %v2041_v5 = vadd.f32 %v4742_v57, %v4315_v0  ;;  %v2035_v42 = vpop.f32.mrb[21].mxu1 }
 0xed5   :  { %v2036_v41 = vadd.f32 %v4315_v0, %v2035_v42  ;;  %v4329_v42 = vld [vmem:[%s6638_s5 + $0x2] sm:$0x3] }
 0xed6   :  { %v2045_v44 = vmax.f32 %v2041_v5, 0.0  ;;  %v2198_v51 = vrot.slane %v4329_v42, %v5897_v27 }
 0xed7   :  { %v2044_v6 = vmax.f32 %v2036_v41, 0.0  ;;  %v2294_v41 = vrot.slane %v2290_v40, %v5897_v27  ;;  %v6336_v40 = vld [vmem:[%s6634_s1 + $0x8] sm:$0xff] }
 0xed9   :  { %4759 = vmatprep.mubr.msk.f32.mxu0 %vm2061_vm9, %v2044_v6 }
 0xeda   :  { %4760 = vmatmul.mubr.msk.f32.vlgmr.msra.gmra.mrb[20].mxu0 %vm2061_vm9, %v2045_v44 }
 0xfad   :  { %v4761_v1 = vpop.f32.mrb[20].mxu0 }
 0xfae   :  { %v2140_v2 = vadd.f32 %v4761_v1, %v4318_v7  ;;  %v2134_v8 = vpop.f32.mrb[21].mxu0 }
 0xfaf   :  { %v2135_v58 = vadd.f32 %v4318_v7, %v2134_v8 }
 0xfb0   :  { %v2144_v9 = vadd.f32 %v2140_v2, %v1951_v45  ;;  %v2202_v2 = vrot.slane %v4329_v42, %v5904_v30 }
 0xfb1   :  { %v2143_v10 = vadd.f32 %v2135_v58, %v1950_v38 }
 0xfb2   :  { %v2148_v11 = vsel %vm253_vm2, %v2144_v9, 0.0 }
 0xfb3   :  { %2149 = vadd.xlane.f32.xlu1 %v2148_v11  ;;  %v2145_v12 = vsel %vm253_vm2, %v2143_v10, 0.0 }
 0xfb4   :  { %2146 = vadd.xlane.f32.xlu0 %v2145_v12 }
0x1040   :  { %v2150_v50 = vpop.xlane.xlu1 %2149 }
0x1041   :  { %v2152_v47 = vmul.f32 0.03125, %v2150_v50  ;;  %v2147_v13 = vpop.xlane.xlu0 %2146 }
0x1042   :  { %v2151_v26 = vmul.f32 0.03125, %v2147_v13 }
0x1043   :  { %v2154_v25 = vsub.f32 %v2144_v9, %v2152_v47 }
0x1044   :  { %v2153_v14 = vsub.f32 %v2143_v10, %v2151_v26 }
0x1045   :  { %v2156_v16 = vmul.f32 %v2154_v25, %v2154_v25 }
0x1046   :  { %v2155_v17 = vmul.f32 %v2153_v14, %v2153_v14 }
0x1047   :  { %v2160_v24 = vsel %vm253_vm2, %v2156_v16, 0.0 }
0x1048   :  { %2161 = vadd.xlane.f32.xlu1 %v2160_v24  ;;  %v2157_v19 = vsel %vm253_vm2, %v2155_v17, 0.0 }
0x1049   :  { %2158 = vadd.xlane.f32.xlu0 %v2157_v19 }
0x105f   :  { %2437 = vrot.lane.b32.xlu0 %v2435_v43, %s5655_s21 }
0x10d5   :  { %v2162_v48 = vpop.xlane.xlu1 %2161 }
0x10d6   :  { %v2164_v52 = vmul.f32 0.03125, %v2162_v48  ;;  %v2159_v53 = vpop.xlane.xlu0 %2158 }
0x10d7   :  { %v2163_v54 = vmul.f32 0.03125, %v2159_v53 }
0x10d8   :  { %v2166_v55 = vadd.f32 1e-05, %v2164_v52  ;;  %v6342_v52 = vld [vmem:[%s6634_s1] sm:$0xff]  ;;  %s6662_s1 = smov 104  }
0x10d9   :  { %v2165_v56 = vadd.f32 1e-05, %v2163_v54 }
0x10da   :  { %5426 = vrsqrt.f32 %v2166_v55  ;;  %v2438_v44 = vpop.permute.xlu0 %2437 }
0x10db   :  { %5428 = vrsqrt.f32 %v2165_v56 }
0x10e4   :  { %v5427_v60 = vpop.eup %5426 }
0x10e5   :  { %v5429_v38 = vpop.eup %5428  ;;  %v2170_v62 = vmul.f32 %v5427_v60, %v2154_v25 }
0x10e6   :  { %v2169_v45 = vmul.f32 %v5429_v38, %v2153_v14 }
0x10e7   :  { %v2176_v57 = vmul.f32 %v2174_v37, %v2170_v62 }
0x10e8   :  { %v2175_v63 = vmul.f32 %v2174_v37, %v2169_v45 }
0x10e9   :  { %v6282_v5 = vadd.f32 %v2180_v61, %v2176_v57 }
0x10ea   :  { %v6277_v0 = vadd.f32 %v2180_v61, %v2175_v63 }
0x10ec   :  { %4330 = vmatmul.mubr.msk.f32.vlgmr.msra.gmra.mrb[22].mxu1 %vm253_vm2, %v6277_v0 }
0x10ed   :  { %2281 = vmatprep.mubr.f32.mxu1 %v5654_v15 }
0x10f0   :  { %4331 = vmatmul.mubr.msk.f32.gmra.mrb[24].mxu1 %vm253_vm2, %v6282_v5 }
0x11bf   :  { %v2277_v6 = vpop.f32.mrb[22].mxu1 }
0x11c0   :  { %v2278_v7 = vadd.f32 %v2277_v6, %v2198_v51  ;;  %v2279_v1 = vpop.f32.mrb[23].mxu1 }
0x11c1   :  { %v2280_v11 = vadd.f32 %v2279_v1, %v2202_v2 }
0x11c2   :  { %v6292_v15 = vmul.f32 %v2438_v44, %v2278_v7  ;;  %v6294_v8 = vmul.f32 %v2294_v41, %v2278_v7  ;;  %v6323_v33 = vmul.f32 %v2300_v28, %v2278_v7 }
0x11c3   :  { %v2283_v58 = vpop.f32.mrb[24].mxu1 }
0x11c4   :  { %v2284_v9 = vadd.f32 %v2283_v58, %v2198_v51  ;;  %v2285_v10 = vpop.f32.mrb[25].mxu1  ;;  %4766 = vmatprep.mubr.msk.f32.mxu1 %vm357_vm3, %v6294_v8  ;;  %2444 = vrot.lane.b32.xlu1 %v6292_v15, %s5656_s2 }
0x11c5   :  { %v2286_v12 = vadd.f32 %v2285_v10, %v2202_v2 }
0x11c6   :  { %v6300_v50 = vmul.f32 %v2294_v41, %v2284_v9  ;;  %v6302_v47 = vpack.i.bf16 %v2284_v9, %v2278_v7  ;;  %v6304_v13 = vmul.f32 %v2438_v44, %v2284_v9  ;;  %v6329_v29 = vmul.f32 %v2300_v28, %v2284_v9 }
0x11c7   :  { %v5060_v26 = vpack.c.bf16 %v2286_v12, %v2280_v11  ;;  %v6306_v25 = vpack.i.bf16 %v2286_v12, %v2280_v11 }
0x11c8   :  { %5279 = vrot.lane.b32.xlu0 %v6302_v47, %s5655_s21  ;;  %2446 = vrot.lane.b32.xlu1 %v6304_v13, %s5656_s2 }
0x11c9   :  { %5062 = vmatprep.subr.msk.bf16.mxu0 %vm5922_vm4, %v5060_v26 }
0x11ca   :  { %5065 = vmatpush3.bf16.xpose.msk.msra.mxu0 %vm5922_vm4, %v5060_v26 }
0x1236   :  { %v2445_v14 = vpop.permute.xlu1 %2444 }
0x1237   :  { %4776 = vmatprep.mubr.msk.f32.mxu0 %vm357_vm3, %v2445_v14 }
0x123a   :  { %v2447_v16 = vpop.permute.xlu1 %2446  ;;  %v5280_v17 = vpop.permute.xlu0 %5279 }
0x123b   :  { %v5282_v24 = vunpack.i.h.bf16 %v5280_v17  ;;  %v5281_v19 = vunpack.i.l.bf16 %v5280_v17  ;;  %4777 = vmatmul.mubr.msk.f32.vlgmr.msra.gmra.mrb[22].mxu0 %vm357_vm3, %v2447_v16 }
0x123d   :  { %v5054_v21 = vpack.c.bf16 %v5282_v24, %v5281_v19 }
0x123f   :  { %5056 = vmatprep.subr.msk.bf16.mxu1 %vm5922_vm4, %v5054_v21 }
0x1240   :  { %5059 = vmatpush3.bf16.xpose.msk.msra.mxu1 %vm5922_vm4, %v5054_v21 }
0x1247   :  { %4767 = vmatmul.mubr.msk.f32.vlgmr.msra.gmra.mrb[26].mxu1 %vm357_vm3, %v6300_v50 }
0x1248   :  { %4769 = vmatprep.mubr.msk.f32.mxu1 %vm357_vm3, %v6323_v33 }
0x124b   :  { %4770 = vmatmul.mubr.msk.f32.gmra.mrb[28].mxu1 %vm357_vm3, %v6329_v29 }
0x130e   :  { %v4778_v31 = vpop.f32.mrb[22].mxu0 }
0x130f   :  { %v4346_v34 = vclamps-f32 %v4778_v31, 5.0  ;;  %v2524_v32 = vpop.f32.mrb[23].mxu0 }
0x1310   :  { %v4345_v35 = vclamps-f32 %v2524_v32, 5.0 }
0x1311   :  { %v2539_v36 = vmul.f32 1.442695, %v4346_v34 }
0x1312   :  { %v2537_v39 = vmul.f32 1.442695, %v4345_v35 }
0x1313   :  { %5430 = vpow2.f32 %v2539_v36 }
0x1314   :  { %5432 = vpow2.f32 %v2537_v39 }
0x131a   :  { %v4768_v22 = vpop.f32.mrb[26].mxu1 }
0x131b   :  { %v2391_v49 = vpop.f32.mrb[27].mxu1  ;;  %v2411_v43 = vmul.f32 %v6336_v40, %v4768_v22 }
0x131c   :  { %v2410_v53 = vmul.f32 %v6342_v52, %v2391_v49 }
0x131d   :  { %v5431_v23 = vpop.eup %5430 }
0x131e   :  { %v5433_v48 = vpop.eup %5432  ;;  %v4771_v54 = vpop.f32.mrb[28].mxu1  ;;  %v2542_v55 = vmul.f32 %v5431_v23, %v5968_v3 }
0x131f   :  { %v2413_v56 = vadd.f32 %v4771_v54, %v2411_v43  ;;  %v2401_v60 = vpop.f32.mrb[29].mxu1  ;;  %v2541_v37 = vmul.f32 %v5433_v48, %v5971_v4 }
0x1320   :  { %v2412_v38 = vadd.f32 %v2410_v53, %v2401_v60  ;;  %v2546_v45 = vsel %vm473_vm7, %v2542_v55, 0.0 }
0x1321   :  { %2547 = vadd.xlane.f32.xlu0 %v2546_v45  ;;  %v2543_v61 = vsel %vm473_vm7, %v2541_v37, 0.0  ;;  %v4340_v62 = vclamps-f32 %v2413_v56, 5.0 }
0x1322   :  { %2544 = vadd.xlane.f32.xlu1 %v2543_v61  ;;  %v4339_v57 = vclamps-f32 %v2412_v38, 5.0 }
0x1323   :  { %v2420_v63 = vmul.f32 1.442695, %v4340_v62 }
0x1324   :  { %v2418_v42 = vmul.f32 1.442695, %v4339_v57 }
0x1325   :  { %5434 = vpow2.f32 %v2420_v63 }
0x1326   :  { %5436 = vpow2.f32 %v2418_v42 }
0x132f   :  { %v5435_v51 = vpop.eup %5434 }
0x1330   :  { %v2423_v41 = vmul.f32 %v6336_v40, %v5435_v51  ;;  %v5437_v6 = vpop.eup %5436 }
0x1331   :  { %v2422_v7 = vmul.f32 %v6342_v52, %v5437_v6 }
0x1332   :  { %v2427_v44 = vsel %vm473_vm7, %v2423_v41, 0.0 }
0x1333   :  { %5289 = vrot.lane.b32.xlu1 %v6302_v47, %s5657_s18  ;;  %v2424_v1 = vsel %vm473_vm7, %v2422_v7, 0.0 }
0x1337   :  { %5284 = vrot.lane.b32.xlu0 %v6306_v25, %s5656_s2  ;;  %s6663_s2 = smov 8  }
0x1357   :  { %2428 = vadd.xlane.f32.xlu1 %v2427_v44 }
0x135b   :  { %2425 = vadd.xlane.f32.xlu1 %v2424_v1 }
0x13ae   :  { %v2548_v2 = vpop.xlane.xlu0 %2547 }
0x13af   :  { %v2550_v58 = vadd.f32 1e-06, %v2548_v2  ;;  %v2545_v9 = vpop.xlane.xlu1 %2544 }
0x13b0   :  { %v2549_v10 = vadd.f32 1e-06, %v2545_v9 }
0x13b1   :  { %5438 = vrcp.f32 %v2550_v58 }
0x13b2   :  { %5440 = vrcp.f32 %v2549_v10  ;;  %v6357_v11 = vpop.permute.xlu0 %5284 }
0x13b3   :  { %v5290_v12 = vpop.permute.xlu1 %5289  ;;  %5294 = vrot.lane.b32.xlu0 %v6357_v11, %s5657_s18  ;;  %s6664_s18 = smov 72  }
0x13b4   :  { %v5292_v26 = vunpack.i.h.bf16 %v5290_v12  ;;  %v5291_v14 = vunpack.i.l.bf16 %v5290_v12 }
0x13b6   :  { %v5066_v16 = vpack.c.bf16 %v5292_v26, %v5291_v14 }
0x13b7   :  { %5299 = vrot.lane.b32.xlu0 %v6306_v25, %s5658_s20 }
0x13b8   :  { %5067 = vmatprep.subr.bf16.mxu1 %v5066_v16 }
0x13b9   :  { %5069 = vmatpush3.bf16.msra.mxu1 %v5066_v16 }
0x13bb   :  { %v5439_v17 = vpop.eup %5438 }
0x13bc   :  { %v5441_v24 = vpop.eup %5440  ;;  %v2560_v19 = vmul.f32 0.09090909, %v5439_v17 }
0x13bd   :  { %v2559_v21 = vmul.f32 0.09090909, %v5441_v24 }
0x13be   :  { %v2562_v28 = vmul.f32 %v2560_v19, %v2542_v55 }
0x13bf   :  { %v2561_v31 = vmul.f32 %v2559_v21, %v2541_v37 }
0x13c0   :  { %2567 = vrot.lane.b32.xlu0 %v2562_v28, %s5646_s3 }
0x13c1   :  { %2565 = vrot.lane.b32.xlu1 %v2561_v31, %s5646_s3 }
0x13c4   :  { %2803 = vrot.lane.b32.xlu0 %v6304_v13, %s5659_s23 }
0x13c5   :  { %2801 = vrot.lane.b32.xlu1 %v6292_v15, %s5659_s23 }
0x13c8   :  { %2670 = vrot.lane.b32.xlu0 %v6294_v8, %s5658_s20 }
0x13c9   :  { %5304 = vrot.lane.b32.xlu1 %v6302_v47, %s5660_s25 }
0x13cc   :  { %2674 = vrot.lane.b32.xlu0 %v6323_v33, %s5658_s20 }
0x13cd   :  { %2672 = vrot.lane.b32.xlu1 %v6300_v50, %s5658_s20 }
0x13d1   :  { %2676 = vrot.lane.b32.xlu1 %v6329_v29, %s5658_s20  ;;  %s6665_s20 = smov 40  }
0x13e4   :  { %v2429_v34 = vpop.xlane.xlu1 %2428 }
0x13e5   :  { %v2431_v36 = vadd.f32 1e-06, %v2429_v34 }
0x13e8   :  { %v2426_v32 = vpop.xlane.xlu1 %2425 }
0x13e9   :  { %v2430_v35 = vadd.f32 1e-06, %v2426_v32 }
0x13eb   :  { %5442 = vrcp.f32 %v2430_v35 }
0x13ec   :  { %5444 = vrcp.f32 %v2431_v36 }
0x13f5   :  { %v5443_v23 = vpop.eup %5442 }
0x13f6   :  { %v5445_v43 = vpop.eup %5444  ;;  %v2553_v54 = vmul.f32 0.90909094, %v5443_v23 }
0x13f7   :  { %v2554_v60 = vmul.f32 0.90909094, %v5445_v43 }
0x13f8   :  { %v2555_v38 = vmul.f32 %v2553_v54, %v2422_v7 }
0x13f9   :  { %v2556_v61 = vmul.f32 %v2554_v60, %v2423_v41 }
0x1425   :  { %v5295_v39 = vpop.permute.xlu0 %5294 }
0x1426   :  { %v5297_v22 = vunpack.i.h.bf16 %v5295_v39  ;;  %v5296_v49 = vunpack.i.l.bf16 %v5295_v39 }
0x1428   :  { %v5070_v48 = vpack.c.bf16 %v5297_v22, %v5296_v49 }
0x1429   :  { %v5300_v53 = vpop.permute.xlu0 %5299 }
0x142a   :  { %v5302_v55 = vunpack.i.h.bf16 %v5300_v53  ;;  %v5301_v56 = vunpack.i.l.bf16 %v5300_v53  ;;  %5071 = vmatprep.subr.bf16.mxu1 %v5070_v48 }
0x142b   :  { %5073 = vmatpush3.bf16.msra.mxu1 %v5070_v48 }
0x142c   :  { %v5080_v37 = vpack.c.bf16 %v5302_v55, %v5301_v56 }
0x142e   :  { %5082 = vmatprep.subr.msk.bf16.mxu1 %vm5922_vm4, %v5080_v37 }
0x1432   :  { %v2568_v45 = vpop.permute.xlu0 %2567 }
0x1433   :  { %v2566_v62 = vpop.permute.xlu1 %2565  ;;  %v2572_v57 = vsel %vm473_vm7, %v2556_v61, %v2568_v45 }
0x1434   :  { %v2571_v63 = vsel %vm473_vm7, %v2555_v38, %v2566_v62 }
0x1435   :  { %4787 = vmatprep.mubr.msk.f32.mxu1 %vm253_vm2, %v2571_v63 }
0x1436   :  { %v2804_v42 = vpop.permute.xlu0 %2803  ;;  %4788 = vmatmul.mubr.msk.f32.vlgmr.msra.gmra.mrb[30].mxu1 %vm253_vm2, %v2572_v57 }
0x1437   :  { %v2802_v51 = vpop.permute.xlu1 %2801  ;;  %5085 = vmatpush3.bf16.xpose.msk.msra.mxu1 %vm5922_vm4, %v5080_v37 }
0x1438   :  { %4804 = vmatprep.mubr.msk.f32.mxu1 %vm357_vm3, %v2802_v51 }
0x143a   :  { %v2671_v6 = vpop.permute.xlu0 %2670 }
0x143b   :  { %4794 = vmatprep.mubr.msk.f32.mxu0 %vm357_vm3, %v2671_v6  ;;  %v5305_v41 = vpop.permute.xlu1 %5304 }
0x143c   :  { %v5307_v44 = vunpack.i.h.bf16 %v5305_v41  ;;  %v5306_v7 = vunpack.i.l.bf16 %v5305_v41 }
0x143e   :  { %v5074_v1 = vpack.c.bf16 %v5307_v44, %v5306_v7  ;;  %4805 = vmatmul.mubr.msk.f32.vlgmr.msra.gmra.mrb[32].mxu1 %vm357_vm3, %v2804_v42  ;;  %v2675_v58 = vpop.permute.xlu0 %2674 }
0x143f   :  { %v2673_v2 = vpop.permute.xlu1 %2672 }
0x1440   :  { %5076 = vmatprep.subr.msk.bf16.mxu0 %vm5922_vm4, %v5074_v1 }
0x1441   :  { %5079 = vmatpush3.bf16.xpose.msk.msra.mxu0 %vm5922_vm4, %v5074_v1 }
0x1443   :  { %v2677_v9 = vpop.permute.xlu1 %2676 }
0x1448   :  { %4795 = vmatmul.mubr.msk.f32.vlgmr.msra.gmra.mrb[24].mxu0 %vm357_vm3, %v2673_v2 }
0x1449   :  { %4797 = vmatprep.mubr.msk.f32.mxu0 %vm357_vm3, %v2675_v58 }
0x144c   :  { %4798 = vmatmul.mubr.msk.f32.gmra.mrb[26].mxu0 %vm357_vm3, %v2677_v9 }
0x1509   :  { %v6397_v10 = vpop.f32.mrb[30].mxu1 }
0x150a   :  { %v6399_v12 = vpop.f32.mrb[31].mxu1 }
0x1511   :  { %v4806_v26 = vpop.f32.mrb[32].mxu1 }
0x1512   :  { %v4362_v14 = vclamps-f32 %v4806_v26, 5.0  ;;  %v2883_v16 = vpop.f32.mrb[33].mxu1 }
0x1513   :  { %v4361_v17 = vclamps-f32 %v2883_v16, 5.0 }
0x1514   :  { %v2898_v24 = vmul.f32 1.442695, %v4362_v14 }
0x1515   :  { %v2896_v19 = vmul.f32 1.442695, %v4361_v17 }
0x1516   :  { %5446 = vpow2.f32 %v2898_v24 }
0x1517   :  { %5448 = vpow2.f32 %v2896_v19 }
0x151b   :  { %v4796_v21 = vpop.f32.mrb[24].mxu0 }
0x151c   :  { %v2760_v28 = vpop.f32.mrb[25].mxu0  ;;  %v2780_v31 = vmul.f32 %v6336_v40, %v4796_v21 }
0x151d   :  { %v2779_v34 = vmul.f32 %v6342_v52, %v2760_v28 }
0x151f   :  { %v4799_v32 = vpop.f32.mrb[26].mxu0 }
0x1520   :  { %v2782_v35 = vadd.f32 %v4799_v32, %v2780_v31  ;;  %v2770_v36 = vpop.f32.mrb[27].mxu0  ;;  %v5447_v39 = vpop.eup %5446 }
0x1521   :  { %v2781_v22 = vadd.f32 %v2779_v34, %v2770_v36  ;;  %v5449_v49 = vpop.eup %5448  ;;  %v2901_v43 = vmul.f32 %v5447_v39, %v5968_v3 }
0x1522   :  { %v4356_v23 = vclamps-f32 %v2782_v35, 5.0  ;;  %v2900_v53 = vmul.f32 %v5449_v49, %v5971_v4 }
0x1523   :  { %v4355_v48 = vclamps-f32 %v2781_v22, 5.0  ;;  %v2905_v55 = vsel %vm473_vm7, %v2901_v43, 0.0 }
0x1524   :  { %v2789_v54 = vmul.f32 1.442695, %v4356_v23  ;;  %2906 = vadd.xlane.f32.xlu1 %v2905_v55  ;;  %v2902_v60 = vsel %vm473_vm7, %v2900_v53, 0.0 }
0x1525   :  { %v2787_v56 = vmul.f32 1.442695, %v4355_v48  ;;  %2903 = vadd.xlane.f32.xlu0 %v2902_v60 }
0x1526   :  { %5450 = vpow2.f32 %v2789_v54 }
0x1527   :  { %5452 = vpow2.f32 %v2787_v56 }
0x1530   :  { %v5451_v37 = vpop.eup %5450 }
0x1531   :  { %v5453_v38 = vpop.eup %5452  ;;  %v2792_v62 = vmul.f32 %v6336_v40, %v5451_v37 }
0x1532   :  { %v2791_v45 = vmul.f32 %v6342_v52, %v5453_v38 }
0x1533   :  { %v2796_v63 = vsel %vm473_vm7, %v2792_v62, 0.0 }
0x1534   :  { %v2793_v61 = vsel %vm473_vm7, %v2791_v45, 0.0 }
0x1535   :  { %2794 = vadd.xlane.f32.xlu0 %v2793_v61  ;;  %5309 = vrot.lane.b32.xlu1 %v6302_v47, %s5661_s26 }
0x1539   :  { %2797 = vadd.xlane.f32.xlu0 %v2796_v63  ;;  %5319 = vrot.lane.b32.xlu1 %v6306_v25, %s5662_s13 }
0x154f   :  { %5314 = vrot.lane.b32.xlu0 %v6357_v11, %s5661_s26 }
0x15b1   :  { %v2907_v57 = vpop.xlane.xlu1 %2906 }
0x15b2   :  { %v2909_v42 = vadd.f32 1e-06, %v2907_v57  ;;  %v2904_v51 = vpop.xlane.xlu0 %2903 }
0x15b3   :  { %v2908_v6 = vadd.f32 1e-06, %v2904_v51 }
0x15b4   :  { %5454 = vrcp.f32 %v2909_v42 }
0x15b5   :  { %5456 = vrcp.f32 %v2908_v6  ;;  %v5310_v41 = vpop.permute.xlu1 %5309 }
0x15b6   :  { %v5312_v44 = vunpack.i.h.bf16 %v5310_v41  ;;  %v5311_v7 = vunpack.i.l.bf16 %v5310_v41 }
0x15b8   :  { %v5086_v1 = vpack.c.bf16 %v5312_v44, %v5311_v7 }
0x15b9   :  { %v5320_v19 = vpop.permute.xlu1 %5319 }
0x15ba   :  { %5087 = vmatprep.subr.bf16.mxu0 %v5086_v1  ;;  %v5322_v28 = vunpack.i.h.bf16 %v5320_v19  ;;  %v5321_v31 = vunpack.i.l.bf16 %v5320_v19 }
0x15bb   :  { %5089 = vmatpush3.bf16.msra.mxu0 %v5086_v1 }
0x15bc   :  { %v5100_v36 = vpack.c.bf16 %v5322_v28, %v5321_v31 }
0x15be   :  { %v5455_v2 = vpop.eup %5454 }
0x15bf   :  { %v5457_v58 = vpop.eup %5456  ;;  %v2919_v9 = vmul.f32 0.09090909, %v5455_v2 }
0x15c0   :  { %v2918_v26 = vmul.f32 0.09090909, %v5457_v58 }
0x15c1   :  { %v2921_v16 = vmul.f32 %v2919_v9, %v2901_v43 }
0x15c2   :  { %v2795_v14 = vpop.xlane.xlu0 %2794  ;;  %v2920_v17 = vmul.f32 %v2918_v26, %v2900_v53 }
0x15c3   :  { %2926 = vrot.lane.b32.xlu0 %v2921_v16, %s5646_s3  ;;  %v2799_v39 = vadd.f32 1e-06, %v2795_v14 }
0x15c4   :  { %2924 = vrot.lane.b32.xlu1 %v2920_v17, %s5646_s3 }
0x15c5   :  { %5458 = vrcp.f32 %v2799_v39 }
0x15c6   :  { %v2798_v24 = vpop.xlane.xlu0 %2797 }
0x15c7   :  { %3158 = vrot.lane.b32.xlu0 %v6304_v13, %s5646_s3  ;;  %v2800_v22 = vadd.f32 1e-06, %v2798_v24 }
0x15c8   :  { %3156 = vrot.lane.b32.xlu1 %v6292_v15, %s5646_s3 }
0x15c9   :  { %5460 = vrcp.f32 %v2800_v22 }
0x15ca   :  { %v5315_v21 = vpop.permute.xlu0 %5314 }
0x15cb   :  { %v5317_v34 = vunpack.i.h.bf16 %v5315_v21  ;;  %v5316_v32 = vunpack.i.l.bf16 %v5315_v21  ;;  %3025 = vrot.lane.b32.xlu0 %v6294_v8, %s5662_s13 }
0x15cc   :  { %5324 = vrot.lane.b32.xlu1 %v6302_v47, %s5663_s22 }
0x15cd   :  { %v5090_v35 = vpack.c.bf16 %v5317_v34, %v5316_v32 }
0x15cf   :  { %5091 = vmatprep.subr.bf16.mxu0 %v5090_v35  ;;  %3029 = vrot.lane.b32.xlu0 %v6323_v33, %s5662_s13  ;;  %v5459_v49 = vpop.eup %5458 }
0x15d0   :  { %5093 = vmatpush3.bf16.msra.mxu0 %v5090_v35  ;;  %3027 = vrot.lane.b32.xlu1 %v6300_v50, %s5662_s13  ;;  %v2912_v43 = vmul.f32 0.90909094, %v5459_v49 }
0x15d1   :  { %5102 = vmatprep.subr.msk.bf16.mxu0 %vm5922_vm4, %v5100_v36 }
0x15d2   :  { %v2914_v53 = vmul.f32 %v2912_v43, %v2791_v45 }
0x15d3   :  { %v5461_v23 = vpop.eup %5460 }
0x15d4   :  { %3031 = vrot.lane.b32.xlu1 %v6329_v29, %s5662_s13  ;;  %v2913_v48 = vmul.f32 0.90909094, %v5461_v23 }
0x15d6   :  { %v2915_v55 = vmul.f32 %v2913_v48, %v2792_v62 }
0x1635   :  { %v2927_v54 = vpop.permute.xlu0 %2926 }
0x1636   :  { %v2925_v56 = vpop.permute.xlu1 %2924  ;;  %v2931_v37 = vsel %vm473_vm7, %v2915_v55, %v2927_v54 }
0x1637   :  { %v2930_v60 = vsel %vm473_vm7, %v2914_v53, %v2925_v56 }
0x1638   :  { %4815 = vmatprep.mubr.msk.f32.mxu0 %vm253_vm2, %v2930_v60 }
0x1639   :  { %v3159_v38 = vpop.permute.xlu0 %3158  ;;  %4816 = vmatmul.mubr.msk.f32.vlgmr.msra.gmra.mrb[28].mxu0 %vm253_vm2, %v2931_v37 }
0x163a   :  { %5105 = vmatpush3.bf16.xpose.msk.msra.mxu0 %vm5922_vm4, %v5100_v36  ;;  %v3157_v61 = vpop.permute.xlu1 %3156 }
0x163b   :  { %4832 = vmatprep.mubr.msk.f32.mxu0 %vm357_vm3, %v3157_v61 }
0x163d   :  { %v3026_v63 = vpop.permute.xlu0 %3025 }
0x163e   :  { %v5325_v45 = vpop.permute.xlu1 %5324  ;;  %4822 = vmatprep.mubr.msk.f32.mxu1 %vm357_vm3, %v3026_v63 }
0x163f   :  { %v5327_v62 = vunpack.i.h.bf16 %v5325_v45  ;;  %v5326_v57 = vunpack.i.l.bf16 %v5325_v45 }
0x1641   :  { %v5094_v42 = vpack.c.bf16 %v5327_v62, %v5326_v57  ;;  %4833 = vmatmul.mubr.msk.f32.vlgmr.msra.gmra.mrb[30].mxu0 %vm357_vm3, %v3159_v38  ;;  %v3030_v6 = vpop.permute.xlu0 %3029 }
0x1642   :  { %v3028_v51 = vpop.permute.xlu1 %3027 }
0x1643   :  { %5096 = vmatprep.subr.msk.bf16.mxu1 %vm5922_vm4, %v5094_v42 }
0x1644   :  { %5099 = vmatpush3.bf16.xpose.msk.msra.mxu1 %vm5922_vm4, %v5094_v42 }
0x1646   :  { %v3032_v41 = vpop.permute.xlu1 %3031 }
0x164b   :  { %4823 = vmatmul.mubr.msk.f32.vlgmr.msra.gmra.mrb[34].mxu1 %vm357_vm3, %v3028_v51 }
0x164c   :  { %4825 = vmatprep.mubr.msk.f32.mxu1 %vm357_vm3, %v3030_v6 }
0x164f   :  { %4826 = vmatmul.mubr.msk.f32.gmra.mrb[36].mxu1 %vm357_vm3, %v3032_v41 }
0x170c   :  { %v6451_v44 = vpop.f32.mrb[28].mxu0 }
0x170d   :  { %v6453_v7 = vpop.f32.mrb[29].mxu0 }
0x1714   :  { %v4834_v1 = vpop.f32.mrb[30].mxu0 }
0x1715   :  { %v4378_v2 = vclamps-f32 %v4834_v1, 5.0  ;;  %v3238_v58 = vpop.f32.mrb[31].mxu0 }
0x1716   :  { %v4377_v9 = vclamps-f32 %v3238_v58, 5.0 }
0x1717   :  { %v3253_v26 = vmul.f32 1.442695, %v4378_v2 }
0x1718   :  { %v3251_v14 = vmul.f32 1.442695, %v4377_v9 }
0x1719   :  { %5462 = vpow2.f32 %v3253_v26 }
0x171a   :  { %5464 = vpow2.f32 %v3251_v14 }
0x171e   :  { %v4824_v16 = vpop.f32.mrb[34].mxu1 }
0x171f   :  { %v3115_v17 = vpop.f32.mrb[35].mxu1  ;;  %v3135_v24 = vmul.f32 %v6336_v40, %v4824_v16 }
0x1720   :  { %v3134_v19 = vmul.f32 %v6342_v52, %v3115_v17 }
0x1722   :  { %v4827_v21 = vpop.f32.mrb[36].mxu1 }
0x1723   :  { %v5463_v28 = vpop.eup %5462  ;;  %v3137_v31 = vadd.f32 %v4827_v21, %v3135_v24  ;;  %v3125_v34 = vpop.f32.mrb[37].mxu1 }
0x1724   :  { %v5465_v32 = vpop.eup %5464  ;;  %v3136_v35 = vadd.f32 %v3134_v19, %v3125_v34  ;;  %v3256_v36 = vmul.f32 %v5463_v28, %v5968_v3 }
0x1725   :  { %v4372_v39 = vclamps-f32 %v3137_v31, 5.0  ;;  %v3255_v22 = vmul.f32 %v5465_v32, %v5971_v4 }
0x1726   :  { %v4371_v49 = vclamps-f32 %v3136_v35, 5.0  ;;  %v3260_v23 = vsel %vm473_vm7, %v3256_v36, 0.0 }
0x1727   :  { %v3144_v43 = vmul.f32 1.442695, %v4372_v39  ;;  %3261 = vadd.xlane.f32.xlu1 %v3260_v23  ;;  %v3257_v48 = vsel %vm473_vm7, %v3255_v22, 0.0 }
0x1728   :  { %v3142_v53 = vmul.f32 1.442695, %v4371_v49  ;;  %3258 = vadd.xlane.f32.xlu0 %v3257_v48 }
0x1729   :  { %5466 = vpow2.f32 %v3144_v43 }
0x172a   :  { %5468 = vpow2.f32 %v3142_v53 }
0x1733   :  { %v5467_v54 = vpop.eup %5466 }
0x1734   :  { %v5469_v55 = vpop.eup %5468  ;;  %v3147_v37 = vmul.f32 %v6336_v40, %v5467_v54 }
0x1735   :  { %v3146_v56 = vmul.f32 %v6342_v52, %v5469_v55 }
0x1736   :  { %v3151_v38 = vsel %vm473_vm7, %v3147_v37, 0.0 }
0x1737   :  { %v3148_v60 = vsel %vm473_vm7, %v3146_v56, 0.0 }
0x1738   :  { %5329 = vrot.lane.b32.xlu1 %v6302_v47, %s5664_s24  ;;  %3149 = vadd.xlane.f32.xlu0 %v3148_v60 }
0x173c   :  { %5339 = vrot.lane.b32.xlu1 %v6306_v25, %s6662_s1  ;;  %3152 = vadd.xlane.f32.xlu0 %v3151_v38 }
0x1752   :  { %5334 = vrot.lane.b32.xlu0 %v6357_v11, %s5664_s24 }
0x17b4   :  { %v3262_v61 = vpop.xlane.xlu1 %3261 }
0x17b5   :  { %v3264_v63 = vadd.f32 1e-06, %v3262_v61  ;;  %v3259_v45 = vpop.xlane.xlu0 %3258 }
0x17b6   :  { %v3263_v62 = vadd.f32 1e-06, %v3259_v45 }
0x17b7   :  { %5470 = vrcp.f32 %v3264_v63 }
0x17b8   :  { %5472 = vrcp.f32 %v3263_v62  ;;  %v5330_v57 = vpop.permute.xlu1 %5329 }
0x17b9   :  { %v5332_v42 = vunpack.i.h.bf16 %v5330_v57  ;;  %v5331_v51 = vunpack.i.l.bf16 %v5330_v57 }
0x17bb   :  { %v5106_v6 = vpack.c.bf16 %v5332_v42, %v5331_v51 }
0x17bc   :  { %v5340_v16 = vpop.permute.xlu1 %5339 }
0x17bd   :  { %5107 = vmatprep.subr.bf16.mxu1 %v5106_v6  ;;  %v5342_v24 = vunpack.i.h.bf16 %v5340_v16  ;;  %v5341_v19 = vunpack.i.l.bf16 %v5340_v16 }
0x17be   :  { %5109 = vmatpush3.bf16.msra.mxu1 %v5106_v6 }
0x17bf   :  { %v5120_v34 = vpack.c.bf16 %v5342_v24, %v5341_v19 }
0x17c1   :  { %v5471_v41 = vpop.eup %5470 }
0x17c2   :  { %v5473_v1 = vpop.eup %5472  ;;  %v3274_v2 = vmul.f32 0.09090909, %v5471_v41 }
0x17c3   :  { %v3273_v25 = vmul.f32 0.09090909, %v5473_v1 }
0x17c4   :  { %v3276_v58 = vmul.f32 %v3274_v2, %v3256_v36 }
0x17c5   :  { %v3150_v9 = vpop.xlane.xlu0 %3149  ;;  %v3275_v26 = vmul.f32 %v3273_v25, %v3255_v22 }
0x17c6   :  { %3281 = vrot.lane.b32.xlu0 %v3276_v58, %s5646_s3 }
0x17c7   :  { %3279 = vrot.lane.b32.xlu1 %v3275_v26, %s5646_s3 }
0x17c9   :  { %v3153_v14 = vpop.xlane.xlu0 %3152 }
0x17ca   :  { %3513 = vrot.lane.b32.xlu0 %v6304_v13, %s6663_s2 }
0x17cb   :  { %3511 = vrot.lane.b32.xlu1 %v6292_v15, %s6663_s2  ;;  %v3154_v15 = vadd.f32 1e-06, %v3150_v9 }
0x17cd   :  { %v5335_v17 = vpop.permute.xlu0 %5334  ;;  %5474 = vrcp.f32 %v3154_v15 }
0x17ce   :  { %3380 = vrot.lane.b32.xlu0 %v6294_v8, %s6662_s1  ;;  %v5337_v21 = vunpack.i.h.bf16 %v5335_v17  ;;  %v5336_v28 = vunpack.i.l.bf16 %v5335_v17  ;;  %v3155_v8 = vadd.f32 1e-06, %v3153_v14 }
0x17cf   :  { %5344 = vrot.lane.b32.xlu1 %v6302_v47, %s6664_s18 }
0x17d0   :  { %v5110_v31 = vpack.c.bf16 %v5337_v21, %v5336_v28  ;;  %5476 = vrcp.f32 %v3155_v8 }
0x17d2   :  { %3384 = vrot.lane.b32.xlu0 %v6323_v33, %s6662_s1  ;;  %5111 = vmatprep.subr.bf16.mxu1 %v5110_v31 }
0x17d3   :  { %3382 = vrot.lane.b32.xlu1 %v6300_v50, %s6662_s1  ;;  %5113 = vmatpush3.bf16.msra.mxu1 %v5110_v31 }
0x17d4   :  { %5122 = vmatprep.subr.msk.bf16.mxu1 %vm5922_vm4, %v5120_v34 }
0x17d7   :  { %3386 = vrot.lane.b32.xlu1 %v6329_v29, %s6662_s1  ;;  %v5475_v13 = vpop.eup %5474 }
0x17d8   :  { %v3267_v35 = vmul.f32 0.90909094, %v5475_v13 }
0x17da   :  { %v5477_v32 = vpop.eup %5476  ;;  %v3269_v33 = vmul.f32 %v3267_v35, %v3146_v56 }
0x17db   :  { %v3268_v36 = vmul.f32 0.90909094, %v5477_v32 }
0x17dd   :  { %v3270_v22 = vmul.f32 %v3268_v36, %v3147_v37 }
0x1838   :  { %v3282_v39 = vpop.permute.xlu0 %3281 }
0x1839   :  { %v3280_v49 = vpop.permute.xlu1 %3279  ;;  %v3286_v23 = vsel %vm473_vm7, %v3270_v22, %v3282_v39 }
0x183a   :  { %v3285_v50 = vsel %vm473_vm7, %v3269_v33, %v3280_v49 }
0x183b   :  { %4843 = vmatprep.mubr.msk.f32.mxu1 %vm253_vm2, %v3285_v50 }
0x183c   :  { %v3514_v43 = vpop.permute.xlu0 %3513  ;;  %4844 = vmatmul.mubr.msk.f32.vlgmr.msra.gmra.mrb[38].mxu1 %vm253_vm2, %v3286_v23 }
0x183d   :  { %5125 = vmatpush3.bf16.xpose.msk.msra.mxu1 %vm5922_vm4, %v5120_v34  ;;  %v3512_v29 = vpop.permute.xlu1 %3511 }
0x183e   :  { %4860 = vmatprep.mubr.msk.f32.mxu1 %vm357_vm3, %v3512_v29 }
0x1840   :  { %v3381_v48 = vpop.permute.xlu0 %3380 }
0x1841   :  { %v5345_v53 = vpop.permute.xlu1 %5344  ;;  %4850 = vmatprep.mubr.msk.f32.mxu0 %vm357_vm3, %v3381_v48 }
0x1842   :  { %v5347_v54 = vunpack.i.h.bf16 %v5345_v53  ;;  %v5346_v55 = vunpack.i.l.bf16 %v5345_v53 }
0x1844   :  { %v5114_v56 = vpack.c.bf16 %v5347_v54, %v5346_v55  ;;  %4861 = vmatmul.mubr.msk.f32.vlgmr.msra.gmra.mrb[40].mxu1 %vm357_vm3, %v3514_v43  ;;  %v3385_v37 = vpop.permute.xlu0 %3384 }
0x1845   :  { %v3383_v60 = vpop.permute.xlu1 %3382 }
0x1846   :  { %5116 = vmatprep.subr.msk.bf16.mxu0 %vm5922_vm4, %v5114_v56 }
0x1847   :  { %5119 = vmatpush3.bf16.xpose.msk.msra.mxu0 %vm5922_vm4, %v5114_v56 }
0x1849   :  { %v3387_v38 = vpop.permute.xlu1 %3386 }
0x184e   :  { %4851 = vmatmul.mubr.msk.f32.vlgmr.msra.gmra.mrb[32].mxu0 %vm357_vm3, %v3383_v60 }
0x184f   :  { %4853 = vmatprep.mubr.msk.f32.mxu0 %vm357_vm3, %v3385_v37 }
0x1852   :  { %4854 = vmatmul.mubr.msk.f32.gmra.mrb[34].mxu0 %vm357_vm3, %v3387_v38 }
0x190f   :  { %v6505_v61 = vpop.f32.mrb[38].mxu1 }
0x1910   :  { %v3371_v63 = vpop.f32.mrb[39].mxu1 }
0x1917   :  { %v4862_v45 = vpop.f32.mrb[40].mxu1 }
0x1918   :  { %v4394_v62 = vclamps-f32 %v4862_v45, 5.0  ;;  %v3593_v57 = vpop.f32.mrb[41].mxu1 }
0x1919   :  { %v4393_v42 = vclamps-f32 %v3593_v57, 5.0 }
0x191a   :  { %v3608_v51 = vmul.f32 1.442695, %v4394_v62 }
0x191b   :  { %v3606_v6 = vmul.f32 1.442695, %v4393_v42 }
0x191c   :  { %5478 = vpow2.f32 %v3608_v51 }
0x191d   :  { %5480 = vpow2.f32 %v3606_v6 }
0x1921   :  { %v4852_v46 = vpop.f32.mrb[32].mxu0 }
0x1922   :  { %v3470_v41 = vpop.f32.mrb[33].mxu0  ;;  %v3490_v1 = vmul.f32 %v6336_v40, %v4852_v46 }
0x1923   :  { %v3489_v2 = vmul.f32 %v6342_v52, %v3470_v41 }
0x1925   :  { %v4855_v25 = vpop.f32.mrb[34].mxu0 }
0x1926   :  { %v5479_v58 = vpop.eup %5478  ;;  %v3492_v9 = vadd.f32 %v4855_v25, %v3490_v1  ;;  %v3480_v26 = vpop.f32.mrb[35].mxu0  ;;  %v4398_v1 = vld [vmem:[%s6640_s7 + $0x28] sm:$0xff] }
0x1927   :  { %v5481_v14 = vpop.eup %5480  ;;  %v3491_v16 = vadd.f32 %v3489_v2, %v3480_v26  ;;  %v3611_v17 = vmul.f32 %v5479_v58, %v5968_v3  ;;  %v4399_v2 = vld [vmem:[%s6640_s7 + $0x30] sm:$0xff]  ;;  %v4400_v58 = vld [vmem:[%s6640_s7 + $0x38] sm:$0xff] }
0x1928   :  { %v4388_v24 = vclamps-f32 %v3492_v9, 5.0  ;;  %v3610_v19 = vmul.f32 %v5481_v14, %v5971_v4  ;;  %v5138_v9 = vpack.c.bf16 %v4400_v58, %v4399_v2 }
0x1929   :  { %v4387_v21 = vclamps-f32 %v3491_v16, 5.0  ;;  %v3615_v28 = vsel %vm473_vm7, %v3611_v17, 0.0 }
0x192a   :  { %v3499_v31 = vmul.f32 1.442695, %v4388_v24  ;;  %3616 = vadd.xlane.f32.xlu1 %v3615_v28  ;;  %v3612_v34 = vsel %vm473_vm7, %v3610_v19, 0.0 }
0x192b   :  { %v3497_v15 = vmul.f32 1.442695, %v4387_v21  ;;  %3613 = vadd.xlane.f32.xlu0 %v3612_v34 }
0x192c   :  { %5482 = vpow2.f32 %v3499_v31 }
0x192d   :  { %5484 = vpow2.f32 %v3497_v15 }
0x1936   :  { %v5483_v8 = vpop.eup %5482 }
0x1937   :  { %v5485_v13 = vpop.eup %5484  ;;  %v3502_v35 = vmul.f32 %v6336_v40, %v5483_v8 }
0x1938   :  { %v3501_v32 = vmul.f32 %v6342_v52, %v5485_v13 }
0x1939   :  { %v3506_v4 = vsel %vm473_vm7, %v3502_v35, 0.0 }
0x193a   :  { %v3503_v3 = vsel %vm473_vm7, %v3501_v32, 0.0 }
0x193b   :  { %5349 = vrot.lane.b32.xlu1 %v6302_v47, %s6665_s20  ;;  %3504 = vadd.xlane.f32.xlu0 %v3503_v3 }
0x193f   :  { %3507 = vadd.xlane.f32.xlu0 %v3506_v4 }
0x1955   :  { %5354 = vrot.lane.b32.xlu0 %v6357_v11, %s6665_s20 }
0x1959   :  { %3737 = vrot.lane.b32.xlu0 %v6453_v7, %s6663_s2 }
0x195d   :  { %3745 = vrot.lane.b32.xlu0 %v3371_v63, %s5646_s3 }
0x19b7   :  { %v3617_v52 = vpop.xlane.xlu1 %3616 }
0x19b8   :  { %v3619_v36 = vadd.f32 1e-06, %v3617_v52  ;;  %v3614_v33 = vpop.xlane.xlu0 %3613 }
0x19b9   :  { %v3618_v39 = vadd.f32 1e-06, %v3614_v33 }
0x19ba   :  { %5486 = vrcp.f32 %v3619_v36 }
0x19bb   :  { %5488 = vrcp.f32 %v3618_v39  ;;  %v5350_v40 = vpop.permute.xlu1 %5349 }
0x19bc   :  { %v5352_v47 = vunpack.i.h.bf16 %v5350_v40  ;;  %v5351_v22 = vunpack.i.l.bf16 %v5350_v40 }
0x19be   :  { %v5126_v49 = vpack.c.bf16 %v5352_v47, %v5351_v22 }
0x19c0   :  { %5127 = vmatprep.subr.bf16.mxu0 %v5126_v49 }
0x19c1   :  { %5129 = vmatpush3.bf16.msra.mxu0 %v5126_v49 }
0x19c4   :  { %v5487_v50 = vpop.eup %5486 }
0x19c5   :  { %v5489_v23 = vpop.eup %5488  ;;  %v3629_v43 = vmul.f32 0.09090909, %v5487_v50 }
0x19c6   :  { %v3628_v11 = vmul.f32 0.09090909, %v5489_v23 }
0x19c7   :  { %v3631_v53 = vmul.f32 %v3629_v43, %v3611_v17 }
0x19c8   :  { %v3505_v29 = vpop.xlane.xlu0 %3504  ;;  %v3630_v7 = vmul.f32 %v3628_v11, %v3610_v19 }
0x19c9   :  { %v3509_v37 = vadd.f32 1e-06, %v3505_v29  ;;  %v3904_v29 = vld [vmem:[#allocation6 + $0x20] sm:$0xff] }
0x19ca   :  { %3634 = vrot.lane.b32.xlu1 %v3630_v7, %s5646_s3  ;;  %v3905_v7 = vld [vmem:[#allocation6 + $0x28] sm:$0xff] }
0x19cb   :  { %5490 = vrcp.f32 %v3509_v37  ;;  %v4411_v37 = vld [vmem:[%s6645_s12 + $0x50] sm:$0xff] }
0x19cc   :  { %v3508_v48 = vpop.xlane.xlu0 %3507 }
0x19cd   :  { %v3510_v38 = vadd.f32 1e-06, %v3508_v48  ;;  %v5142_v48 = vpack.c.bf16 %v3905_v7, %v3904_v29  ;;  %v4137_v29 = vld [vmem:[%s6647_s14] sm:$0xff]  ;;  %v4138_v7 = vld [vmem:[%s6647_s14 + $0x8] sm:$0xff] }
0x19ce   :  { %3636 = vrot.lane.b32.xlu1 %v3631_v53, %s5646_s3  ;;  %v3906_v53 = vld [vmem:[#allocation6 + $0x30] sm:$0xff] }
0x19cf   :  { %5492 = vrcp.f32 %v3510_v38 }
0x19d0   :  { %v5355_v54 = vpop.permute.xlu0 %5354 }
0x19d1   :  { %v5357_v55 = vunpack.i.h.bf16 %v5355_v54  ;;  %v5356_v56 = vunpack.i.l.bf16 %v5355_v54  ;;  %v3907_v54 = vld [vmem:[#allocation6 + $0x38] sm:$0xff] }
0x19d2   :  { %3739 = vrot.lane.b32.xlu1 %v6451_v44, %s6663_s2 }
0x19d3   :  { %v5130_v60 = vpack.c.bf16 %v5357_v55, %v5356_v56  ;;  %v5146_v55 = vpack.c.bf16 %v3907_v54, %v3906_v53  ;;  %v4409_v56 = vld [vmem:[%s6645_s12 + $0x40] sm:$0xff]  ;;  %v4139_v53 = vld [vmem:[%s6647_s14 + $0x10] sm:$0xff]  ;;  %v4140_v54 = vld [vmem:[%s6647_s14 + $0x18] sm:$0xff] }
0x19d4   :  { %v3738_v17 = vpop.permute.xlu0 %3737 }
0x19d5   :  { %5131 = vmatprep.subr.bf16.mxu0 %v5130_v60  ;;  %v5491_v63 = vpop.eup %5490  ;;  %v3759_v21 = vsel %vm357_vm3, %v6399_v12, %v3738_v17  ;;  %v4404_v12 = vld [vmem:[%s6641_s8 + $0x1] ss:$0 sm:$0xff] }
0x19d6   :  { %3747 = vrot.lane.b32.xlu1 %v6505_v61, %s5646_s3  ;;  %5133 = vmatpush3.bf16.msra.mxu0 %v5130_v60  ;;  %v3622_v45 = vmul.f32 0.90909094, %v5491_v63  ;;  %v4397_v61 = vld [vmem:[%s6640_s7 + $0x20] sm:$0xff]  ;;  %v4410_v60 = vld [vmem:[%s6645_s12 + $0x48] sm:$0xff]  ;;  %v4412_v63 = vld [vmem:[%s6645_s12 + $0x58] sm:$0xff] }
0x19d7   :  { %v5134_v25 = vpack.c.bf16 %v4398_v1, %v4397_v61  ;;  %5143 = vmatprep.subr.bf16.mxu0 %v5142_v48  ;;  %v5150_v38 = vpack.c.bf16 %v4410_v60, %v4409_v56  ;;  %v6588_v1 = vld [vmem:[%s6642_s9 + $0x4] sm:$0xf] }
0x19d8   :  { %v3624_v57 = vmul.f32 %v3622_v45, %v3501_v32  ;;  %v3746_v19 = vpop.permute.xlu0 %3745  ;;  %v5154_v45 = vpack.c.bf16 %v4412_v63, %v4411_v37  ;;  %v3894_v2 = vrot.slane %v6588_v1, %v5897_v27  ;;  %v4416_v27 = vld [vmem:[%s6645_s12 + $0x78] sm:$0xff] }
0x19d9   :  { %v5493_v62 = vpop.eup %5492  ;;  %5135 = vmatprep.subr.bf16.mxu1 %v5134_v25  ;;  %v3761_v31 = vsel %vm473_vm7, %v3759_v21, %v3746_v19  ;;  %v4415_v21 = vld [vmem:[%s6645_s12 + $0x70] sm:$0xff] }
0x19da   :  { %v3623_v42 = vmul.f32 0.90909094, %v5493_v62  ;;  %5137 = vmatpush3.bf16.msra.mxu1 %v5134_v25  ;;  %v4413_v62 = vld [vmem:[%s6645_s12 + $0x60] sm:$0xff] }
0x19db   :  { %5139 = vmatprep.subr.bf16.mxu1 %v5138_v9 }
0x19dc   :  { %v3625_v44 = vmul.f32 %v3623_v42, %v3502_v35 }
0x19de   :  { %5141 = vmatpush3.bf16.msra.mxu1 %v5138_v9  ;;  %v3900_v9 = vrot.slane %v6588_v1, %v5904_v30  ;;  %v4406_v30 = vld [vmem:[#allocation7 + $0x1] ss:$0 sm:$0xff] }
0x19df   :  { %5151 = vmatprep.subr.bf16.mxu1 %v5150_v38 }
0x1a3c   :  { %v3635_v51 = vpop.permute.xlu1 %3634 }
0x1a3d   :  { %v3640_v6 = vsel %vm473_vm7, %v3624_v57, %v3635_v51  ;;  %v4414_v57 = vld [vmem:[%s6645_s12 + $0x68] sm:$0xff] }
0x1a3e   :  { %4871 = vmatprep.mubr.msk.f32.mxu0 %vm253_vm2, %v3640_v6  ;;  %v5158_v42 = vpack.c.bf16 %v4414_v57, %v4413_v62  ;;  %v4128_v62 = vrot.slane %v6588_v1, %v5883_v20 }
0x1a40   :  { %v3637_v46 = vpop.permute.xlu1 %3636 }
0x1a41   :  { %v3641_v41 = vsel %vm473_vm7, %v3625_v44, %v3637_v46 }
0x1a42   :  { %4872 = vmatmul.mubr.msk.f32.vlgmr.msra.gmra.mrb[36].mxu0 %vm253_vm2, %v3641_v41 }
0x1a43   :  { %5145 = vmatpush3.bf16.msra.mxu0 %v5142_v48  ;;  %v5166_v48 = vpack.c.bf16 %v4138_v7, %v4137_v29 }
0x1a44   :  { %v3740_v16 = vpop.permute.xlu1 %3739  ;;  %5147 = vmatprep.subr.bf16.mxu0 %v5146_v55 }
0x1a45   :  { %v3760_v34 = vsel %vm357_vm3, %v6397_v10, %v3740_v16 }
0x1a47   :  { %5149 = vmatpush3.bf16.msra.mxu0 %v5146_v55  ;;  %v5170_v55 = vpack.c.bf16 %v4140_v54, %v4139_v53 }
0x1a48   :  { %v3748_v24 = vpop.permute.xlu1 %3747  ;;  %5167 = vmatprep.subr.bf16.mxu0 %v5166_v48 }
0x1a49   :  { %v3762_v8 = vsel %vm473_vm7, %v3760_v34, %v3748_v24 }
0x1b15   :  { %v4873_v26 = vpop.f32.mrb[36].mxu0 }
0x1b16   :  { %3755 = vrot.lane.b32.xlu1 %v4873_v26, %s5659_s23  ;;  %v3726_v14 = vpop.f32.mrb[37].mxu0 }
0x1b17   :  { %3753 = vrot.lane.b32.xlu0 %v3726_v14, %s5659_s23 }
0x1b88   :  { %v3756_v28 = vpop.permute.xlu1 %3755 }
0x1b89   :  { %v3754_v15 = vpop.permute.xlu0 %3753  ;;  %v3764_v32 = vsel %vm1813_vm8, %v3762_v8, %v3756_v28  ;;  %v5162_v28 = vpack.c.bf16 %v4416_v27, %v4415_v21 }
0x1b8a   :  { %v3763_v13 = vsel %vm1813_vm8, %v3761_v31, %v3754_v15 }
0x1b8b   :  { %4882 = vmatprep.mubr.msk.f32.mxu1 %vm253_vm2, %v3763_v13 }
0x1b8c   :  { %4883 = vmatmul.mubr.msk.f32.vlgmr.msra.gmra.mrb[42].mxu1 %vm253_vm2, %v3764_v32 }
0x1b8d   :  { %5153 = vmatpush3.bf16.msra.mxu1 %v5150_v38 }
0x1b8e   :  { %5155 = vmatprep.subr.bf16.mxu1 %v5154_v45 }
0x1b91   :  { %5157 = vmatpush3.bf16.msra.mxu1 %v5154_v45 }
0x1b92   :  { %5159 = vmatprep.subr.bf16.mxu1 %v5158_v42 }
0x1b95   :  { %5161 = vmatpush3.bf16.msra.mxu1 %v5158_v42 }
0x1b96   :  { %5163 = vmatprep.subr.bf16.mxu1 %v5162_v28 }
0x1b99   :  { %5165 = vmatpush3.bf16.msra.mxu1 %v5162_v28 }
0x1c5f   :  { %v4884_v3 = vpop.f32.mrb[42].mxu1 }
0x1c60   :  { %v3852_v35 = vadd.f32 %v4884_v3, %v6282_v5  ;;  %v3842_v4 = vpop.f32.mrb[43].mxu1  ;;  %v4417_v3 = vld [vmem:[#allocation9 + $0x1] ss:$0 sm:$0xff] }
0x1c61   :  { %v3851_v10 = vadd.f32 %v3842_v4, %v6277_v0 }
0x1c62   :  { %v3862_v52 = vadd.f32 %v4404_v12, %v3852_v35 }
0x1c63   :  { %v3861_v36 = vadd.f32 %v4404_v12, %v3851_v10 }
0x1c64   :  { %v3868_v33 = vsel %vm253_vm2, %v3862_v52, 0.0 }
0x1c65   :  { %3869 = vadd.xlane.f32.xlu1 %v3868_v33  ;;  %v3865_v39 = vsel %vm253_vm2, %v3861_v36, 0.0 }
0x1c66   :  { %3866 = vadd.xlane.f32.xlu0 %v3865_v39 }
0x1cf2   :  { %v3870_v40 = vpop.xlane.xlu1 %3869 }
0x1cf3   :  { %v3872_v47 = vmul.f32 0.03125, %v3870_v40  ;;  %v3867_v22 = vpop.xlane.xlu0 %3866 }
0x1cf4   :  { %v3871_v49 = vmul.f32 0.03125, %v3867_v22 }
0x1cf5   :  { %v3874_v50 = vsub.f32 %v3862_v52, %v3872_v47 }
0x1cf6   :  { %v3873_v23 = vsub.f32 %v3861_v36, %v3871_v49 }
0x1cf7   :  { %v3876_v43 = vmul.f32 %v3874_v50, %v3874_v50 }
0x1cf8   :  { %v3875_v11 = vmul.f32 %v3873_v23, %v3873_v23 }
0x1cf9   :  { %v3880_v0 = vsel %vm253_vm2, %v3876_v43, 0.0 }
0x1cfa   :  { %v3877_v5 = vsel %vm253_vm2, %v3875_v11, 0.0 }
0x1cfb   :  { %3878 = vadd.xlane.f32.xlu0 %v3877_v5 }
0x1cff   :  { %3881 = vadd.xlane.f32.xlu0 %v3880_v0 }
0x1d88   :  { %v3879_v51 = vpop.xlane.xlu0 %3878 }
0x1d89   :  { %v3883_v6 = vmul.f32 0.03125, %v3879_v51 }
0x1d8b   :  { %v3885_v44 = vadd.f32 1e-05, %v3883_v6 }
0x1d8c   :  { %v3882_v46 = vpop.xlane.xlu0 %3881 }
0x1d8d   :  { %5494 = vrsqrt.f32 %v3885_v44  ;;  %v3884_v41 = vmul.f32 0.03125, %v3882_v46  ;;  %v4134_v44 = vrot.slane %v6588_v1, %v2179_v59 }
0x1d8f   :  { %v3886_v61 = vadd.f32 1e-05, %v3884_v41 }
0x1d91   :  { %5496 = vrsqrt.f32 %v3886_v61 }
0x1d97   :  { %v5495_v25 = vpop.eup %5494 }
0x1d98   :  { %v3889_v58 = vmul.f32 %v5495_v25, %v3873_v23  ;;  %v4420_v25 = vld [vmem:[#allocation10] ss:$0 sm:$0xff] }
0x1d9a   :  { %v3895_v26 = vmul.f32 %v3894_v2, %v3889_v58 }
0x1d9b   :  { %v5497_v14 = vpop.eup %5496 }
0x1d9c   :  { %v3890_v16 = vmul.f32 %v5497_v14, %v3874_v50  ;;  %v3901_v17 = vadd.f32 %v3900_v9, %v3895_v26 }
0x1d9e   :  { %v3896_v24 = vmul.f32 %v3894_v2, %v3890_v16  ;;  %4893 = vmatprep.mubr.msk.f32.mxu0 %vm253_vm2, %v3901_v17 }
0x1da0   :  { %v3902_v19 = vadd.f32 %v3900_v9, %v3896_v24 }
0x1da2   :  { %4894 = vmatmul.mubr.msk.f32.vlgmr.msra.gmra.mrb[38].mxu0 %vm253_vm2, %v3902_v19 }
0x1da3   :  { %5169 = vmatpush3.bf16.msra.mxu0 %v5166_v48 }
0x1da4   :  { %5171 = vmatprep.subr.bf16.mxu0 %v5170_v55 }
0x1da7   :  { %5173 = vmatpush3.bf16.msra.mxu0 %v5170_v55 }
0x1e75   :  { %v4895_v31 = vpop.f32.mrb[38].mxu0 }
0x1e76   :  { %v3994_v34 = vadd.f32 %v4895_v31, %v4406_v30  ;;  %v3988_v15 = vpop.f32.mrb[39].mxu0 }
0x1e77   :  { %v3989_v8 = vadd.f32 %v4406_v30, %v3988_v15 }
0x1e78   :  { %v3998_v32 = vmax.f32 %v3994_v34, 0.0 }
0x1e79   :  { %v3997_v13 = vmax.f32 %v3989_v8, 0.0 }
0x1e7b   :  { %4912 = vmatprep.mubr.msk.f32.mxu1 %vm2061_vm9, %v3997_v13 }
0x1e7c   :  { %4913 = vmatmul.mubr.msk.f32.vlgmr.msra.gmra.mrb[44].mxu1 %vm2061_vm9, %v3998_v32 }
0x1f4f   :  { %v4914_v12 = vpop.f32.mrb[44].mxu1 }
0x1f50   :  { %v4094_v35 = vadd.f32 %v4914_v12, %v4417_v3  ;;  %v4088_v4 = vpop.f32.mrb[45].mxu1 }
0x1f51   :  { %v4089_v10 = vadd.f32 %v4417_v3, %v4088_v4 }
0x1f52   :  { %v4098_v52 = vadd.f32 %v4094_v35, %v3902_v19 }
0x1f53   :  { %v4097_v36 = vadd.f32 %v4089_v10, %v3901_v17 }
0x1f54   :  { %v4102_v33 = vsel %vm253_vm2, %v4098_v52, 0.0 }
0x1f55   :  { %4103 = vadd.xlane.f32.xlu0 %v4102_v33  ;;  %v4099_v39 = vsel %vm253_vm2, %v4097_v36, 0.0 }
0x1f56   :  { %4100 = vadd.xlane.f32.xlu1 %v4099_v39 }
0x1fe2   :  { %v4104_v40 = vpop.xlane.xlu0 %4103 }
0x1fe3   :  { %v4106_v47 = vmul.f32 0.03125, %v4104_v40  ;;  %v4101_v22 = vpop.xlane.xlu1 %4100 }
0x1fe4   :  { %v4105_v49 = vmul.f32 0.03125, %v4101_v22 }
0x1fe5   :  { %v4108_v50 = vsub.f32 %v4098_v52, %v4106_v47 }
0x1fe6   :  { %v4107_v23 = vsub.f32 %v4097_v36, %v4105_v49 }
0x1fe7   :  { %v4110_v11 = vmul.f32 %v4108_v50, %v4108_v50 }
0x1fe8   :  { %v4109_v5 = vmul.f32 %v4107_v23, %v4107_v23 }
0x1fe9   :  { %v4114_v43 = vsel %vm253_vm2, %v4110_v11, 0.0 }
0x1fea   :  { %4115 = vadd.xlane.f32.xlu0 %v4114_v43  ;;  %v4111_v0 = vsel %vm253_vm2, %v4109_v5, 0.0 }
0x1feb   :  { %4112 = vadd.xlane.f32.xlu1 %v4111_v0 }
0x2077   :  { %v4116_v56 = vpop.xlane.xlu0 %4115 }
0x2078   :  { %v4118_v60 = vmul.f32 0.03125, %v4116_v56  ;;  %v4113_v37 = vpop.xlane.xlu1 %4112 }
0x2079   :  { %v4117_v38 = vmul.f32 0.03125, %v4113_v37 }
0x207a   :  { %v4120_v63 = vadd.f32 1e-05, %v4118_v60 }
0x207b   :  { %v4119_v45 = vadd.f32 1e-05, %v4117_v38 }
0x207c   :  { %5498 = vrsqrt.f32 %v4120_v63 }
0x207d   :  { %5500 = vrsqrt.f32 %v4119_v45 }
0x2086   :  { %v5499_v57 = vpop.eup %5498 }
0x2087   :  { %v5501_v42 = vpop.eup %5500  ;;  %v4124_v51 = vmul.f32 %v5499_v57, %v4108_v50 }
0x2088   :  { %v4123_v6 = vmul.f32 %v5501_v42, %v4107_v23 }
0x2089   :  { %v4130_v46 = vmul.f32 %v4128_v62, %v4124_v51 }
0x208a   :  { %v4129_v41 = vmul.f32 %v4128_v62, %v4123_v6 }
0x208b   :  { %v4136_v2 = vadd.f32 %v4134_v44, %v4130_v46 }
0x208c   :  { %v4135_v61 = vadd.f32 %v4134_v44, %v4129_v41 }
0x208e   :  { %4923 = vmatprep.mubr.msk.f32.mxu0 %vm253_vm2, %v4135_v61 }
0x208f   :  { %4924 = vmatmul.mubr.msk.f32.vlgmr.msra.gmra.mrb[40].mxu0 %vm253_vm2, %v4136_v2 }
0x2162   :  { %v4925_v58 = vpop.f32.mrb[40].mxu0 }
0x2163   :  { %v4226_v20 = vadd.f32 %v4925_v58, %v4420_v25  ;;  %v4220_v9 = vpop.f32.mrb[41].mxu0 }
0x2164   :  { %v4221_v26 = vadd.f32 %v4420_v25, %v4220_v9 }
0x2165   :  { %4231 = vst.msk [vmem:[%s6649_s16 + $0x8] sm:$0xff] %vm4229_vm10, %v4226_v20 }
0x2166   :  { %4230 = vst.msk [vmem:[%s6649_s16] sm:$0xff] %vm4229_vm10, %v4221_v26 }
0x2167   :  { %4236 = vsyncpa [#allocation3], 1 }
0x2168   :  { %4237 = vsyncpa [#allocation5], 1 }
0x2169   :  { %4238 = vsyncpa [#allocation8], 1 }
0x216a   :  { %4239 = vsyncpa [#allocation11], 1 }

</bundles_post_ra>
